<compile_context>
chip_gen: v7x
topology: tpu7x:2x2x1
jax: 0.10.0
libtpu: 0.0.40
codegen_flags: <defaults>
</compile_context>

<pallas_src>
import functools

import numpy as np
import jax
import jax.numpy as jnp
from jax.experimental import pallas as pl
from jax.experimental.pallas import tpu as pltpu

LOOPS = [[2, 16, 1], [3, 24, 2], [6, 48, 4], [6, 64, 5],
         [6, 96, 5], [3, 160, 2], [2, 320, 1]]
UP_SIZES = [(300, 300), (150, 150), (75, 75), (38, 38),
            (19, 19), (10, 10), (5, 5), (3, 3)]


def _vmem_limit_bytes():
    # Generation-aware scoped-VMEM budget: stay well below v7x's 64 MiB per
    # TensorCore while allowing a bit more headroom on 128 MiB parts (v5e/v6e).
    try:
        cap = pltpu.get_tpu_info().vmem_capacity_bytes
    except Exception:
        cap = 64 * 1024 * 1024
    return int(min(max(cap // 2, 32 * 1024 * 1024), 64 * 1024 * 1024))


VMEM_LIMIT = _vmem_limit_bytes()


def _largest_divisor(n, cap):
    for t in range(min(cap, n), 0, -1):
        if n % t == 0:
            return t
    return 1


def _cparams(semantics):
    return pltpu.CompilerParams(dimension_semantics=semantics,
                                vmem_limit_bytes=VMEM_LIMIT)


# ---------------------------------------------------------------------------
# Pallas kernels
# ---------------------------------------------------------------------------

def _mm_kernel(x_ref, w_ref, b_ref, o_ref, *, relu):
    # 1x1 conv + folded BN (+ ReLU): o = act(x @ w + b)
    acc = jnp.dot(x_ref[...], w_ref[...], preferred_element_type=jnp.float32)
    acc = acc + b_ref[...]
    if relu:
        acc = jnp.maximum(acc, 0.0)
    o_ref[...] = acc


def _dw_s1_kernel(xs_ref, w_ref, b_ref, o_ref, *, relu, residual, rps):
    # stride-1 depthwise 3x3 + folded BN (+ReLU / + x residual), lane-packed:
    #   xs_ref: (3, 1, H+2, W*C)  -- 3 kx-shifted zero-padded copies, VMEM-resident
    #   w_ref : (9, W*C)  (per-tap weight tiled along W)
    #   b_ref : (1, W*C)
    #   o_ref : (1, H, W*C)
    # Each step computes `rps` dense output rows with 9 aligned slab MACs.
    H = o_ref.shape[1]
    WC = o_ref.shape[2]
    b = b_ref[...]
    nsteps = pl.cdiv(H, rps)

    def step(s, carry):
        r0 = jnp.minimum(s * rps, H - rps)   # clamp: last group may overlap
        acc = jnp.zeros((rps, WC), jnp.float32)
        for ky in range(3):
            for kx in range(3):
                acc = acc + (xs_ref[kx, 0, pl.ds(r0 + ky, rps), :]
                             * w_ref[3 * ky + kx][None, :])
        acc = acc + b
        if relu:
            acc = jnp.maximum(acc, 0.0)
        if residual:
            # kx=1 copy at row r+1 is exactly the unpadded input row r.
            acc = acc + xs_ref[1, 0, pl.ds(r0 + 1, rps), :]
        o_ref[0, pl.ds(r0, rps), :] = acc
        return carry

    jax.lax.fori_loop(0, nsteps, step, None)


def _dw_s2_kernel(p_ref, w_ref, b_ref, o_ref, *, relu, rps):
    # stride-2 depthwise 3x3 from 9 pre-extracted, lane-packed taps:
    #   p_ref: (9, 1, th, Wo*C), o_ref: (1, th, Wo*C).  All-static addressing.
    th = o_ref.shape[1]
    WC = o_ref.shape[2]
    b = b_ref[...]
    for g in range(pl.cdiv(th, rps)):        # static unroll over 8-row groups
        r0 = min(g * rps, th - rps)
        acc = jnp.zeros((rps, WC), jnp.float32)
        for k in range(9):
            acc = acc + p_ref[k, 0, r0:r0 + rps, :] * w_ref[k][None, :]
        acc = acc + b
        if relu:
            acc = jnp.maximum(acc, 0.0)
        o_ref[0, r0:r0 + rps, :] = acc


def _mbconv_kernel(xp_ref, we_ref, be_ref, wd_ref, bd_ref, wp_ref, bp_ref,
                   o_ref, e_ref):
    # Fused InvertedResidual (expand 1x1 -> dw 3x3 s1 -> project 1x1 + x).
    # The 6x-expanded activation for one row tile lives only in VMEM (e_ref).
    i = pl.program_id(1)
    th = o_ref.shape[1]
    W = o_ref.shape[2]
    Wp = W + 2
    Hp = xp_ref.shape[1]
    Ce = wd_ref.shape[1]
    r0 = i * th

    # the dw conv pads the *expanded* activation with zeros, so the expansion
    # of padded rows/cols must be masked back to zero.
    col = jax.lax.broadcasted_iota(jnp.int32, (Wp, 1), 0)
    colmask = jnp.logical_and(col >= 1, col <= W).astype(jnp.float32)
    we = we_ref[...]
    be = be_ref[...]

    def expand_row(rr, carry):
        g = r0 + rr
        rowmask = jnp.where(jnp.logical_or(g == 0, g == Hp - 1), 0.0, 1.0)
        e = jnp.dot(xp_ref[0, g], we, preferred_element_type=jnp.float32) + be
        e = jnp.maximum(e, 0.0)
        e_ref[rr] = e * (colmask * rowmask)
        return carry

    jax.lax.fori_loop(0, th + 2, expand_row, None)

    wd = wd_ref[...]
    bd = bd_ref[...]
    wp = wp_ref[...]
    bp = bp_ref[...]

    def out_row(rr, carry):
        acc = jnp.zeros((W, Ce), jnp.float32)
        for ky in range(3):
            for kx in range(3):
                acc = acc + (e_ref[rr + ky, kx:kx + W, :]
                             * wd[3 * ky + kx][None, :])
        acc = jnp.maximum(acc + bd, 0.0)
        out = jnp.dot(acc, wp, preferred_element_type=jnp.float32) + bp
        out = out + xp_ref[0, r0 + rr + 1, 1:1 + W, :]     # residual = x
        o_ref[0, rr] = out
        return carry

    jax.lax.fori_loop(0, th, out_row, None)


def _upsample_add_kernel(x_ref, aw_ref, y_ref, o_ref, *, src_h, dst_h):
    # bilinear (align_corners=True) upsample fused with `x += y`: per output
    # row, a 2-tap lerp over source rows then one matmul with the dense W-axis
    # interpolation matrix.
    i = pl.program_id(1)
    t_oh = o_ref.shape[1]
    aw = aw_ref[...]                      # (out_w, W)
    for rr in range(t_oh):
        r = i * t_oh + rr
        if src_h == 1 or dst_h == 1:
            row = x_ref[0, 0]
        else:
            num = r * (src_h - 1)
            h0 = jnp.minimum(num // (dst_h - 1), src_h - 2)
            f = (num.astype(jnp.float32) / float(dst_h - 1)
                 - h0.astype(jnp.float32))
            x0 = x_ref[0, h0]
            x1 = x_ref[0, h0 + 1]
            row = x0 + f * (x1 - x0)
        up = jnp.dot(aw, row, preferred_element_type=jnp.float32)
        o_ref[0, rr] = up + y_ref[0, rr]


# ---------------------------------------------------------------------------
# Pallas wrappers (jit-cached per shape)
# ---------------------------------------------------------------------------

@functools.partial(jax.jit, static_argnames=("relu",))
def pointwise_conv(x, w, b, *, relu):
    """1x1 conv + folded BN (+ ReLU).  x: (N,H,W,Cin), w: (Cin,Cout), b: (Cout,)."""
    N, H, W, C = x.shape
    Nc = w.shape[1]
    M = N * H * W
    xm = x.reshape(M, C)
    cap = max(256, min(2048, (4 * 1024 * 1024) // ((C + 2 * Nc) * 4) // 8 * 8))
    tile_m = M if M <= cap else cap
    grid = (pl.cdiv(M, tile_m),)
    out = pl.pallas_call(
        functools.partial(_mm_kernel, relu=relu),
        out_shape=jax.ShapeDtypeStruct((M, Nc), jnp.float32),
        grid=grid,
        in_specs=[pl.BlockSpec((tile_m, C), lambda i: (i, 0)),
                  pl.BlockSpec((C, Nc), lambda i: (0, 0)),
                  pl.BlockSpec((1, Nc), lambda i: (0, 0))],
        out_specs=pl.BlockSpec((tile_m, Nc), lambda i: (i, 0)),
        compiler_params=_cparams(("parallel",)),
    )(xm, w, b.reshape(1, Nc))
    return out.reshape(N, H, W, Nc)


@functools.partial(jax.jit, static_argnames=("relu", "residual"))
def depthwise_s1(x, w, b, *, relu, residual):
    """3x3 depthwise, stride 1, pad 1, + folded BN (+ReLU / + x residual)."""
    N, H, W, C = x.shape
    WC = W * C
    xp = jnp.pad(x, ((0, 0), (1, 1), (1, 1), (0, 0)))
    # 3 kx-shifted, lane-packed padded copies (built once in XLA; small data).
    xs = jnp.stack([xp[:, :, kx:kx + W, :].reshape(N, H + 2, WC)
                    for kx in range(3)], 0)                   # (3,N,H+2,W*C)
    wt = jnp.tile(w.reshape(9, C), (1, W))                    # (9, W*C)
    bt = jnp.tile(b.reshape(1, C), (1, W))                    # (1, W*C)
    rps = min(H, 8 if WC >= 1024 else 16)                     # rows per step
    out = pl.pallas_call(
        functools.partial(_dw_s1_kernel, relu=relu, residual=residual, rps=rps),
        out_shape=jax.ShapeDtypeStruct((N, H, WC), jnp.float32),
        grid=(N,),
        in_specs=[pl.BlockSpec((3, 1, H + 2, WC), lambda n: (0, n, 0, 0)),
                  pl.BlockSpec((9, WC), lambda n: (0, 0)),
                  pl.BlockSpec((1, WC), lambda n: (0, 0))],
        out_specs=pl.BlockSpec((1, H, WC), lambda n: (n, 0, 0)),
        compiler_params=_cparams(("arbitrary",)),
    )(xs, wt, bt)
    return out.reshape(N, H, W, C)


@functools.partial(jax.jit, static_argnames=("relu",))
def depthwise_s2(x, w, b, *, relu):
    """3x3 depthwise, stride 2, pad 1, + folded BN (+ ReLU)."""
    # TODO(synk): taps are extracted at output resolution in XLA (~2.25x the
    # input in HBM); an in-kernel strided-row DMA variant would remove this.
    N, H, W, C = x.shape
    Ho = (H - 1) // 2 + 1
    Wo = (W - 1) // 2 + 1
    WC = Wo * C
    xp = jnp.pad(x, ((0, 0), (1, 1), (1, 1), (0, 0)))
    taps = [xp[:, ky:ky + 2 * Ho - 1:2, kx:kx + 2 * Wo - 1:2, :].reshape(N, Ho, WC)
            for ky in range(3) for kx in range(3)]
    p = jnp.stack(taps, 0)                                    # (9,N,Ho,Wo*C)
    wt = jnp.tile(w.reshape(9, C), (1, Wo))                   # (9, Wo*C)
    bt = jnp.tile(b.reshape(1, C), (1, Wo))                   # (1, Wo*C)
    th = Ho if Ho <= 32 else 32
    rps = min(th, 8)
    grid = (N, pl.cdiv(Ho, th))
    out = pl.pallas_call(
        functools.partial(_dw_s2_kernel, relu=relu, rps=rps),
        out_shape=jax.ShapeDtypeStruct((N, Ho, WC), jnp.float32),
        grid=grid,
        in_specs=[pl.BlockSpec((9, 1, th, WC), lambda n, i: (0, n, i, 0)),
                  pl.BlockSpec((9, WC), lambda n, i: (0, 0)),
                  pl.BlockSpec((1, WC), lambda n, i: (0, 0))],
        out_specs=pl.BlockSpec((1, th, WC), lambda n, i: (n, i, 0)),
        compiler_params=_cparams(("parallel", "parallel")),
    )(p, wt, bt)
    return out.reshape(N, Ho, Wo, C)


@jax.jit
def mbconv(x, we, be, wd, bd, wp, bp):
    """Fused InvertedResidual (expand=6, stride=1, with residual)."""
    N, H, W, C = x.shape
    Ce = we.shape[1]
    xp = jnp.pad(x, ((0, 0), (1, 1), (1, 1), (0, 0)))
    row_bytes = (W + 2) * Ce * 4
    cap = max(1, min(20, (3 * 1024 * 1024) // row_bytes - 2))
    th = _largest_divisor(H, cap)
    grid = (N, H // th)
    return pl.pallas_call(
        _mbconv_kernel,
        out_shape=jax.ShapeDtypeStruct((N, H, W, C), jnp.float32),
        grid=grid,
        in_specs=[pl.BlockSpec((1, H + 2, W + 2, C), lambda n, i: (n, 0, 0, 0)),
                  pl.BlockSpec((C, Ce), lambda n, i: (0, 0)),
                  pl.BlockSpec((1, Ce), lambda n, i: (0, 0)),
                  pl.BlockSpec((9, Ce), lambda n, i: (0, 0)),
                  pl.BlockSpec((1, Ce), lambda n, i: (0, 0)),
                  pl.BlockSpec((Ce, C), lambda n, i: (0, 0)),
                  pl.BlockSpec((1, C), lambda n, i: (0, 0))],
        out_specs=pl.BlockSpec((1, th, W, C), lambda n, i: (n, i, 0, 0)),
        scratch_shapes=[pltpu.VMEM((th + 2, W + 2, Ce), jnp.float32)],
        compiler_params=_cparams(("parallel", "parallel")),
    )(xp, we, be.reshape(1, Ce), wd.reshape(9, Ce), bd.reshape(1, Ce),
      wp, bp.reshape(1, C))


def _interp_matrix(out_size, in_size):
    A = np.zeros((out_size, in_size), np.float32)
    if out_size == 1 or in_size == 1:
        A[:, 0] = 1.0
        return A
    for i in range(out_size):
        src = i * (in_size - 1) / (out_size - 1)
        i0 = min(int(np.floor(src)), in_size - 1)
        i1 = min(i0 + 1, in_size - 1)
        f = src - i0
        A[i, i0] += 1.0 - f
        A[i, i1] += f
    return A


@functools.partial(jax.jit, static_argnames=("out_h", "out_w"))
def upsample_add(x, y, *, out_h, out_w):
    """nn.Upsample(size=(out_h,out_w), bilinear, align_corners=True)(x) + y."""
    N, H, W, C = x.shape
    aw = jnp.asarray(_interp_matrix(out_w, W))
    t_oh = _largest_divisor(out_h, 20)
    grid = (N, out_h // t_oh)
    return pl.pallas_call(
        functools.partial(_upsample_add_kernel, src_h=H, dst_h=out_h),
        out_shape=jax.ShapeDtypeStruct((N, out_h, out_w, C), jnp.float32),
        grid=grid,
        in_specs=[pl.BlockSpec((1, H, W, C), lambda n, i: (n, 0, 0, 0)),
                  pl.BlockSpec((out_w, W), lambda n, i: (0, 0)),
                  pl.BlockSpec((1, t_oh, out_w, C), lambda n, i: (n, i, 0, 0))],
        out_specs=pl.BlockSpec((1, t_oh, out_w, C), lambda n, i: (n, i, 0, 0)),
        compiler_params=_cparams(("parallel", "parallel")),
    )(x, aw, y)


# ---------------------------------------------------------------------------
# Deterministic parameter construction (synthetic; BN folded, inference mode)
# ---------------------------------------------------------------------------

class KeyGen:
    def __init__(self, seed):
        self._key = jax.random.PRNGKey(seed)

    def __call__(self):
        self._key, sub = jax.random.split(self._key)
        return sub


def _bn(kg, c):
    gamma = 1.0 + 0.1 * jax.random.normal(kg(), (c,), jnp.float32)
    beta = 0.05 * jax.random.normal(kg(), (c,), jnp.float32)
    mean = 0.05 * jax.random.normal(kg(), (c,), jnp.float32)
    var = 1.0 + 0.1 * jax.random.uniform(kg(), (c,), jnp.float32)
    scale = gamma / jnp.sqrt(var + 1e-5)
    return scale, beta - mean * scale


def _fold_pw(kg, cin, cout, bias):
    w = (0.5 / np.sqrt(cin)) * jax.random.normal(kg(), (cin, cout), jnp.float32)
    b = (0.02 * jax.random.normal(kg(), (cout,), jnp.float32)
         if bias else jnp.zeros((cout,), jnp.float32))
    s, sh = _bn(kg, cout)
    return w * s[None, :], b * s + sh


def _fold_dw(kg, c, bias):
    w = 0.1 * jax.random.normal(kg(), (3, 3, c), jnp.float32)
    b = (0.02 * jax.random.normal(kg(), (c,), jnp.float32)
         if bias else jnp.zeros((c,), jnp.float32))
    s, sh = _bn(kg, c)
    return w * s[None, None, :], b * s + sh


def build_fpn_params(input_channel, seed=0):
    kg = KeyGen(seed)
    params = []
    inp = input_channel
    for n, c, f in LOOPS:
        oup = c
        inc_w, inc_b = _fold_pw(kg, inp, oup, bias=True)            # increase_ch
        blocks = []
        for _ in range(n):                                          # block(inp, inp, 1)
            bw, bb = _fold_dw(kg, inp, bias=True)
            blocks.append(dict(w=bw, b=bb))
        sep_dw_w, sep_dw_b = _fold_dw(kg, inp, bias=True)           # seperableconv dw
        sep_pw_w, sep_pw_b = _fold_pw(kg, inp, oup, bias=True)      # seperableconv pw
        irs = []
        for i in range(f):
            if i == 0:  # InvertedResidual(oup, oup, 2, 1, onnx_compatible=True)
                dw_w, dw_b = _fold_dw(kg, oup, bias=False)
                pw_w, pw_b = _fold_pw(kg, oup, oup, bias=False)
                irs.append(dict(expand=1, stride=2, use_res=False,
                                dw_w=dw_w, dw_b=dw_b, pw_w=pw_w, pw_b=pw_b))
            else:       # InvertedResidual(oup, oup, 1, 6, onnx_compatible=True)
                hid = oup * 6
                ex_w, ex_b = _fold_pw(kg, oup, hid, bias=False)
                dw_w, dw_b = _fold_dw(kg, hid, bias=False)
                pw_w, pw_b = _fold_pw(kg, hid, oup, bias=False)
                irs.append(dict(expand=6, stride=1, use_res=True,
                                ex_w=ex_w, ex_b=ex_b,
                                dw_w=dw_w, dw_b=dw_b, pw_w=pw_w, pw_b=pw_b))
        params.append(dict(inc_w=inc_w, inc_b=inc_b, blocks=blocks,
                           sep_dw_w=sep_dw_w, sep_dw_b=sep_dw_b,
                           sep_pw_w=sep_pw_w, sep_pw_b=sep_pw_b, irs=irs))
        inp = c
    return params


# ---------------------------------------------------------------------------
# Forward
# ---------------------------------------------------------------------------

def apply_inverted_residual(p, x):
    if p["expand"] == 1:
        h = depthwise_s2(x, p["dw_w"], p["dw_b"], relu=True)
        return pointwise_conv(h, p["pw_w"], p["pw_b"], relu=False)
    return mbconv(x, p["ex_w"], p["ex_b"], p["dw_w"], p["dw_b"],
                  p["pw_w"], p["pw_b"])


def fpn_forward(params, x_nchw):
    # layout: input NCHW -> internal NHWC -> output NCHW
    x = jnp.transpose(x_nchw.astype(jnp.float32), (0, 2, 3, 1))
    for i, lp in enumerate(params):
        y = pointwise_conv(x, lp["inc_w"], lp["inc_b"], relu=True)   # j == 0: y = increase_ch(x)
        for bp in lp["blocks"]:                                      # x = x + block(x)  (fused)
            x = depthwise_s1(x, bp["w"], bp["b"], relu=False, residual=True)
        x = depthwise_s2(x, lp["sep_dw_w"], lp["sep_dw_b"], relu=True)   # seperableconv
        x = pointwise_conv(x, lp["sep_pw_w"], lp["sep_pw_b"], relu=False)
        oh, ow = UP_SIZES[i]
        x = upsample_add(x, y, out_h=oh, out_w=ow)                   # upsampler[i](x) + y (fused)
        for irp in lp["irs"]:                                        # InvertedResiduals
            x = apply_inverted_residual(irp, x)
    return jnp.transpose(x, (0, 3, 1, 2))


if __name__ == "__main__":
    input_channel = 3
    batch = 1
    # Spatial must be 300x300: the module's Upsample target sizes are hard-coded.
    x = jax.random.normal(jax.random.PRNGKey(0),
                          (batch, input_channel, 300, 300), jnp.float32)
    params = build_fpn_params(input_channel, seed=0)
    out = fpn_forward(params, x)
    out = jax.block_until_ready(out)
    assert out.shape == (batch, 320, 3, 3), out.shape
    assert bool(jnp.all(jnp.isfinite(out)))
    print("KERNEL_OK")
</pallas_src>

<mosaic_0001>
module attributes {stable_mosaic.version = 11 : i64} {
  func.func @_mm_kernel(%arg0: i32, %arg1: memref<2048x3xf32, #tpu.memory_space<vmem>>, %arg2: memref<3x16xf32, #tpu.memory_space<vmem>>, %arg3: memref<1x16xf32, #tpu.memory_space<vmem>>, %arg4: memref<2048x16xf32, #tpu.memory_space<vmem>>) attributes {dimension_semantics = [#tpu.dimension_semantics<parallel>], iteration_bounds = array<i64: 44>, scalar_prefetch = 0 : i64, scratch_operands = 0 : i64, tpu.core_type = #tpu.core_type<tc>, window_params = [{transform_indices = @transform_0, window_bounds = array<i64: 2048, 3>}, {pipeline_mode = #tpu.pipeline_mode<synchronous>, transform_indices = @transform_1, window_bounds = array<i64: 3, 16>}, {pipeline_mode = #tpu.pipeline_mode<synchronous>, transform_indices = @transform_2, window_bounds = array<i64: 1, 16>}, {transform_indices = @transform_3, window_bounds = array<i64: 2048, 16>}]} {
    %c0 = arith.constant 0 : index
    %c0_0 = arith.constant 0 : index
    %0 = vector.load %arg1[%c0, %c0_0] : memref<2048x3xf32, #tpu.memory_space<vmem>>, vector<2048x3xf32>
    %c0_1 = arith.constant 0 : index
    %c0_2 = arith.constant 0 : index
    %1 = vector.load %arg2[%c0_1, %c0_2] : memref<3x16xf32, #tpu.memory_space<vmem>>, vector<3x16xf32>
    %cst = arith.constant dense<0.000000e+00> : vector<2048x16xf32>
    %2 = tpu.matmul %0, %1, %cst {dimension_numbers = #tpu.dot_dimension_numbers<[1], [0], [0], [1], [0, 0, 1, 1], [], []>} : vector<2048x3xf32>, vector<3x16xf32>, vector<2048x16xf32> -> vector<2048x16xf32>
    %c0_3 = arith.constant 0 : index
    %c0_4 = arith.constant 0 : index
    %3 = vector.load %arg3[%c0_3, %c0_4] : memref<1x16xf32, #tpu.memory_space<vmem>>, vector<1x16xf32>
    %4 = vector.broadcast %3 : vector<1x16xf32> to vector<2048x16xf32>
    %5 = arith.addf %2, %4 : vector<2048x16xf32>
    %cst_5 = arith.constant 0.000000e+00 : f32
    %6 = vector.broadcast %cst_5 : f32 to vector<2048x16xf32>
    %7 = arith.maximumf %5, %6 : vector<2048x16xf32>
    %c0_6 = arith.constant 0 : index
    %c0_7 = arith.constant 0 : index
    %8 = vector.load %arg4[%c0_6, %c0_7] : memref<2048x16xf32, #tpu.memory_space<vmem>>, vector<2048x16xf32>
    tpu.vector_store %arg4[%c0_6, %c0_7], %7 {strides = array<i32>} : memref<2048x16xf32, #tpu.memory_space<vmem>>, vector<2048x16xf32>,
    return
  }
  func.func @transform_0(%arg0: i32) -> (i32, i32) {
    %c0_i32 = arith.constant 0 : i32
    %c0_i32_0 = arith.constant 0 : i32
    return %arg0, %c0_i32 : i32, i32
  }
  func.func @transform_1(%arg0: i32) -> (i32, i32) {
    %c0_i32 = arith.constant 0 : i32
    %c0_i32_0 = arith.constant 0 : i32
    %c0_i32_1 = arith.constant 0 : i32
    return %c0_i32, %c0_i32_0 : i32, i32
  }
  func.func @transform_2(%arg0: i32) -> (i32, i32) {
    %c0_i32 = arith.constant 0 : i32
    %c0_i32_0 = arith.constant 0 : i32
    %c0_i32_1 = arith.constant 0 : i32
    return %c0_i32, %c0_i32_0 : i32, i32
  }
  func.func @transform_3(%arg0: i32) -> (i32, i32) {
    %c0_i32 = arith.constant 0 : i32
    %c0_i32_0 = arith.constant 0 : i32
    return %arg0, %c0_i32 : i32, i32
  }
}

</mosaic_0001>

<bundles_post_ra>
// kernel: pointwise_conv.1
= control target key start
LH: loop header
LB: loop body
LE: loop exit
PB: predicated region body
PF: predicated region fallthrough
CT: control target
= control target key end

     0   :  { %8 = vsyncpa [#allocation3], 0  ;;  %s5761_s0 = inlined_call_operand.hbm [shape: f32[90000,3], index: 0, kind: input, shape index: {}]   ;;  %s5762_s1 = inlined_call_operand.vmem [shape: f32[3,16], index: 1, kind: input, shape index: {}]   ;;  %s5763_s2 = inlined_call_operand.vmem [shape: f32[1,16], index: 2, kind: input, shape index: {}]   ;;  %s5764_s3 = inlined_call_operand.hbm [shape: f32[90000,16], index: 3, kind: output, shape index: {}]  }
   0x1   :  { %10 = vsyncpa [#allocation3 + $0x1], 0 }
   0x2   :  { %11 = vsyncpa [#allocation4], 0 }
   0x3   :  { %13 = vsyncpa [#allocation4 + $0x1], 0  ;;  %s4287_s12 = smov 0   ;;  %s4289_s13 = smov 0  }
   0x4   :  { %s4291_s14 = smov 0   ;;  %s4293_s15 = smov 0  }
   0x5 LB: > { %s4308_s16 = sadd.s32 4294967295, %s4259_s15   ;;  %s3193_s17 = sadd.s32 4294967294, %s4259_s15   ;;  %s4259_s15 = sphi %s4293_s15, %s5772_s15   ;;  %s4255_s14 = sphi %s4291_s14, %s5771_s14   ;;  %s4251_s13 = sphi %s4289_s13, %s5770_s13   ;;  %s4247_s12 = sphi %s4287_s12, %s5769_s12  }
   0x6   : > { %s4312_s18 = sadd.s32 1, %s4259_s15   ;;  %s26_s19 = sadd.s32 1, %s4255_s14 }
   0x7   : > { %s23_s20 = ssub.s32 %s4259_s15, %s4312_s18  ;;  %p33_p0 = scmp.ne.s32.totalorder %s4255_s14, %s4251_s13 }
   0x8   : > { %p24_p1 = scmp.eq.s32.totalorder %s23_s20, 0  ;;  %p34_p2 = scmp.eq.s32.totalorder %s4259_s15, 0 }
   0x9   : > { %p39_p3 = scmp.ne.s32.totalorder %s4251_s13, %s4247_s12  ;;  %p40_p4 = scmp.eq.s32.totalorder %s4308_s16, 0 }
   0xa   : > { %s4324_s21 = scalar_select %p24_p1, %s4255_s14, %s26_s19  }
   0xb   : > { %p35_p5 = por %p34_p2, %p33_p0  ;;  %p4326_p6 = por %p40_p4, %p39_p3 }
   0xc   : > { %p105_p7 = scmp.eq.s32.totalorder %s4308_s16, 43  ;;  %p111_p8 = scmp.eq.s32.totalorder %s3193_s17, 43 }
   0xd   : > { %p3195_p11 = scmp.ge.s32.totalorder %s4259_s15, 44 }
   0xe   : > { %p4331_p9 = por %p105_p7, %p33_p0  ;;  %p4335_p10 = por %p111_p8, %p39_p3 }
   0xf   : > { %133 = sbr.rel (%p3195_p11) target bundleno = 57 (0x39), region = 24 }
  0x10   : > { %s5767_s24 = scalar_select %p4335_p10, 1, 0 }
  0x16   : > { %136 = sbr.rel (!%p35_p5) target bundleno = 57 (0x39), region = 28  ;;  %s137_s25 = sand.u32 (%p35_p5), 1, %s4255_s14  }
  0x17   : > { %s3197_s26 = sshll.u32 (%p35_p5), %s4259_s15, 8  ;;  %s3196_s27 = sshll.u32 (%p35_p5), %s137_s25, 11 }
  0x18   : > { %s143_s28 = ssub.s32 (%p35_p5), 11250, %s3197_s26  ;;  %s4345_s4 = scalar_lea.sflag (%p35_p5), [#allocation3], %s137_s25 }
  0x19   : > { %p144_p12 = scmp.lt.s32.totalorder (%p35_p5), %s143_s28, 256  ;;  %s141_s5 = scalar_lea.vmem (%p35_p5), [#allocation2], %s3196_s27 }
  0x1d   : > { %s5774_s28 = smov (!%p144_p12, %s143_s28), 256 }
  0x1e   : > { %s4342_s29 = sshll.u32 %s5774_s28, 7 }
  0x1f   : > { %s148_s30 = ssub.s32 32768, %s4342_s29 }
  0x20   : > { %149 = vsyncadd %s4345_s4, %s148_s30  ;;  %p3199_p13 = scmp.ne.s32.totalorder %s4342_s29, 0  ;;  %s3473_s6 = sshll.u32 %s4259_s15, 15 }
  0x21   : > { %s4353_s9 = scalar_lea.hbm %s5761_s0, %s3473_s6  ;;  %s154_s10 = sshll.u32 %s141_s5, 4  ;;  %s4355_s10 = int_to_ptr.vmem [resolvable:$true] %s154_s10 }
  0x22   : > { %s4165_s11 = scalar_lea.hbm %s4353_s9, %s4342_s29  ;;  %s4169_s20 = scalar_lea.hbm %s5761_s0, 1440000 }
  0x23   : > { %p4166_p0 = scmp.ne.s32.totalorder %s4353_s9, %s4165_s11  ;;  %p4170_p3 = scmp.lt.u32.totalorder %s4353_s9, %s5761_s0 }
  0x24   : > { %p4171_p4 = scmp.lt.u32.totalorder %s4169_s20, %s4165_s11  ;;  %p4173_p7 = scmp.lt.u32.totalorder %s4165_s11, %s4353_s9 }
  0x25   : > { %p4167_p1 = pnand %p4166_p0, %p3199_p13 }
  0x26   : > { %p4172_p5 = por %p4171_p4, %p4170_p3 }
  0x27   : > { %p4168_p2 = pneg %p4167_p1 }
  0x28   : > { %p4174_p8 = por %p4173_p7, %p4172_p5 }
  0x2a   : > { %p4175_p11 = pnand %p4174_p8, %p4168_p2 }
  0x2c   : > { %4178 = shalt.err (!%p4175_p11)
}
  0x2d   : > { %s4179_s27 = scalar_lea.vmem %s4355_s10, %s4342_s29  ;;  %s4261_s28 = smov [#allocation2]  }
  0x2e   : > { %p4180_p12 = scmp.ne.s32.totalorder %s4355_s10, %s4179_s27  ;;  %s4183_s30 = sshll.u32 %s4261_s28, 4  ;;  %s4184_s30 = int_to_ptr.vmem [resolvable:$false] %s4183_s30 }
  0x2f   : > { %s4185_s5 = scalar_lea.vmem %s4184_s30, 65536  ;;  %p4186_p10 = scmp.lt.s32.totalorder %s4355_s10, %s4184_s30 }
  0x30   : > { %p4181_p0 = pnand %p4180_p12, %p3199_p13  ;;  %p4187_p3 = scmp.lt.s32.totalorder %s4185_s5, %s4179_s27 }
  0x32   : > { %p4182_p1 = pneg %p4181_p0  ;;  %p4188_p4 = por %p4187_p3, %p4186_p10 }
  0x34   : > { %p4189_p5 = pnand %p4188_p4, %p4182_p1 }
  0x36   : > { %4192 = shalt.err (!%p4189_p5)
}
  0x37   : > { %s4262_s6 = smov 128   ;;  %s4263_s7 = smov 8  }
  0x38   : > { %160 = dma.hbm_to_vmem [thread:$0]  (%p3199_p13), %s4353_s9, %s4342_s29, %s4355_s10, %s4345_s4, %s4262_s6, %s4262_s6, %s4263_s7  }
  0x39 PF: > { %p3203_p2 = scmp.ge.s32.totalorder %s4259_s15, 1  ;;  %p162_p7 = scmp.lt.s32.totalorder %s4259_s15, 45 }
  0x3b   : > { %p163_p8 = pnand %p3203_p2, %p162_p7 }
  0x3c   : > { %s4385_s8 = sand.u32 (!%p163_p8), 1, %s4251_s13  }
  0x3d   : > { %166 = sbr.rel (%p163_p8) target bundleno = 571 (0x23b), region = 32  ;;  %s3204_s11 = sshll.u32 (!%p163_p8), %s4385_s8, 11 }
  0x3e   : > { %s169_s17 = scalar_lea.sflag (!%p163_p8), [#allocation3], %s4385_s8  ;;  %s4391_s19 = scalar_lea.vmem (!%p163_p8), [#allocation2], %s3204_s11 }
  0x44   : > { %4238 = dma.done.wait (%p4326_p6), %s169_s17, 32768  }
  0x45   : > { %4240 = vsyncadd (%p4326_p6), %s169_s17, 4294934528  ;;  %vm1238_vm0 = vcmask 1042432   ;;  %v461_v0 = vld [vmem:[%s5762_s1] sm:$0x7]  ;;  %vm469_vm1 = vcmask 23552   ;;  %v206_v3 = vld [vmem:[%s4391_s19 + $0x8] sm:$0xff] }
  0x46   : > { %v205_v1 = vld [vmem:[%s4391_s19] sm:$0xff]  ;;  %3732 = vmatprep.subr.msk.mxu0 %vm1238_vm0, %v461_v0  ;;  %4118 = vmatprep.subr.msk.mxu1 %vm1238_vm0, %v461_v0  ;;  %v334_v4 = vld [vmem:[%s4391_s19 + $0x408] sm:$0xff]  ;;  %v207_v5 = vld [vmem:[%s4391_s19 + $0x10] sm:$0xff]  ;;  %vm2843_vm2 = vcmask 130048   ;;  %s4851_s10 = scalar_lea.vmem [#allocation5], %s3204_s11  ;;  %s3101_s28 = scalar_lea.sflag [#allocation4], %s4385_s8 }
  0x47   : > { %v333_v2 = vld [vmem:[%s4391_s19 + $0x400] sm:$0xff]  ;;  %3733 = vmatpush3.msk.msra.mxu0 %vm1238_vm0, %v461_v0  ;;  %4119 = vmatpush3.msk.msra.mxu1 %vm1238_vm0, %v461_v0  ;;  %v335_v6 = vld [vmem:[%s4391_s19 + $0x410] sm:$0xff]  ;;  %v208_v7 = vld [vmem:[%s4391_s19 + $0x18] sm:$0xff]  ;;  %s3465_s30 = sshll.u32 (%p4331_p9), %s4308_s16, 8 }
  0x48   : > { %3734 = vmatprep.mubr.msk.f32.mxu0 %vm469_vm1, %v205_v1  ;;  %3926 = vmatprep.mubr.msk.f32.mxu1 %vm469_vm1, %v333_v2  ;;  %v336_v8 = vld [vmem:[%s4391_s19 + $0x418] sm:$0xff]  ;;  %v209_v9 = vld [vmem:[%s4391_s19 + $0x20] sm:$0xff]  ;;  %v210_v11 = vld [vmem:[%s4391_s19 + $0x28] sm:$0xff]  ;;  %s3109_s5 = ssub.s32 (%p4331_p9), 11250, %s3465_s30 }
  0x49   : > { %3735 = vmatmul.mubr.msk.f32.vlgmr.msra.gmra.mrb[0].mxu0 %vm469_vm1, %v206_v3  ;;  %3927 = vmatmul.mubr.msk.f32.vlgmr.msra.gmra.mrb[0].mxu1 %vm469_vm1, %v334_v4  ;;  %v337_v10 = vld [vmem:[%s4391_s19 + $0x420] sm:$0xff]  ;;  %v338_v12 = vld [vmem:[%s4391_s19 + $0x428] sm:$0xff]  ;;  %v211_v13 = vld [vmem:[%s4391_s19 + $0x30] sm:$0xff]  ;;  %p3110_p6 = scmp.lt.s32.totalorder (%p4331_p9), %s3109_s5, 256 }
  0x4a   : > { %3737 = vmatprep.mubr.msk.f32.mxu0 %vm469_vm1, %v207_v5  ;;  %3929 = vmatprep.mubr.msk.f32.mxu1 %vm469_vm1, %v335_v6  ;;  %v339_v14 = vld [vmem:[%s4391_s19 + $0x430] sm:$0xff]  ;;  %v212_v15 = vld [vmem:[%s4391_s19 + $0x38] sm:$0xff]  ;;  %v213_v17 = vld [vmem:[%s4391_s19 + $0x40] sm:$0xff] }
  0x4b   : > { %v340_v16 = vld [vmem:[%s4391_s19 + $0x438] sm:$0xff]  ;;  %v341_v18 = vld [vmem:[%s4391_s19 + $0x440] sm:$0xff]  ;;  %v214_v19 = vld [vmem:[%s4391_s19 + $0x48] sm:$0xff] }
  0x4c   : > { %v342_v20 = vld [vmem:[%s4391_s19 + $0x448] sm:$0xff]  ;;  %v215_v21 = vld [vmem:[%s4391_s19 + $0x50] sm:$0xff]  ;;  %v216_v23 = vld [vmem:[%s4391_s19 + $0x58] sm:$0xff] }
  0x4d   : > { %3738 = vmatmul.mubr.msk.f32.gmra.mrb[2].mxu0 %vm469_vm1, %v208_v7  ;;  %3930 = vmatmul.mubr.msk.f32.gmra.mrb[2].mxu1 %vm469_vm1, %v336_v8  ;;  %v343_v22 = vld [vmem:[%s4391_s19 + $0x450] sm:$0xff]  ;;  %v344_v24 = vld [vmem:[%s4391_s19 + $0x458] sm:$0xff]  ;;  %v217_v25 = vld [vmem:[%s4391_s19 + $0x60] sm:$0xff] }
  0x4e   : > { %3740 = vmatprep.mubr.msk.f32.mxu0 %vm469_vm1, %v209_v9  ;;  %3932 = vmatprep.mubr.msk.f32.mxu1 %vm469_vm1, %v337_v10  ;;  %v345_v26 = vld [vmem:[%s4391_s19 + $0x460] sm:$0xff]  ;;  %v218_v27 = vld [vmem:[%s4391_s19 + $0x68] sm:$0xff]  ;;  %v219_v29 = vld [vmem:[%s4391_s19 + $0x70] sm:$0xff] }
  0x4f   : > { %v346_v28 = vld [vmem:[%s4391_s19 + $0x468] sm:$0xff]  ;;  %v347_v30 = vld [vmem:[%s4391_s19 + $0x470] sm:$0xff]  ;;  %v220_v31 = vld [vmem:[%s4391_s19 + $0x78] sm:$0xff] }
  0x50   : > { %v348_v32 = vld [vmem:[%s4391_s19 + $0x478] sm:$0xff]  ;;  %v221_v33 = vld [vmem:[%s4391_s19 + $0x80] sm:$0xff]  ;;  %v222_v35 = vld [vmem:[%s4391_s19 + $0x88] sm:$0xff] }
  0x51   : > { %3741 = vmatmul.mubr.msk.f32.gmra.mrb[4].mxu0 %vm469_vm1, %v210_v11  ;;  %3933 = vmatmul.mubr.msk.f32.gmra.mrb[4].mxu1 %vm469_vm1, %v338_v12  ;;  %v349_v34 = vld [vmem:[%s4391_s19 + $0x480] sm:$0xff]  ;;  %v350_v36 = vld [vmem:[%s4391_s19 + $0x488] sm:$0xff]  ;;  %v223_v37 = vld [vmem:[%s4391_s19 + $0x90] sm:$0xff] }
  0x52   : > { %3743 = vmatprep.mubr.msk.f32.mxu0 %vm469_vm1, %v211_v13  ;;  %3935 = vmatprep.mubr.msk.f32.mxu1 %vm469_vm1, %v339_v14  ;;  %v351_v38 = vld [vmem:[%s4391_s19 + $0x490] sm:$0xff]  ;;  %v224_v39 = vld [vmem:[%s4391_s19 + $0x98] sm:$0xff]  ;;  %v225_v41 = vld [vmem:[%s4391_s19 + $0xa0] sm:$0xff] }
  0x53   : > { %v352_v40 = vld [vmem:[%s4391_s19 + $0x498] sm:$0xff]  ;;  %v353_v42 = vld [vmem:[%s4391_s19 + $0x4a0] sm:$0xff]  ;;  %v226_v43 = vld [vmem:[%s4391_s19 + $0xa8] sm:$0xff] }
  0x54   : > { %v354_v44 = vld [vmem:[%s4391_s19 + $0x4a8] sm:$0xff]  ;;  %v227_v45 = vld [vmem:[%s4391_s19 + $0xb0] sm:$0xff]  ;;  %v228_v47 = vld [vmem:[%s4391_s19 + $0xb8] sm:$0xff] }
  0x55   : > { %3744 = vmatmul.mubr.msk.f32.gmra.mrb[6].mxu0 %vm469_vm1, %v212_v15  ;;  %3936 = vmatmul.mubr.msk.f32.gmra.mrb[6].mxu1 %vm469_vm1, %v340_v16  ;;  %v355_v46 = vld [vmem:[%s4391_s19 + $0x4b0] sm:$0xff]  ;;  %v356_v48 = vld [vmem:[%s4391_s19 + $0x4b8] sm:$0xff]  ;;  %v229_v49 = vld [vmem:[%s4391_s19 + $0xc0] sm:$0xff] }
  0x56   : > { %3746 = vmatprep.mubr.msk.f32.mxu0 %vm469_vm1, %v213_v17  ;;  %3938 = vmatprep.mubr.msk.f32.mxu1 %vm469_vm1, %v341_v18  ;;  %v357_v50 = vld [vmem:[%s4391_s19 + $0x4c0] sm:$0xff]  ;;  %v230_v51 = vld [vmem:[%s4391_s19 + $0xc8] sm:$0xff]  ;;  %v231_v53 = vld [vmem:[%s4391_s19 + $0xd0] sm:$0xff] }
  0x57   : > { %v358_v52 = vld [vmem:[%s4391_s19 + $0x4c8] sm:$0xff]  ;;  %v359_v54 = vld [vmem:[%s4391_s19 + $0x4d0] sm:$0xff]  ;;  %v232_v55 = vld [vmem:[%s4391_s19 + $0xd8] sm:$0xff] }
  0x58   : > { %v360_v56 = vld [vmem:[%s4391_s19 + $0x4d8] sm:$0xff]  ;;  %v233_v57 = vld [vmem:[%s4391_s19 + $0xe0] sm:$0xff]  ;;  %v234_v59 = vld [vmem:[%s4391_s19 + $0xe8] sm:$0xff] }
  0x59   : > { %3747 = vmatmul.mubr.msk.f32.gmra.mrb[8].mxu0 %vm469_vm1, %v214_v19  ;;  %3939 = vmatmul.mubr.msk.f32.gmra.mrb[8].mxu1 %vm469_vm1, %v342_v20  ;;  %v361_v58 = vld [vmem:[%s4391_s19 + $0x4e0] sm:$0xff]  ;;  %v362_v60 = vld [vmem:[%s4391_s19 + $0x4e8] sm:$0xff]  ;;  %v235_v61 = vld [vmem:[%s4391_s19 + $0xf0] sm:$0xff] }
  0x5a   : > { %3749 = vmatprep.mubr.msk.f32.mxu0 %vm469_vm1, %v215_v21  ;;  %3941 = vmatprep.mubr.msk.f32.mxu1 %vm469_vm1, %v343_v22  ;;  %v363_v62 = vld [vmem:[%s4391_s19 + $0x4f0] sm:$0xff]  ;;  %v236_v63 = vld [vmem:[%s4391_s19 + $0xf8] sm:$0xff]  ;;  %v237_v1 = vld [vmem:[%s4391_s19 + $0x100] sm:$0xff] }
  0x5b   : > { %v364_v0 = vld [vmem:[%s4391_s19 + $0x4f8] sm:$0xff]  ;;  %v365_v2 = vld [vmem:[%s4391_s19 + $0x500] sm:$0xff]  ;;  %v238_v3 = vld [vmem:[%s4391_s19 + $0x108] sm:$0xff] }
  0x5c   : > { %v366_v4 = vld [vmem:[%s4391_s19 + $0x508] sm:$0xff]  ;;  %v239_v5 = vld [vmem:[%s4391_s19 + $0x110] sm:$0xff]  ;;  %v240_v7 = vld [vmem:[%s4391_s19 + $0x118] sm:$0xff] }
  0x5d   : > { %3750 = vmatmul.mubr.msk.f32.gmra.mrb[10].mxu0 %vm469_vm1, %v216_v23  ;;  %3942 = vmatmul.mubr.msk.f32.gmra.mrb[10].mxu1 %vm469_vm1, %v344_v24  ;;  %v367_v6 = vld [vmem:[%s4391_s19 + $0x510] sm:$0xff]  ;;  %v368_v8 = vld [vmem:[%s4391_s19 + $0x518] sm:$0xff]  ;;  %v241_v9 = vld [vmem:[%s4391_s19 + $0x120] sm:$0xff] }
  0x5e   : > { %3752 = vmatprep.mubr.msk.f32.mxu0 %vm469_vm1, %v217_v25  ;;  %3944 = vmatprep.mubr.msk.f32.mxu1 %vm469_vm1, %v345_v26  ;;  %v369_v10 = vld [vmem:[%s4391_s19 + $0x520] sm:$0xff]  ;;  %v242_v11 = vld [vmem:[%s4391_s19 + $0x128] sm:$0xff]  ;;  %v243_v13 = vld [vmem:[%s4391_s19 + $0x130] sm:$0xff] }
  0x5f   : > { %v370_v12 = vld [vmem:[%s4391_s19 + $0x528] sm:$0xff]  ;;  %v371_v14 = vld [vmem:[%s4391_s19 + $0x530] sm:$0xff]  ;;  %v244_v15 = vld [vmem:[%s4391_s19 + $0x138] sm:$0xff] }
  0x60   : > { %v372_v16 = vld [vmem:[%s4391_s19 + $0x538] sm:$0xff]  ;;  %v245_v17 = vld [vmem:[%s4391_s19 + $0x140] sm:$0xff]  ;;  %v246_v19 = vld [vmem:[%s4391_s19 + $0x148] sm:$0xff] }
  0x61   : > { %3753 = vmatmul.mubr.msk.f32.gmra.mrb[12].mxu0 %vm469_vm1, %v218_v27  ;;  %3945 = vmatmul.mubr.msk.f32.gmra.mrb[12].mxu1 %vm469_vm1, %v346_v28  ;;  %v373_v18 = vld [vmem:[%s4391_s19 + $0x540] sm:$0xff]  ;;  %v374_v20 = vld [vmem:[%s4391_s19 + $0x548] sm:$0xff]  ;;  %v247_v21 = vld [vmem:[%s4391_s19 + $0x150] sm:$0xff] }
  0x62   : > { %3755 = vmatprep.mubr.msk.f32.mxu0 %vm469_vm1, %v219_v29  ;;  %3947 = vmatprep.mubr.msk.f32.mxu1 %vm469_vm1, %v347_v30  ;;  %v375_v22 = vld [vmem:[%s4391_s19 + $0x550] sm:$0xff]  ;;  %v248_v23 = vld [vmem:[%s4391_s19 + $0x158] sm:$0xff]  ;;  %v249_v25 = vld [vmem:[%s4391_s19 + $0x160] sm:$0xff] }
  0x63   : > { %v376_v24 = vld [vmem:[%s4391_s19 + $0x558] sm:$0xff]  ;;  %v377_v26 = vld [vmem:[%s4391_s19 + $0x560] sm:$0xff]  ;;  %v250_v27 = vld [vmem:[%s4391_s19 + $0x168] sm:$0xff] }
  0x64   : > { %v378_v28 = vld [vmem:[%s4391_s19 + $0x568] sm:$0xff]  ;;  %v251_v29 = vld [vmem:[%s4391_s19 + $0x170] sm:$0xff] }
  0x65   : > { %3756 = vmatmul.mubr.msk.f32.gmra.mrb[14].mxu0 %vm469_vm1, %v220_v31  ;;  %3948 = vmatmul.mubr.msk.f32.gmra.mrb[14].mxu1 %vm469_vm1, %v348_v32  ;;  %v379_v30 = vld [vmem:[%s4391_s19 + $0x570] sm:$0xff]  ;;  %v252_v31 = vld [vmem:[%s4391_s19 + $0x178] sm:$0xff] }
  0x66   : > { %3758 = vmatprep.mubr.msk.f32.mxu0 %vm469_vm1, %v221_v33  ;;  %3950 = vmatprep.mubr.msk.f32.mxu1 %vm469_vm1, %v349_v34  ;;  %v380_v32 = vld [vmem:[%s4391_s19 + $0x578] sm:$0xff]  ;;  %v253_v33 = vld [vmem:[%s4391_s19 + $0x180] sm:$0xff] }
  0x67   : > { %v381_v34 = vld [vmem:[%s4391_s19 + $0x580] sm:$0xff] }
  0x69   : > { %3759 = vmatmul.mubr.msk.f32.gmra.mrb[16].mxu0 %vm469_vm1, %v222_v35  ;;  %3951 = vmatmul.mubr.msk.f32.gmra.mrb[16].mxu1 %vm469_vm1, %v350_v36  ;;  %v254_v35 = vld [vmem:[%s4391_s19 + $0x188] sm:$0xff] }
  0x6a   : > { %3761 = vmatprep.mubr.msk.f32.mxu0 %vm469_vm1, %v223_v37  ;;  %3953 = vmatprep.mubr.msk.f32.mxu1 %vm469_vm1, %v351_v38  ;;  %v382_v36 = vld [vmem:[%s4391_s19 + $0x588] sm:$0xff]  ;;  %v255_v37 = vld [vmem:[%s4391_s19 + $0x190] sm:$0xff] }
  0x6b   : > { %v383_v38 = vld [vmem:[%s4391_s19 + $0x590] sm:$0xff] }
  0x6d   : > { %3762 = vmatmul.mubr.msk.f32.gmra.mrb[18].mxu0 %vm469_vm1, %v224_v39  ;;  %3954 = vmatmul.mubr.msk.f32.gmra.mrb[18].mxu1 %vm469_vm1, %v352_v40  ;;  %v256_v39 = vld [vmem:[%s4391_s19 + $0x198] sm:$0xff] }
  0x6e   : > { %3764 = vmatprep.mubr.msk.f32.mxu0 %vm469_vm1, %v225_v41  ;;  %3956 = vmatprep.mubr.msk.f32.mxu1 %vm469_vm1, %v353_v42  ;;  %v384_v40 = vld [vmem:[%s4391_s19 + $0x598] sm:$0xff]  ;;  %v257_v41 = vld [vmem:[%s4391_s19 + $0x1a0] sm:$0xff] }
  0x6f   : > { %v385_v42 = vld [vmem:[%s4391_s19 + $0x5a0] sm:$0xff] }
  0x71   : > { %3765 = vmatmul.mubr.msk.f32.gmra.mrb[20].mxu0 %vm469_vm1, %v226_v43  ;;  %3957 = vmatmul.mubr.msk.f32.gmra.mrb[20].mxu1 %vm469_vm1, %v354_v44  ;;  %v258_v43 = vld [vmem:[%s4391_s19 + $0x1a8] sm:$0xff] }
  0x72   : > { %3767 = vmatprep.mubr.msk.f32.mxu0 %vm469_vm1, %v227_v45  ;;  %3959 = vmatprep.mubr.msk.f32.mxu1 %vm469_vm1, %v355_v46  ;;  %v386_v44 = vld [vmem:[%s4391_s19 + $0x5a8] sm:$0xff]  ;;  %v259_v45 = vld [vmem:[%s4391_s19 + $0x1b0] sm:$0xff] }
  0x73   : > { %v387_v46 = vld [vmem:[%s4391_s19 + $0x5b0] sm:$0xff] }
  0x75   : > { %3768 = vmatmul.mubr.msk.f32.gmra.mrb[22].mxu0 %vm469_vm1, %v228_v47  ;;  %3960 = vmatmul.mubr.msk.f32.gmra.mrb[22].mxu1 %vm469_vm1, %v356_v48  ;;  %v260_v47 = vld [vmem:[%s4391_s19 + $0x1b8] sm:$0xff] }
  0x76   : > { %3770 = vmatprep.mubr.msk.f32.mxu0 %vm469_vm1, %v229_v49  ;;  %3962 = vmatprep.mubr.msk.f32.mxu1 %vm469_vm1, %v357_v50  ;;  %v388_v48 = vld [vmem:[%s4391_s19 + $0x5b8] sm:$0xff]  ;;  %v261_v49 = vld [vmem:[%s4391_s19 + $0x1c0] sm:$0xff] }
  0x77   : > { %v389_v50 = vld [vmem:[%s4391_s19 + $0x5c0] sm:$0xff] }
  0x79   : > { %3771 = vmatmul.mubr.msk.f32.gmra.mrb[24].mxu0 %vm469_vm1, %v230_v51  ;;  %3963 = vmatmul.mubr.msk.f32.gmra.mrb[24].mxu1 %vm469_vm1, %v358_v52  ;;  %v262_v51 = vld [vmem:[%s4391_s19 + $0x1c8] sm:$0xff] }
  0x7a   : > { %3773 = vmatprep.mubr.msk.f32.mxu0 %vm469_vm1, %v231_v53  ;;  %3965 = vmatprep.mubr.msk.f32.mxu1 %vm469_vm1, %v359_v54  ;;  %v390_v52 = vld [vmem:[%s4391_s19 + $0x5c8] sm:$0xff]  ;;  %v263_v53 = vld [vmem:[%s4391_s19 + $0x1d0] sm:$0xff] }
  0x7b   : > { %v391_v54 = vld [vmem:[%s4391_s19 + $0x5d0] sm:$0xff] }
  0x7d   : > { %3774 = vmatmul.mubr.msk.f32.gmra.mrb[26].mxu0 %vm469_vm1, %v232_v55  ;;  %3966 = vmatmul.mubr.msk.f32.gmra.mrb[26].mxu1 %vm469_vm1, %v360_v56  ;;  %v264_v55 = vld [vmem:[%s4391_s19 + $0x1d8] sm:$0xff] }
  0x7e   : > { %3776 = vmatprep.mubr.msk.f32.mxu0 %vm469_vm1, %v233_v57  ;;  %3968 = vmatprep.mubr.msk.f32.mxu1 %vm469_vm1, %v361_v58  ;;  %v392_v56 = vld [vmem:[%s4391_s19 + $0x5d8] sm:$0xff]  ;;  %v265_v57 = vld [vmem:[%s4391_s19 + $0x1e0] sm:$0xff] }
  0x7f   : > { %v393_v58 = vld [vmem:[%s4391_s19 + $0x5e0] sm:$0xff] }
  0x81   : > { %3777 = vmatmul.mubr.msk.f32.gmra.mrb[28].mxu0 %vm469_vm1, %v234_v59  ;;  %3969 = vmatmul.mubr.msk.f32.gmra.mrb[28].mxu1 %vm469_vm1, %v362_v60  ;;  %v266_v59 = vld [vmem:[%s4391_s19 + $0x1e8] sm:$0xff] }
  0x82   : > { %3779 = vmatprep.mubr.msk.f32.mxu0 %vm469_vm1, %v235_v61  ;;  %3971 = vmatprep.mubr.msk.f32.mxu1 %vm469_vm1, %v363_v62  ;;  %v394_v60 = vld [vmem:[%s4391_s19 + $0x5e8] sm:$0xff]  ;;  %v267_v61 = vld [vmem:[%s4391_s19 + $0x1f0] sm:$0xff] }
  0x83   : > { %v395_v62 = vld [vmem:[%s4391_s19 + $0x5f0] sm:$0xff] }
  0x85   : > { %3780 = vmatmul.mubr.msk.f32.gmra.mrb[30].mxu0 %vm469_vm1, %v236_v63  ;;  %3972 = vmatmul.mubr.msk.f32.gmra.mrb[30].mxu1 %vm469_vm1, %v364_v0  ;;  %v268_v63 = vld [vmem:[%s4391_s19 + $0x1f8] sm:$0xff] }
  0x86   : > { %3782 = vmatprep.mubr.msk.f32.mxu0 %vm469_vm1, %v237_v1  ;;  %3974 = vmatprep.mubr.msk.f32.mxu1 %vm469_vm1, %v365_v2  ;;  %v396_v0 = vld [vmem:[%s4391_s19 + $0x5f8] sm:$0xff]  ;;  %v269_v1 = vld [vmem:[%s4391_s19 + $0x200] sm:$0xff] }
  0x87   : > { %v397_v2 = vld [vmem:[%s4391_s19 + $0x600] sm:$0xff] }
  0x89   : > { %3783 = vmatmul.mubr.msk.f32.gmra.mrb[32].mxu0 %vm469_vm1, %v238_v3  ;;  %3975 = vmatmul.mubr.msk.f32.gmra.mrb[32].mxu1 %vm469_vm1, %v366_v4  ;;  %v270_v3 = vld [vmem:[%s4391_s19 + $0x208] sm:$0xff] }
  0x8a   : > { %3785 = vmatprep.mubr.msk.f32.mxu0 %vm469_vm1, %v239_v5  ;;  %3977 = vmatprep.mubr.msk.f32.mxu1 %vm469_vm1, %v367_v6  ;;  %v398_v4 = vld [vmem:[%s4391_s19 + $0x608] sm:$0xff]  ;;  %v271_v5 = vld [vmem:[%s4391_s19 + $0x210] sm:$0xff] }
  0x8b   : > { %v399_v6 = vld [vmem:[%s4391_s19 + $0x610] sm:$0xff] }
  0x8d   : > { %3786 = vmatmul.mubr.msk.f32.gmra.mrb[34].mxu0 %vm469_vm1, %v240_v7  ;;  %3978 = vmatmul.mubr.msk.f32.gmra.mrb[34].mxu1 %vm469_vm1, %v368_v8  ;;  %v272_v7 = vld [vmem:[%s4391_s19 + $0x218] sm:$0xff] }
  0x8e   : > { %3788 = vmatprep.mubr.msk.f32.mxu0 %vm469_vm1, %v241_v9  ;;  %3980 = vmatprep.mubr.msk.f32.mxu1 %vm469_vm1, %v369_v10  ;;  %v400_v8 = vld [vmem:[%s4391_s19 + $0x618] sm:$0xff]  ;;  %v273_v9 = vld [vmem:[%s4391_s19 + $0x220] sm:$0xff] }
  0x8f   : > { %v401_v10 = vld [vmem:[%s4391_s19 + $0x620] sm:$0xff] }
  0x91   : > { %3789 = vmatmul.mubr.msk.f32.gmra.mrb[36].mxu0 %vm469_vm1, %v242_v11  ;;  %3981 = vmatmul.mubr.msk.f32.gmra.mrb[36].mxu1 %vm469_vm1, %v370_v12  ;;  %v274_v11 = vld [vmem:[%s4391_s19 + $0x228] sm:$0xff] }
  0x92   : > { %3791 = vmatprep.mubr.msk.f32.mxu0 %vm469_vm1, %v243_v13  ;;  %3983 = vmatprep.mubr.msk.f32.mxu1 %vm469_vm1, %v371_v14  ;;  %v402_v12 = vld [vmem:[%s4391_s19 + $0x628] sm:$0xff]  ;;  %v275_v13 = vld [vmem:[%s4391_s19 + $0x230] sm:$0xff] }
  0x93   : > { %v403_v14 = vld [vmem:[%s4391_s19 + $0x630] sm:$0xff] }
  0x95   : > { %3792 = vmatmul.mubr.msk.f32.gmra.mrb[38].mxu0 %vm469_vm1, %v244_v15  ;;  %3984 = vmatmul.mubr.msk.f32.gmra.mrb[38].mxu1 %vm469_vm1, %v372_v16  ;;  %v276_v15 = vld [vmem:[%s4391_s19 + $0x238] sm:$0xff] }
  0x96   : > { %3794 = vmatprep.mubr.msk.f32.mxu0 %vm469_vm1, %v245_v17  ;;  %3986 = vmatprep.mubr.msk.f32.mxu1 %vm469_vm1, %v373_v18  ;;  %v404_v16 = vld [vmem:[%s4391_s19 + $0x638] sm:$0xff]  ;;  %v277_v17 = vld [vmem:[%s4391_s19 + $0x240] sm:$0xff] }
  0x97   : > { %v405_v18 = vld [vmem:[%s4391_s19 + $0x640] sm:$0xff] }
  0x99   : > { %3795 = vmatmul.mubr.msk.f32.gmra.mrb[40].mxu0 %vm469_vm1, %v246_v19  ;;  %3987 = vmatmul.mubr.msk.f32.gmra.mrb[40].mxu1 %vm469_vm1, %v374_v20  ;;  %v278_v19 = vld [vmem:[%s4391_s19 + $0x248] sm:$0xff] }
  0x9a   : > { %3797 = vmatprep.mubr.msk.f32.mxu0 %vm469_vm1, %v247_v21  ;;  %3989 = vmatprep.mubr.msk.f32.mxu1 %vm469_vm1, %v375_v22  ;;  %v406_v20 = vld [vmem:[%s4391_s19 + $0x648] sm:$0xff]  ;;  %v279_v21 = vld [vmem:[%s4391_s19 + $0x250] sm:$0xff] }
  0x9b   : > { %v407_v22 = vld [vmem:[%s4391_s19 + $0x650] sm:$0xff] }
  0x9d   : > { %3798 = vmatmul.mubr.msk.f32.gmra.mrb[42].mxu0 %vm469_vm1, %v248_v23  ;;  %3990 = vmatmul.mubr.msk.f32.gmra.mrb[42].mxu1 %vm469_vm1, %v376_v24  ;;  %v280_v23 = vld [vmem:[%s4391_s19 + $0x258] sm:$0xff] }
  0x9e   : > { %3800 = vmatprep.mubr.msk.f32.mxu0 %vm469_vm1, %v249_v25  ;;  %3992 = vmatprep.mubr.msk.f32.mxu1 %vm469_vm1, %v377_v26  ;;  %v408_v24 = vld [vmem:[%s4391_s19 + $0x658] sm:$0xff]  ;;  %v281_v25 = vld [vmem:[%s4391_s19 + $0x260] sm:$0xff] }
  0x9f   : > { %v409_v26 = vld [vmem:[%s4391_s19 + $0x660] sm:$0xff] }
  0xa1   : > { %3801 = vmatmul.mubr.msk.f32.gmra.mrb[44].mxu0 %vm469_vm1, %v250_v27  ;;  %3993 = vmatmul.mubr.msk.f32.gmra.mrb[44].mxu1 %vm469_vm1, %v378_v28  ;;  %v282_v27 = vld [vmem:[%s4391_s19 + $0x268] sm:$0xff] }
  0xa2   : > { %3803 = vmatprep.mubr.msk.f32.mxu0 %vm469_vm1, %v251_v29  ;;  %3995 = vmatprep.mubr.msk.f32.mxu1 %vm469_vm1, %v379_v30  ;;  %v410_v28 = vld [vmem:[%s4391_s19 + $0x668] sm:$0xff]  ;;  %v283_v29 = vld [vmem:[%s4391_s19 + $0x270] sm:$0xff] }
  0xa3   : > { %v411_v30 = vld [vmem:[%s4391_s19 + $0x670] sm:$0xff] }
  0xa5   : > { %3804 = vmatmul.mubr.msk.f32.gmra.mrb[46].mxu0 %vm469_vm1, %v252_v31  ;;  %3996 = vmatmul.mubr.msk.f32.gmra.mrb[46].mxu1 %vm469_vm1, %v380_v32  ;;  %v284_v31 = vld [vmem:[%s4391_s19 + $0x278] sm:$0xff] }
  0xa6   : > { %3806 = vmatprep.mubr.msk.f32.mxu0 %vm469_vm1, %v253_v33  ;;  %3998 = vmatprep.mubr.msk.f32.mxu1 %vm469_vm1, %v381_v34  ;;  %v412_v32 = vld [vmem:[%s4391_s19 + $0x678] sm:$0xff]  ;;  %v285_v33 = vld [vmem:[%s4391_s19 + $0x280] sm:$0xff] }
  0xa7   : > { %v413_v34 = vld [vmem:[%s4391_s19 + $0x680] sm:$0xff] }
  0xa9   : > { %3807 = vmatmul.mubr.msk.f32.gmra.mrb[48].mxu0 %vm469_vm1, %v254_v35  ;;  %3999 = vmatmul.mubr.msk.f32.gmra.mrb[48].mxu1 %vm469_vm1, %v382_v36  ;;  %v286_v35 = vld [vmem:[%s4391_s19 + $0x288] sm:$0xff] }
  0xaa   : > { %3809 = vmatprep.mubr.msk.f32.mxu0 %vm469_vm1, %v255_v37  ;;  %4001 = vmatprep.mubr.msk.f32.mxu1 %vm469_vm1, %v383_v38  ;;  %v414_v36 = vld [vmem:[%s4391_s19 + $0x688] sm:$0xff]  ;;  %v287_v37 = vld [vmem:[%s4391_s19 + $0x290] sm:$0xff] }
  0xab   : > { %v415_v38 = vld [vmem:[%s4391_s19 + $0x690] sm:$0xff] }
  0xad   : > { %3810 = vmatmul.mubr.msk.f32.gmra.mrb[50].mxu0 %vm469_vm1, %v256_v39  ;;  %4002 = vmatmul.mubr.msk.f32.gmra.mrb[50].mxu1 %vm469_vm1, %v384_v40  ;;  %v288_v39 = vld [vmem:[%s4391_s19 + $0x298] sm:$0xff] }
  0xae   : > { %3812 = vmatprep.mubr.msk.f32.mxu0 %vm469_vm1, %v257_v41  ;;  %4004 = vmatprep.mubr.msk.f32.mxu1 %vm469_vm1, %v385_v42  ;;  %v416_v40 = vld [vmem:[%s4391_s19 + $0x698] sm:$0xff]  ;;  %v289_v41 = vld [vmem:[%s4391_s19 + $0x2a0] sm:$0xff] }
  0xaf   : > { %v417_v42 = vld [vmem:[%s4391_s19 + $0x6a0] sm:$0xff] }
  0xb1   : > { %3813 = vmatmul.mubr.msk.f32.gmra.mrb[52].mxu0 %vm469_vm1, %v258_v43  ;;  %4005 = vmatmul.mubr.msk.f32.gmra.mrb[52].mxu1 %vm469_vm1, %v386_v44  ;;  %v290_v43 = vld [vmem:[%s4391_s19 + $0x2a8] sm:$0xff] }
  0xb2   : > { %3815 = vmatprep.mubr.msk.f32.mxu0 %vm469_vm1, %v259_v45  ;;  %4007 = vmatprep.mubr.msk.f32.mxu1 %vm469_vm1, %v387_v46  ;;  %v418_v44 = vld [vmem:[%s4391_s19 + $0x6a8] sm:$0xff]  ;;  %v291_v45 = vld [vmem:[%s4391_s19 + $0x2b0] sm:$0xff] }
  0xb3   : > { %v419_v46 = vld [vmem:[%s4391_s19 + $0x6b0] sm:$0xff] }
  0xb5   : > { %3816 = vmatmul.mubr.msk.f32.gmra.mrb[54].mxu0 %vm469_vm1, %v260_v47  ;;  %4008 = vmatmul.mubr.msk.f32.gmra.mrb[54].mxu1 %vm469_vm1, %v388_v48  ;;  %v292_v47 = vld [vmem:[%s4391_s19 + $0x2b8] sm:$0xff] }
  0xb6   : > { %3818 = vmatprep.mubr.msk.f32.mxu0 %vm469_vm1, %v261_v49  ;;  %4010 = vmatprep.mubr.msk.f32.mxu1 %vm469_vm1, %v389_v50  ;;  %v420_v48 = vld [vmem:[%s4391_s19 + $0x6b8] sm:$0xff]  ;;  %v293_v49 = vld [vmem:[%s4391_s19 + $0x2c0] sm:$0xff] }
  0xb7   : > { %v421_v50 = vld [vmem:[%s4391_s19 + $0x6c0] sm:$0xff] }
  0xb9   : > { %3819 = vmatmul.mubr.msk.f32.gmra.mrb[56].mxu0 %vm469_vm1, %v262_v51  ;;  %4011 = vmatmul.mubr.msk.f32.gmra.mrb[56].mxu1 %vm469_vm1, %v390_v52  ;;  %v294_v51 = vld [vmem:[%s4391_s19 + $0x2c8] sm:$0xff] }
  0xba   : > { %3821 = vmatprep.mubr.msk.f32.mxu0 %vm469_vm1, %v263_v53  ;;  %4013 = vmatprep.mubr.msk.f32.mxu1 %vm469_vm1, %v391_v54  ;;  %v422_v52 = vld [vmem:[%s4391_s19 + $0x6c8] sm:$0xff]  ;;  %v295_v53 = vld [vmem:[%s4391_s19 + $0x2d0] sm:$0xff] }
  0xbb   : > { %v423_v54 = vld [vmem:[%s4391_s19 + $0x6d0] sm:$0xff] }
  0xbd   : > { %3822 = vmatmul.mubr.msk.f32.gmra.mrb[58].mxu0 %vm469_vm1, %v264_v55  ;;  %4014 = vmatmul.mubr.msk.f32.gmra.mrb[58].mxu1 %vm469_vm1, %v392_v56  ;;  %v296_v55 = vld [vmem:[%s4391_s19 + $0x2d8] sm:$0xff] }
  0xbe   : > { %3824 = vmatprep.mubr.msk.f32.mxu0 %vm469_vm1, %v265_v57  ;;  %4016 = vmatprep.mubr.msk.f32.mxu1 %vm469_vm1, %v393_v58  ;;  %v424_v56 = vld [vmem:[%s4391_s19 + $0x6d8] sm:$0xff]  ;;  %v297_v57 = vld [vmem:[%s4391_s19 + $0x2e0] sm:$0xff] }
  0xbf   : > { %v425_v58 = vld [vmem:[%s4391_s19 + $0x6e0] sm:$0xff] }
  0xc1   : > { %3825 = vmatmul.mubr.msk.f32.gmra.mrb[60].mxu0 %vm469_vm1, %v266_v59  ;;  %4017 = vmatmul.mubr.msk.f32.gmra.mrb[60].mxu1 %vm469_vm1, %v394_v60  ;;  %v298_v59 = vld [vmem:[%s4391_s19 + $0x2e8] sm:$0xff] }
  0xc2   : > { %3827 = vmatprep.mubr.msk.f32.mxu0 %vm469_vm1, %v267_v61  ;;  %4019 = vmatprep.mubr.msk.f32.mxu1 %vm469_vm1, %v395_v62  ;;  %v426_v60 = vld [vmem:[%s4391_s19 + $0x6e8] sm:$0xff]  ;;  %v299_v61 = vld [vmem:[%s4391_s19 + $0x2f0] sm:$0xff] }
  0xc3   : > { %v427_v62 = vld [vmem:[%s4391_s19 + $0x6f0] sm:$0xff] }
  0xc5   : > { %3828 = vmatmul.mubr.msk.f32.gmra.mrb[62].mxu0 %vm469_vm1, %v268_v63  ;;  %4020 = vmatmul.mubr.msk.f32.gmra.mrb[62].mxu1 %vm469_vm1, %v396_v0  ;;  %v300_v63 = vld [vmem:[%s4391_s19 + $0x2f8] sm:$0xff] }
  0xc6   : > { %3830 = vmatprep.mubr.msk.f32.mxu0 %vm469_vm1, %v269_v1  ;;  %4022 = vmatprep.mubr.msk.f32.mxu1 %vm469_vm1, %v397_v2  ;;  %v428_v0 = vld [vmem:[%s4391_s19 + $0x6f8] sm:$0xff]  ;;  %v301_v1 = vld [vmem:[%s4391_s19 + $0x300] sm:$0xff] }
  0xc7   : > { %v429_v2 = vld [vmem:[%s4391_s19 + $0x700] sm:$0xff] }
  0xc9   : > { %3831 = vmatmul.mubr.msk.f32.gmra.mrb[64].mxu0 %vm469_vm1, %v270_v3  ;;  %4023 = vmatmul.mubr.msk.f32.gmra.mrb[64].mxu1 %vm469_vm1, %v398_v4  ;;  %v302_v3 = vld [vmem:[%s4391_s19 + $0x308] sm:$0xff] }
  0xca   : > { %3833 = vmatprep.mubr.msk.f32.mxu0 %vm469_vm1, %v271_v5  ;;  %4025 = vmatprep.mubr.msk.f32.mxu1 %vm469_vm1, %v399_v6  ;;  %v430_v4 = vld [vmem:[%s4391_s19 + $0x708] sm:$0xff]  ;;  %v303_v5 = vld [vmem:[%s4391_s19 + $0x310] sm:$0xff] }
  0xcb   : > { %v431_v6 = vld [vmem:[%s4391_s19 + $0x710] sm:$0xff] }
  0xcd   : > { %3834 = vmatmul.mubr.msk.f32.gmra.mrb[66].mxu0 %vm469_vm1, %v272_v7  ;;  %4026 = vmatmul.mubr.msk.f32.gmra.mrb[66].mxu1 %vm469_vm1, %v400_v8  ;;  %v304_v7 = vld [vmem:[%s4391_s19 + $0x318] sm:$0xff] }
  0xce   : > { %3836 = vmatprep.mubr.msk.f32.mxu0 %vm469_vm1, %v273_v9  ;;  %4028 = vmatprep.mubr.msk.f32.mxu1 %vm469_vm1, %v401_v10  ;;  %v432_v8 = vld [vmem:[%s4391_s19 + $0x718] sm:$0xff]  ;;  %v305_v9 = vld [vmem:[%s4391_s19 + $0x320] sm:$0xff] }
  0xcf   : > { %v433_v10 = vld [vmem:[%s4391_s19 + $0x720] sm:$0xff] }
  0xd1   : > { %3837 = vmatmul.mubr.msk.f32.gmra.mrb[68].mxu0 %vm469_vm1, %v274_v11  ;;  %4029 = vmatmul.mubr.msk.f32.gmra.mrb[68].mxu1 %vm469_vm1, %v402_v12  ;;  %v306_v11 = vld [vmem:[%s4391_s19 + $0x328] sm:$0xff] }
  0xd2   : > { %3839 = vmatprep.mubr.msk.f32.mxu0 %vm469_vm1, %v275_v13  ;;  %4031 = vmatprep.mubr.msk.f32.mxu1 %vm469_vm1, %v403_v14  ;;  %v434_v12 = vld [vmem:[%s4391_s19 + $0x728] sm:$0xff]  ;;  %v307_v13 = vld [vmem:[%s4391_s19 + $0x330] sm:$0xff] }
  0xd3   : > { %v435_v14 = vld [vmem:[%s4391_s19 + $0x730] sm:$0xff] }
  0xd5   : > { %3840 = vmatmul.mubr.msk.f32.gmra.mrb[70].mxu0 %vm469_vm1, %v276_v15  ;;  %4032 = vmatmul.mubr.msk.f32.gmra.mrb[70].mxu1 %vm469_vm1, %v404_v16  ;;  %v308_v15 = vld [vmem:[%s4391_s19 + $0x338] sm:$0xff] }
  0xd6   : > { %3842 = vmatprep.mubr.msk.f32.mxu0 %vm469_vm1, %v277_v17  ;;  %4034 = vmatprep.mubr.msk.f32.mxu1 %vm469_vm1, %v405_v18  ;;  %v436_v16 = vld [vmem:[%s4391_s19 + $0x738] sm:$0xff]  ;;  %v309_v17 = vld [vmem:[%s4391_s19 + $0x340] sm:$0xff] }
  0xd7   : > { %v437_v18 = vld [vmem:[%s4391_s19 + $0x740] sm:$0xff] }
  0xd9   : > { %3843 = vmatmul.mubr.msk.f32.gmra.mrb[72].mxu0 %vm469_vm1, %v278_v19  ;;  %4035 = vmatmul.mubr.msk.f32.gmra.mrb[72].mxu1 %vm469_vm1, %v406_v20  ;;  %v310_v19 = vld [vmem:[%s4391_s19 + $0x348] sm:$0xff] }
  0xda   : > { %3845 = vmatprep.mubr.msk.f32.mxu0 %vm469_vm1, %v279_v21  ;;  %4037 = vmatprep.mubr.msk.f32.mxu1 %vm469_vm1, %v407_v22  ;;  %v438_v20 = vld [vmem:[%s4391_s19 + $0x748] sm:$0xff]  ;;  %v311_v21 = vld [vmem:[%s4391_s19 + $0x350] sm:$0xff] }
  0xdb   : > { %v439_v22 = vld [vmem:[%s4391_s19 + $0x750] sm:$0xff] }
  0xdd   : > { %3846 = vmatmul.mubr.msk.f32.gmra.mrb[74].mxu0 %vm469_vm1, %v280_v23  ;;  %4038 = vmatmul.mubr.msk.f32.gmra.mrb[74].mxu1 %vm469_vm1, %v408_v24  ;;  %v4829_v23 = vld [vmem:[%s5763_s2] ss:$0 sm:$0xff]  ;;  %v312_v24 = vld [vmem:[%s4391_s19 + $0x358] sm:$0xff] }
  0xde   : > { %3848 = vmatprep.mubr.msk.f32.mxu0 %vm469_vm1, %v281_v25  ;;  %4040 = vmatprep.mubr.msk.f32.mxu1 %vm469_vm1, %v409_v26  ;;  %v440_v25 = vld [vmem:[%s4391_s19 + $0x758] sm:$0xff]  ;;  %v313_v26 = vld [vmem:[%s4391_s19 + $0x360] sm:$0xff] }
  0xe1   : > { %3849 = vmatmul.mubr.msk.f32.gmra.mrb[76].mxu0 %vm469_vm1, %v282_v27  ;;  %4041 = vmatmul.mubr.msk.f32.gmra.mrb[76].mxu1 %vm469_vm1, %v410_v28  ;;  %v441_v27 = vld [vmem:[%s4391_s19 + $0x760] sm:$0xff] }
  0xe2   : > { %3851 = vmatprep.mubr.msk.f32.mxu0 %vm469_vm1, %v283_v29  ;;  %4043 = vmatprep.mubr.msk.f32.mxu1 %vm469_vm1, %v411_v30 }
  0xe5   : > { %3852 = vmatmul.mubr.msk.f32.gmra.mrb[78].mxu0 %vm469_vm1, %v284_v31  ;;  %4044 = vmatmul.mubr.msk.f32.gmra.mrb[78].mxu1 %vm469_vm1, %v412_v32 }
  0xe6   : > { %3854 = vmatprep.mubr.msk.f32.mxu0 %vm469_vm1, %v285_v33  ;;  %4046 = vmatprep.mubr.msk.f32.mxu1 %vm469_vm1, %v413_v34 }
  0xe9   : > { %3855 = vmatmul.mubr.msk.f32.gmra.mrb[80].mxu0 %vm469_vm1, %v286_v35  ;;  %4047 = vmatmul.mubr.msk.f32.gmra.mrb[80].mxu1 %vm469_vm1, %v414_v36  ;;  %v314_v36 = vld [vmem:[%s4391_s19 + $0x368] sm:$0xff] }
  0xea   : > { %3857 = vmatprep.mubr.msk.f32.mxu0 %vm469_vm1, %v287_v37  ;;  %4049 = vmatprep.mubr.msk.f32.mxu1 %vm469_vm1, %v415_v38  ;;  %v442_v37 = vld [vmem:[%s4391_s19 + $0x768] sm:$0xff] }
  0xed   : > { %3858 = vmatmul.mubr.msk.f32.gmra.mrb[82].mxu0 %vm469_vm1, %v288_v39  ;;  %4050 = vmatmul.mubr.msk.f32.gmra.mrb[82].mxu1 %vm469_vm1, %v416_v40  ;;  %v315_v40 = vld [vmem:[%s4391_s19 + $0x370] sm:$0xff] }
  0xee   : > { %3860 = vmatprep.mubr.msk.f32.mxu0 %vm469_vm1, %v289_v41  ;;  %4052 = vmatprep.mubr.msk.f32.mxu1 %vm469_vm1, %v417_v42  ;;  %v443_v41 = vld [vmem:[%s4391_s19 + $0x770] sm:$0xff] }
  0xf1   : > { %3861 = vmatmul.mubr.msk.f32.gmra.mrb[84].mxu0 %vm469_vm1, %v290_v43  ;;  %4053 = vmatmul.mubr.msk.f32.gmra.mrb[84].mxu1 %vm469_vm1, %v418_v44 }
  0xf2   : > { %3863 = vmatprep.mubr.msk.f32.mxu0 %vm469_vm1, %v291_v45  ;;  %4055 = vmatprep.mubr.msk.f32.mxu1 %vm469_vm1, %v419_v46 }
  0xf5   : > { %3864 = vmatmul.mubr.msk.f32.gmra.mrb[86].mxu0 %vm469_vm1, %v292_v47  ;;  %4056 = vmatmul.mubr.msk.f32.gmra.mrb[86].mxu1 %vm469_vm1, %v420_v48 }
  0xf6   : > { %3866 = vmatprep.mubr.msk.f32.mxu0 %vm469_vm1, %v293_v49  ;;  %4058 = vmatprep.mubr.msk.f32.mxu1 %vm469_vm1, %v421_v50 }
  0xf9   : > { %3867 = vmatmul.mubr.msk.f32.gmra.mrb[88].mxu0 %vm469_vm1, %v294_v51  ;;  %4059 = vmatmul.mubr.msk.f32.gmra.mrb[88].mxu1 %vm469_vm1, %v422_v52  ;;  %v316_v52 = vld [vmem:[%s4391_s19 + $0x378] sm:$0xff] }
  0xfa   : > { %3869 = vmatprep.mubr.msk.f32.mxu0 %vm469_vm1, %v295_v53  ;;  %4061 = vmatprep.mubr.msk.f32.mxu1 %vm469_vm1, %v423_v54  ;;  %v444_v53 = vld [vmem:[%s4391_s19 + $0x778] sm:$0xff] }
  0xfd   : > { %3870 = vmatmul.mubr.msk.f32.gmra.mrb[90].mxu0 %vm469_vm1, %v296_v55  ;;  %4062 = vmatmul.mubr.msk.f32.gmra.mrb[90].mxu1 %vm469_vm1, %v424_v56  ;;  %v317_v56 = vld [vmem:[%s4391_s19 + $0x380] sm:$0xff] }
  0xfe   : > { %3872 = vmatprep.mubr.msk.f32.mxu0 %vm469_vm1, %v297_v57  ;;  %4064 = vmatprep.mubr.msk.f32.mxu1 %vm469_vm1, %v425_v58  ;;  %v445_v57 = vld [vmem:[%s4391_s19 + $0x780] sm:$0xff] }
 0x101   : > { %3873 = vmatmul.mubr.msk.f32.gmra.mrb[92].mxu0 %vm469_vm1, %v298_v59  ;;  %4065 = vmatmul.mubr.msk.f32.gmra.mrb[92].mxu1 %vm469_vm1, %v426_v60 }
 0x102   : > { %3875 = vmatprep.mubr.msk.f32.mxu0 %vm469_vm1, %v299_v61  ;;  %4067 = vmatprep.mubr.msk.f32.mxu1 %vm469_vm1, %v427_v62 }
 0x105   : > { %3876 = vmatmul.mubr.msk.f32.gmra.mrb[94].mxu0 %vm469_vm1, %v300_v63  ;;  %4068 = vmatmul.mubr.msk.f32.gmra.mrb[94].mxu1 %vm469_vm1, %v428_v0 }
 0x106   : > { %3878 = vmatprep.mubr.msk.f32.mxu0 %vm469_vm1, %v301_v1  ;;  %4070 = vmatprep.mubr.msk.f32.mxu1 %vm469_vm1, %v429_v2 }
 0x109   : > { %3879 = vmatmul.mubr.msk.f32.gmra.mrb[96].mxu0 %vm469_vm1, %v302_v3  ;;  %4071 = vmatmul.mubr.msk.f32.gmra.mrb[96].mxu1 %vm469_vm1, %v430_v4  ;;  %v318_v4 = vld [vmem:[%s4391_s19 + $0x388] sm:$0xff] }
 0x10a   : > { %3881 = vmatprep.mubr.msk.f32.mxu0 %vm469_vm1, %v303_v5  ;;  %4073 = vmatprep.mubr.msk.f32.mxu1 %vm469_vm1, %v431_v6  ;;  %v446_v5 = vld [vmem:[%s4391_s19 + $0x788] sm:$0xff] }
 0x10d   : > { %3882 = vmatmul.mubr.msk.f32.gmra.mrb[98].mxu0 %vm469_vm1, %v304_v7  ;;  %4074 = vmatmul.mubr.msk.f32.gmra.mrb[98].mxu1 %vm469_vm1, %v432_v8  ;;  %v319_v8 = vld [vmem:[%s4391_s19 + $0x390] sm:$0xff] }
 0x10e   : > { %3884 = vmatprep.mubr.msk.f32.mxu0 %vm469_vm1, %v305_v9  ;;  %4076 = vmatprep.mubr.msk.f32.mxu1 %vm469_vm1, %v433_v10  ;;  %v447_v9 = vld [vmem:[%s4391_s19 + $0x790] sm:$0xff] }
 0x111   : > { %3885 = vmatmul.mubr.msk.f32.gmra.mrb[100].mxu0 %vm469_vm1, %v306_v11  ;;  %4077 = vmatmul.mubr.msk.f32.gmra.mrb[100].mxu1 %vm469_vm1, %v434_v12 }
 0x112   : > { %3887 = vmatprep.mubr.msk.f32.mxu0 %vm469_vm1, %v307_v13  ;;  %4079 = vmatprep.mubr.msk.f32.mxu1 %vm469_vm1, %v435_v14 }
 0x115   : > { %3888 = vmatmul.mubr.msk.f32.gmra.mrb[102].mxu0 %vm469_vm1, %v308_v15  ;;  %4080 = vmatmul.mubr.msk.f32.gmra.mrb[102].mxu1 %vm469_vm1, %v436_v16 }
 0x116   : > { %3890 = vmatprep.mubr.msk.f32.mxu0 %vm469_vm1, %v309_v17  ;;  %4082 = vmatprep.mubr.msk.f32.mxu1 %vm469_vm1, %v437_v18 }
 0x119   : > { %3891 = vmatmul.mubr.msk.f32.gmra.mrb[104].mxu0 %vm469_vm1, %v310_v19  ;;  %4083 = vmatmul.mubr.msk.f32.gmra.mrb[104].mxu1 %vm469_vm1, %v438_v20  ;;  %v320_v20 = vld [vmem:[%s4391_s19 + $0x398] sm:$0xff] }
 0x11a   : > { %3893 = vmatprep.mubr.msk.f32.mxu0 %vm469_vm1, %v311_v21  ;;  %4085 = vmatprep.mubr.msk.f32.mxu1 %vm469_vm1, %v439_v22  ;;  %v448_v21 = vld [vmem:[%s4391_s19 + $0x798] sm:$0xff] }
 0x11c   : > { %v3736_v28 = vpop.f32.mrb[0].mxu0  ;;  %v3928_v29 = vpop.f32.mrb[0].mxu1 }
 0x11d   : > { %v1314_v30 = vadd.f32 %v3736_v28, %v4829_v23  ;;  %v1954_v31 = vadd.f32 %v3928_v29, %v4829_v23  ;;  %v1308_v32 = vpop.f32.mrb[1].mxu0  ;;  %3894 = vmatmul.mubr.msk.f32.gmra.mrb[106].mxu0 %vm469_vm1, %v312_v24  ;;  %v1948_v33 = vpop.f32.mrb[1].mxu1  ;;  %4086 = vmatmul.mubr.msk.f32.gmra.mrb[106].mxu1 %vm469_vm1, %v440_v25  ;;  %v321_v25 = vld [vmem:[%s4391_s19 + $0x3a0] sm:$0xff] }
 0x11e   : > { %v1309_v34 = vadd.f32 %v4829_v23, %v1308_v32  ;;  %v1949_v35 = vadd.f32 %v4829_v23, %v1948_v33  ;;  %3896 = vmatprep.mubr.msk.f32.mxu0 %vm469_vm1, %v313_v26  ;;  %4088 = vmatprep.mubr.msk.f32.mxu1 %vm469_vm1, %v441_v27  ;;  %v449_v26 = vld [vmem:[%s4391_s19 + $0x7a0] sm:$0xff] }
 0x11f   : > { %v2588_v38 = vmax.f32 %v1314_v30, 0.0  ;;  %v2716_v39 = vmax.f32 %v1954_v31, 0.0 }
 0x120   : > { %v2587_v42 = vmax.f32 %v1309_v34, 0.0  ;;  %v2715_v43 = vmax.f32 %v1949_v35, 0.0  ;;  %v3739_v44 = vpop.f32.mrb[2].mxu0  ;;  %v3931_v45 = vpop.f32.mrb[2].mxu1 }
 0x121   : > { %2845 = vst.msk [vmem:[%s4851_s10 + $0x8] sm:$0xff] %vm2843_vm2, %v2588_v38  ;;  %2973 = vst.msk [vmem:[%s4851_s10 + $0x408] sm:$0xff] %vm2843_vm2, %v2716_v39  ;;  %v1324_v46 = vadd.f32 %v3739_v44, %v4829_v23  ;;  %v1964_v47 = vadd.f32 %v3931_v45, %v4829_v23  ;;  %v1318_v48 = vpop.f32.mrb[3].mxu0  ;;  %3897 = vmatmul.mubr.msk.f32.gmra.mrb[108].mxu0 %vm469_vm1, %v314_v36  ;;  %v1958_v49 = vpop.f32.mrb[3].mxu1  ;;  %4089 = vmatmul.mubr.msk.f32.gmra.mrb[108].mxu1 %vm469_vm1, %v442_v37  ;;  %v322_v37 = vld [vmem:[%s4391_s19 + $0x3a8] sm:$0xff] }
 0x122   : > { %2844 = vst.msk [vmem:[%s4851_s10] sm:$0xff] %vm2843_vm2, %v2587_v42  ;;  %2972 = vst.msk [vmem:[%s4851_s10 + $0x400] sm:$0xff] %vm2843_vm2, %v2715_v43  ;;  %v1319_v50 = vadd.f32 %v4829_v23, %v1318_v48  ;;  %v1959_v51 = vadd.f32 %v4829_v23, %v1958_v49  ;;  %3899 = vmatprep.mubr.msk.f32.mxu0 %vm469_vm1, %v315_v40  ;;  %4091 = vmatprep.mubr.msk.f32.mxu1 %vm469_vm1, %v443_v41  ;;  %v450_v38 = vld [vmem:[%s4391_s19 + $0x7a8] sm:$0xff]  ;;  %v323_v41 = vld [vmem:[%s4391_s19 + $0x3b0] sm:$0xff] }
 0x123   : > { %v2590_v54 = vmax.f32 %v1324_v46, 0.0  ;;  %v2718_v55 = vmax.f32 %v1964_v47, 0.0  ;;  %v451_v42 = vld [vmem:[%s4391_s19 + $0x7b0] sm:$0xff] }
 0x124   : > { %v2589_v58 = vmax.f32 %v1319_v50, 0.0  ;;  %v2717_v59 = vmax.f32 %v1959_v51, 0.0  ;;  %v3742_v60 = vpop.f32.mrb[4].mxu0  ;;  %v3934_v61 = vpop.f32.mrb[4].mxu1 }
 0x125   : > { %2847 = vst.msk [vmem:[%s4851_s10 + $0x18] sm:$0xff] %vm2843_vm2, %v2590_v54  ;;  %2975 = vst.msk [vmem:[%s4851_s10 + $0x418] sm:$0xff] %vm2843_vm2, %v2718_v55  ;;  %v1334_v62 = vadd.f32 %v3742_v60, %v4829_v23  ;;  %v1974_v63 = vadd.f32 %v3934_v61, %v4829_v23  ;;  %v1328_v0 = vpop.f32.mrb[5].mxu0  ;;  %3900 = vmatmul.mubr.msk.f32.gmra.mrb[110].mxu0 %vm469_vm1, %v316_v52  ;;  %v1968_v1 = vpop.f32.mrb[5].mxu1  ;;  %4092 = vmatmul.mubr.msk.f32.gmra.mrb[110].mxu1 %vm469_vm1, %v444_v53  ;;  %v324_v53 = vld [vmem:[%s4391_s19 + $0x3b8] sm:$0xff] }
 0x126   : > { %2846 = vst.msk [vmem:[%s4851_s10 + $0x10] sm:$0xff] %vm2843_vm2, %v2589_v58  ;;  %2974 = vst.msk [vmem:[%s4851_s10 + $0x410] sm:$0xff] %vm2843_vm2, %v2717_v59  ;;  %v1329_v2 = vadd.f32 %v4829_v23, %v1328_v0  ;;  %v1969_v3 = vadd.f32 %v4829_v23, %v1968_v1  ;;  %3902 = vmatprep.mubr.msk.f32.mxu0 %vm469_vm1, %v317_v56  ;;  %4094 = vmatprep.mubr.msk.f32.mxu1 %vm469_vm1, %v445_v57  ;;  %v452_v54 = vld [vmem:[%s4391_s19 + $0x7b8] sm:$0xff]  ;;  %v325_v57 = vld [vmem:[%s4391_s19 + $0x3c0] sm:$0xff] }
 0x127   : > { %v2592_v6 = vmax.f32 %v1334_v62, 0.0  ;;  %v2720_v7 = vmax.f32 %v1974_v63, 0.0  ;;  %v453_v58 = vld [vmem:[%s4391_s19 + $0x7c0] sm:$0xff] }
 0x128   : > { %v2591_v10 = vmax.f32 %v1329_v2, 0.0  ;;  %v2719_v11 = vmax.f32 %v1969_v3, 0.0  ;;  %v3745_v12 = vpop.f32.mrb[6].mxu0  ;;  %v3937_v13 = vpop.f32.mrb[6].mxu1 }
 0x129   : > { %2849 = vst.msk [vmem:[%s4851_s10 + $0x28] sm:$0xff] %vm2843_vm2, %v2592_v6  ;;  %2977 = vst.msk [vmem:[%s4851_s10 + $0x428] sm:$0xff] %vm2843_vm2, %v2720_v7  ;;  %v1344_v14 = vadd.f32 %v3745_v12, %v4829_v23  ;;  %v1984_v15 = vadd.f32 %v3937_v13, %v4829_v23  ;;  %v1338_v16 = vpop.f32.mrb[7].mxu0  ;;  %3903 = vmatmul.mubr.msk.f32.gmra.mrb[112].mxu0 %vm469_vm1, %v318_v4  ;;  %v1978_v17 = vpop.f32.mrb[7].mxu1  ;;  %4095 = vmatmul.mubr.msk.f32.gmra.mrb[112].mxu1 %vm469_vm1, %v446_v5  ;;  %v326_v5 = vld [vmem:[%s4391_s19 + $0x3c8] sm:$0xff] }
 0x12a   : > { %2848 = vst.msk [vmem:[%s4851_s10 + $0x20] sm:$0xff] %vm2843_vm2, %v2591_v10  ;;  %2976 = vst.msk [vmem:[%s4851_s10 + $0x420] sm:$0xff] %vm2843_vm2, %v2719_v11  ;;  %v1339_v18 = vadd.f32 %v4829_v23, %v1338_v16  ;;  %v1979_v19 = vadd.f32 %v4829_v23, %v1978_v17  ;;  %3905 = vmatprep.mubr.msk.f32.mxu0 %vm469_vm1, %v319_v8  ;;  %4097 = vmatprep.mubr.msk.f32.mxu1 %vm469_vm1, %v447_v9  ;;  %v454_v6 = vld [vmem:[%s4391_s19 + $0x7c8] sm:$0xff]  ;;  %v327_v9 = vld [vmem:[%s4391_s19 + $0x3d0] sm:$0xff] }
 0x12b   : > { %v2594_v22 = vmax.f32 %v1344_v14, 0.0  ;;  %v2722_v24 = vmax.f32 %v1984_v15, 0.0  ;;  %v455_v10 = vld [vmem:[%s4391_s19 + $0x7d0] sm:$0xff] }
 0x12c   : > { %v2593_v27 = vmax.f32 %v1339_v18, 0.0  ;;  %v2721_v28 = vmax.f32 %v1979_v19, 0.0  ;;  %v3748_v29 = vpop.f32.mrb[8].mxu0  ;;  %v3940_v30 = vpop.f32.mrb[8].mxu1 }
 0x12d   : > { %2851 = vst.msk [vmem:[%s4851_s10 + $0x38] sm:$0xff] %vm2843_vm2, %v2594_v22  ;;  %2979 = vst.msk [vmem:[%s4851_s10 + $0x438] sm:$0xff] %vm2843_vm2, %v2722_v24  ;;  %v1354_v31 = vadd.f32 %v3748_v29, %v4829_v23  ;;  %v1994_v32 = vadd.f32 %v3940_v30, %v4829_v23  ;;  %v1348_v33 = vpop.f32.mrb[9].mxu0  ;;  %3906 = vmatmul.mubr.msk.f32.gmra.mrb[114].mxu0 %vm469_vm1, %v320_v20  ;;  %v1988_v34 = vpop.f32.mrb[9].mxu1  ;;  %4098 = vmatmul.mubr.msk.f32.gmra.mrb[114].mxu1 %vm469_vm1, %v448_v21  ;;  %v328_v21 = vld [vmem:[%s4391_s19 + $0x3d8] sm:$0xff] }
 0x12e   : > { %2850 = vst.msk [vmem:[%s4851_s10 + $0x30] sm:$0xff] %vm2843_vm2, %v2593_v27  ;;  %2978 = vst.msk [vmem:[%s4851_s10 + $0x430] sm:$0xff] %vm2843_vm2, %v2721_v28  ;;  %v1349_v35 = vadd.f32 %v4829_v23, %v1348_v33  ;;  %v1989_v36 = vadd.f32 %v4829_v23, %v1988_v34  ;;  %3908 = vmatprep.mubr.msk.f32.mxu0 %vm469_vm1, %v321_v25  ;;  %4100 = vmatprep.mubr.msk.f32.mxu1 %vm469_vm1, %v449_v26  ;;  %v456_v22 = vld [vmem:[%s4391_s19 + $0x7d8] sm:$0xff]  ;;  %v329_v26 = vld [vmem:[%s4391_s19 + $0x3e0] sm:$0xff] }
 0x12f   : > { %v2596_v39 = vmax.f32 %v1354_v31, 0.0  ;;  %v2724_v40 = vmax.f32 %v1994_v32, 0.0  ;;  %v457_v27 = vld [vmem:[%s4391_s19 + $0x7e0] sm:$0xff] }
 0x130   : > { %v2595_v43 = vmax.f32 %v1349_v35, 0.0  ;;  %v2723_v44 = vmax.f32 %v1989_v36, 0.0  ;;  %v3751_v45 = vpop.f32.mrb[10].mxu0  ;;  %v3943_v46 = vpop.f32.mrb[10].mxu1 }
 0x131   : > { %2853 = vst.msk [vmem:[%s4851_s10 + $0x48] sm:$0xff] %vm2843_vm2, %v2596_v39  ;;  %2981 = vst.msk [vmem:[%s4851_s10 + $0x448] sm:$0xff] %vm2843_vm2, %v2724_v40  ;;  %v1364_v47 = vadd.f32 %v3751_v45, %v4829_v23  ;;  %v2004_v48 = vadd.f32 %v3943_v46, %v4829_v23  ;;  %v1358_v49 = vpop.f32.mrb[11].mxu0  ;;  %3909 = vmatmul.mubr.msk.f32.gmra.mrb[116].mxu0 %vm469_vm1, %v322_v37  ;;  %v1998_v50 = vpop.f32.mrb[11].mxu1  ;;  %4101 = vmatmul.mubr.msk.f32.gmra.mrb[116].mxu1 %vm469_vm1, %v450_v38  ;;  %v330_v38 = vld [vmem:[%s4391_s19 + $0x3e8] sm:$0xff] }
 0x132   : > { %2852 = vst.msk [vmem:[%s4851_s10 + $0x40] sm:$0xff] %vm2843_vm2, %v2595_v43  ;;  %2980 = vst.msk [vmem:[%s4851_s10 + $0x440] sm:$0xff] %vm2843_vm2, %v2723_v44  ;;  %v1359_v51 = vadd.f32 %v4829_v23, %v1358_v49  ;;  %v1999_v52 = vadd.f32 %v4829_v23, %v1998_v50  ;;  %3911 = vmatprep.mubr.msk.f32.mxu0 %vm469_vm1, %v323_v41  ;;  %4103 = vmatprep.mubr.msk.f32.mxu1 %vm469_vm1, %v451_v42  ;;  %v458_v39 = vld [vmem:[%s4391_s19 + $0x7e8] sm:$0xff]  ;;  %v331_v42 = vld [vmem:[%s4391_s19 + $0x3f0] sm:$0xff] }
 0x133   : > { %v2598_v55 = vmax.f32 %v1364_v47, 0.0  ;;  %v2726_v56 = vmax.f32 %v2004_v48, 0.0  ;;  %v459_v43 = vld [vmem:[%s4391_s19 + $0x7f0] sm:$0xff] }
 0x134   : > { %v2597_v59 = vmax.f32 %v1359_v51, 0.0  ;;  %v2725_v60 = vmax.f32 %v1999_v52, 0.0  ;;  %v3754_v61 = vpop.f32.mrb[12].mxu0  ;;  %v3946_v62 = vpop.f32.mrb[12].mxu1 }
 0x135   : > { %2855 = vst.msk [vmem:[%s4851_s10 + $0x58] sm:$0xff] %vm2843_vm2, %v2598_v55  ;;  %2983 = vst.msk [vmem:[%s4851_s10 + $0x458] sm:$0xff] %vm2843_vm2, %v2726_v56  ;;  %v1374_v63 = vadd.f32 %v3754_v61, %v4829_v23  ;;  %v2014_v0 = vadd.f32 %v3946_v62, %v4829_v23  ;;  %v1368_v1 = vpop.f32.mrb[13].mxu0  ;;  %3912 = vmatmul.mubr.msk.f32.gmra.mrb[118].mxu0 %vm469_vm1, %v324_v53  ;;  %v2008_v2 = vpop.f32.mrb[13].mxu1  ;;  %4104 = vmatmul.mubr.msk.f32.gmra.mrb[118].mxu1 %vm469_vm1, %v452_v54  ;;  %v332_v54 = vld [vmem:[%s4391_s19 + $0x3f8] sm:$0xff] }
 0x136   : > { %2854 = vst.msk [vmem:[%s4851_s10 + $0x50] sm:$0xff] %vm2843_vm2, %v2597_v59  ;;  %2982 = vst.msk [vmem:[%s4851_s10 + $0x450] sm:$0xff] %vm2843_vm2, %v2725_v60  ;;  %v1369_v3 = vadd.f32 %v4829_v23, %v1368_v1  ;;  %v2009_v4 = vadd.f32 %v4829_v23, %v2008_v2  ;;  %3914 = vmatprep.mubr.msk.f32.mxu0 %vm469_vm1, %v325_v57  ;;  %4106 = vmatprep.mubr.msk.f32.mxu1 %vm469_vm1, %v453_v58  ;;  %v460_v55 = vld [vmem:[%s4391_s19 + $0x7f8] sm:$0xff] }
 0x137   : > { %v2600_v7 = vmax.f32 %v1374_v63, 0.0  ;;  %v2728_v8 = vmax.f32 %v2014_v0, 0.0 }
 0x138   : > { %v2599_v11 = vmax.f32 %v1369_v3, 0.0  ;;  %v2727_v12 = vmax.f32 %v2009_v4, 0.0  ;;  %v3757_v13 = vpop.f32.mrb[14].mxu0  ;;  %v3949_v14 = vpop.f32.mrb[14].mxu1 }
 0x139   : > { %2857 = vst.msk [vmem:[%s4851_s10 + $0x68] sm:$0xff] %vm2843_vm2, %v2600_v7  ;;  %2985 = vst.msk [vmem:[%s4851_s10 + $0x468] sm:$0xff] %vm2843_vm2, %v2728_v8  ;;  %v1384_v15 = vadd.f32 %v3757_v13, %v4829_v23  ;;  %v2024_v16 = vadd.f32 %v3949_v14, %v4829_v23  ;;  %v1378_v17 = vpop.f32.mrb[15].mxu0  ;;  %3915 = vmatmul.mubr.msk.f32.gmra.mrb[120].mxu0 %vm469_vm1, %v326_v5  ;;  %v2018_v18 = vpop.f32.mrb[15].mxu1  ;;  %4107 = vmatmul.mubr.msk.f32.gmra.mrb[120].mxu1 %vm469_vm1, %v454_v6 }
 0x13a   : > { %2856 = vst.msk [vmem:[%s4851_s10 + $0x60] sm:$0xff] %vm2843_vm2, %v2599_v11  ;;  %2984 = vst.msk [vmem:[%s4851_s10 + $0x460] sm:$0xff] %vm2843_vm2, %v2727_v12  ;;  %v1379_v19 = vadd.f32 %v4829_v23, %v1378_v17  ;;  %v2019_v20 = vadd.f32 %v4829_v23, %v2018_v18  ;;  %3917 = vmatprep.mubr.msk.f32.mxu0 %vm469_vm1, %v327_v9  ;;  %4109 = vmatprep.mubr.msk.f32.mxu1 %vm469_vm1, %v455_v10 }
 0x13b   : > { %v2602_v24 = vmax.f32 %v1384_v15, 0.0  ;;  %v2730_v25 = vmax.f32 %v2024_v16, 0.0 }
 0x13c   : > { %v2601_v28 = vmax.f32 %v1379_v19, 0.0  ;;  %v2729_v29 = vmax.f32 %v2019_v20, 0.0  ;;  %v3760_v30 = vpop.f32.mrb[16].mxu0  ;;  %v3952_v31 = vpop.f32.mrb[16].mxu1 }
 0x13d   : > { %2859 = vst.msk [vmem:[%s4851_s10 + $0x78] sm:$0xff] %vm2843_vm2, %v2602_v24  ;;  %2987 = vst.msk [vmem:[%s4851_s10 + $0x478] sm:$0xff] %vm2843_vm2, %v2730_v25  ;;  %v1394_v32 = vadd.f32 %v3760_v30, %v4829_v23  ;;  %v2034_v33 = vadd.f32 %v3952_v31, %v4829_v23  ;;  %v1388_v34 = vpop.f32.mrb[17].mxu0  ;;  %3918 = vmatmul.mubr.msk.f32.gmra.mrb[122].mxu0 %vm469_vm1, %v328_v21  ;;  %v2028_v35 = vpop.f32.mrb[17].mxu1  ;;  %4110 = vmatmul.mubr.msk.f32.gmra.mrb[122].mxu1 %vm469_vm1, %v456_v22 }
 0x13e   : > { %2858 = vst.msk [vmem:[%s4851_s10 + $0x70] sm:$0xff] %vm2843_vm2, %v2601_v28  ;;  %2986 = vst.msk [vmem:[%s4851_s10 + $0x470] sm:$0xff] %vm2843_vm2, %v2729_v29  ;;  %v1389_v36 = vadd.f32 %v4829_v23, %v1388_v34  ;;  %v2029_v37 = vadd.f32 %v4829_v23, %v2028_v35  ;;  %3920 = vmatprep.mubr.msk.f32.mxu0 %vm469_vm1, %v329_v26  ;;  %4112 = vmatprep.mubr.msk.f32.mxu1 %vm469_vm1, %v457_v27 }
 0x13f   : > { %v2604_v40 = vmax.f32 %v1394_v32, 0.0  ;;  %v2732_v41 = vmax.f32 %v2034_v33, 0.0 }
 0x140   : > { %v2603_v44 = vmax.f32 %v1389_v36, 0.0  ;;  %v2731_v45 = vmax.f32 %v2029_v37, 0.0  ;;  %v3763_v46 = vpop.f32.mrb[18].mxu0  ;;  %v3955_v47 = vpop.f32.mrb[18].mxu1 }
 0x141   : > { %2861 = vst.msk [vmem:[%s4851_s10 + $0x88] sm:$0xff] %vm2843_vm2, %v2604_v40  ;;  %2989 = vst.msk [vmem:[%s4851_s10 + $0x488] sm:$0xff] %vm2843_vm2, %v2732_v41  ;;  %v1404_v48 = vadd.f32 %v3763_v46, %v4829_v23  ;;  %v2044_v49 = vadd.f32 %v3955_v47, %v4829_v23  ;;  %v1398_v50 = vpop.f32.mrb[19].mxu0  ;;  %3921 = vmatmul.mubr.msk.f32.gmra.mrb[124].mxu0 %vm469_vm1, %v330_v38  ;;  %v2038_v51 = vpop.f32.mrb[19].mxu1  ;;  %4113 = vmatmul.mubr.msk.f32.gmra.mrb[124].mxu1 %vm469_vm1, %v458_v39 }
 0x142   : > { %2860 = vst.msk [vmem:[%s4851_s10 + $0x80] sm:$0xff] %vm2843_vm2, %v2603_v44  ;;  %2988 = vst.msk [vmem:[%s4851_s10 + $0x480] sm:$0xff] %vm2843_vm2, %v2731_v45  ;;  %v1399_v52 = vadd.f32 %v4829_v23, %v1398_v50  ;;  %v2039_v53 = vadd.f32 %v4829_v23, %v2038_v51  ;;  %3923 = vmatprep.mubr.msk.f32.mxu0 %vm469_vm1, %v331_v42  ;;  %4115 = vmatprep.mubr.msk.f32.mxu1 %vm469_vm1, %v459_v43 }
 0x143   : > { %v2606_v56 = vmax.f32 %v1404_v48, 0.0  ;;  %v2734_v57 = vmax.f32 %v2044_v49, 0.0 }
 0x144   : > { %v2605_v58 = vmax.f32 %v1399_v52, 0.0  ;;  %v2733_v59 = vmax.f32 %v2039_v53, 0.0  ;;  %v3766_v60 = vpop.f32.mrb[20].mxu0  ;;  %v3958_v61 = vpop.f32.mrb[20].mxu1 }
 0x145   : > { %2863 = vst.msk [vmem:[%s4851_s10 + $0x98] sm:$0xff] %vm2843_vm2, %v2606_v56  ;;  %2991 = vst.msk [vmem:[%s4851_s10 + $0x498] sm:$0xff] %vm2843_vm2, %v2734_v57  ;;  %v1414_v62 = vadd.f32 %v3766_v60, %v4829_v23  ;;  %v2054_v63 = vadd.f32 %v3958_v61, %v4829_v23  ;;  %v1408_v0 = vpop.f32.mrb[21].mxu0  ;;  %3924 = vmatmul.mubr.msk.f32.gmra.mrb[126].mxu0 %vm469_vm1, %v332_v54  ;;  %v2048_v1 = vpop.f32.mrb[21].mxu1  ;;  %4116 = vmatmul.mubr.msk.f32.gmra.mrb[126].mxu1 %vm469_vm1, %v460_v55 }
 0x146   : > { %2862 = vst.msk [vmem:[%s4851_s10 + $0x90] sm:$0xff] %vm2843_vm2, %v2605_v58  ;;  %2990 = vst.msk [vmem:[%s4851_s10 + $0x490] sm:$0xff] %vm2843_vm2, %v2733_v59  ;;  %v1409_v2 = vadd.f32 %v4829_v23, %v1408_v0  ;;  %v2049_v3 = vadd.f32 %v4829_v23, %v2048_v1 }
 0x147   : > { %v2608_v4 = vmax.f32 %v1414_v62, 0.0  ;;  %v2736_v5 = vmax.f32 %v2054_v63, 0.0 }
 0x148   : > { %v2607_v6 = vmax.f32 %v1409_v2, 0.0  ;;  %v2735_v7 = vmax.f32 %v2049_v3, 0.0  ;;  %v3769_v8 = vpop.f32.mrb[22].mxu0  ;;  %v3961_v9 = vpop.f32.mrb[22].mxu1 }
 0x149   : > { %2865 = vst.msk [vmem:[%s4851_s10 + $0xa8] sm:$0xff] %vm2843_vm2, %v2608_v4  ;;  %2993 = vst.msk [vmem:[%s4851_s10 + $0x4a8] sm:$0xff] %vm2843_vm2, %v2736_v5  ;;  %v1424_v10 = vadd.f32 %v3769_v8, %v4829_v23  ;;  %v2064_v11 = vadd.f32 %v3961_v9, %v4829_v23  ;;  %v1418_v12 = vpop.f32.mrb[23].mxu0  ;;  %v2058_v13 = vpop.f32.mrb[23].mxu1 }
 0x14a   : > { %2864 = vst.msk [vmem:[%s4851_s10 + $0xa0] sm:$0xff] %vm2843_vm2, %v2607_v6  ;;  %2992 = vst.msk [vmem:[%s4851_s10 + $0x4a0] sm:$0xff] %vm2843_vm2, %v2735_v7  ;;  %v1419_v14 = vadd.f32 %v4829_v23, %v1418_v12  ;;  %v2059_v15 = vadd.f32 %v4829_v23, %v2058_v13 }
 0x14b   : > { %v2610_v16 = vmax.f32 %v1424_v10, 0.0  ;;  %v2738_v17 = vmax.f32 %v2064_v11, 0.0 }
 0x14c   : > { %v2609_v18 = vmax.f32 %v1419_v14, 0.0  ;;  %v2737_v19 = vmax.f32 %v2059_v15, 0.0  ;;  %v3772_v20 = vpop.f32.mrb[24].mxu0  ;;  %v3964_v21 = vpop.f32.mrb[24].mxu1 }
 0x14d   : > { %2867 = vst.msk [vmem:[%s4851_s10 + $0xb8] sm:$0xff] %vm2843_vm2, %v2610_v16  ;;  %2995 = vst.msk [vmem:[%s4851_s10 + $0x4b8] sm:$0xff] %vm2843_vm2, %v2738_v17  ;;  %v1434_v22 = vadd.f32 %v3772_v20, %v4829_v23  ;;  %v2074_v24 = vadd.f32 %v3964_v21, %v4829_v23  ;;  %v1428_v25 = vpop.f32.mrb[25].mxu0  ;;  %v2068_v26 = vpop.f32.mrb[25].mxu1 }
 0x14e   : > { %2866 = vst.msk [vmem:[%s4851_s10 + $0xb0] sm:$0xff] %vm2843_vm2, %v2609_v18  ;;  %2994 = vst.msk [vmem:[%s4851_s10 + $0x4b0] sm:$0xff] %vm2843_vm2, %v2737_v19  ;;  %v1429_v27 = vadd.f32 %v4829_v23, %v1428_v25  ;;  %v2069_v28 = vadd.f32 %v4829_v23, %v2068_v26 }
 0x14f   : > { %v2612_v29 = vmax.f32 %v1434_v22, 0.0  ;;  %v2740_v30 = vmax.f32 %v2074_v24, 0.0 }
 0x150   : > { %v2611_v31 = vmax.f32 %v1429_v27, 0.0  ;;  %v2739_v32 = vmax.f32 %v2069_v28, 0.0  ;;  %v3775_v33 = vpop.f32.mrb[26].mxu0  ;;  %v3967_v34 = vpop.f32.mrb[26].mxu1 }
 0x151   : > { %2869 = vst.msk [vmem:[%s4851_s10 + $0xc8] sm:$0xff] %vm2843_vm2, %v2612_v29  ;;  %2997 = vst.msk [vmem:[%s4851_s10 + $0x4c8] sm:$0xff] %vm2843_vm2, %v2740_v30  ;;  %v1444_v35 = vadd.f32 %v3775_v33, %v4829_v23  ;;  %v2084_v36 = vadd.f32 %v3967_v34, %v4829_v23  ;;  %v1438_v37 = vpop.f32.mrb[27].mxu0  ;;  %v2078_v38 = vpop.f32.mrb[27].mxu1 }
 0x152   : > { %2868 = vst.msk [vmem:[%s4851_s10 + $0xc0] sm:$0xff] %vm2843_vm2, %v2611_v31  ;;  %2996 = vst.msk [vmem:[%s4851_s10 + $0x4c0] sm:$0xff] %vm2843_vm2, %v2739_v32  ;;  %v1439_v39 = vadd.f32 %v4829_v23, %v1438_v37  ;;  %v2079_v40 = vadd.f32 %v4829_v23, %v2078_v38 }
 0x153   : > { %v2614_v41 = vmax.f32 %v1444_v35, 0.0  ;;  %v2742_v42 = vmax.f32 %v2084_v36, 0.0 }
 0x154   : > { %v2613_v43 = vmax.f32 %v1439_v39, 0.0  ;;  %v2741_v44 = vmax.f32 %v2079_v40, 0.0  ;;  %v3778_v45 = vpop.f32.mrb[28].mxu0  ;;  %v3970_v46 = vpop.f32.mrb[28].mxu1 }
 0x155   : > { %2871 = vst.msk [vmem:[%s4851_s10 + $0xd8] sm:$0xff] %vm2843_vm2, %v2614_v41  ;;  %2999 = vst.msk [vmem:[%s4851_s10 + $0x4d8] sm:$0xff] %vm2843_vm2, %v2742_v42  ;;  %v1454_v47 = vadd.f32 %v3778_v45, %v4829_v23  ;;  %v2094_v48 = vadd.f32 %v3970_v46, %v4829_v23  ;;  %v1448_v49 = vpop.f32.mrb[29].mxu0  ;;  %v2088_v50 = vpop.f32.mrb[29].mxu1 }
 0x156   : > { %2870 = vst.msk [vmem:[%s4851_s10 + $0xd0] sm:$0xff] %vm2843_vm2, %v2613_v43  ;;  %2998 = vst.msk [vmem:[%s4851_s10 + $0x4d0] sm:$0xff] %vm2843_vm2, %v2741_v44  ;;  %v1449_v51 = vadd.f32 %v4829_v23, %v1448_v49  ;;  %v2089_v52 = vadd.f32 %v4829_v23, %v2088_v50 }
 0x157   : > { %v2616_v53 = vmax.f32 %v1454_v47, 0.0  ;;  %v2744_v54 = vmax.f32 %v2094_v48, 0.0 }
 0x158   : > { %v2615_v55 = vmax.f32 %v1449_v51, 0.0  ;;  %v2743_v56 = vmax.f32 %v2089_v52, 0.0  ;;  %v3781_v57 = vpop.f32.mrb[30].mxu0  ;;  %v3973_v58 = vpop.f32.mrb[30].mxu1 }
 0x159   : > { %2873 = vst.msk [vmem:[%s4851_s10 + $0xe8] sm:$0xff] %vm2843_vm2, %v2616_v53  ;;  %3001 = vst.msk [vmem:[%s4851_s10 + $0x4e8] sm:$0xff] %vm2843_vm2, %v2744_v54  ;;  %v1464_v59 = vadd.f32 %v3781_v57, %v4829_v23  ;;  %v2104_v60 = vadd.f32 %v3973_v58, %v4829_v23  ;;  %v1458_v61 = vpop.f32.mrb[31].mxu0  ;;  %v2098_v62 = vpop.f32.mrb[31].mxu1 }
 0x15a   : > { %2872 = vst.msk [vmem:[%s4851_s10 + $0xe0] sm:$0xff] %vm2843_vm2, %v2615_v55  ;;  %3000 = vst.msk [vmem:[%s4851_s10 + $0x4e0] sm:$0xff] %vm2843_vm2, %v2743_v56  ;;  %v1459_v63 = vadd.f32 %v4829_v23, %v1458_v61  ;;  %v2099_v0 = vadd.f32 %v4829_v23, %v2098_v62 }
 0x15b   : > { %v2618_v1 = vmax.f32 %v1464_v59, 0.0  ;;  %v2746_v2 = vmax.f32 %v2104_v60, 0.0 }
 0x15c   : > { %v2617_v3 = vmax.f32 %v1459_v63, 0.0  ;;  %v2745_v4 = vmax.f32 %v2099_v0, 0.0  ;;  %v3784_v5 = vpop.f32.mrb[32].mxu0  ;;  %v3976_v6 = vpop.f32.mrb[32].mxu1 }
 0x15d   : > { %2875 = vst.msk [vmem:[%s4851_s10 + $0xf8] sm:$0xff] %vm2843_vm2, %v2618_v1  ;;  %3003 = vst.msk [vmem:[%s4851_s10 + $0x4f8] sm:$0xff] %vm2843_vm2, %v2746_v2  ;;  %v1474_v7 = vadd.f32 %v3784_v5, %v4829_v23  ;;  %v2114_v8 = vadd.f32 %v3976_v6, %v4829_v23  ;;  %v1468_v9 = vpop.f32.mrb[33].mxu0  ;;  %v2108_v10 = vpop.f32.mrb[33].mxu1 }
 0x15e   : > { %2874 = vst.msk [vmem:[%s4851_s10 + $0xf0] sm:$0xff] %vm2843_vm2, %v2617_v3  ;;  %3002 = vst.msk [vmem:[%s4851_s10 + $0x4f0] sm:$0xff] %vm2843_vm2, %v2745_v4  ;;  %v1469_v11 = vadd.f32 %v4829_v23, %v1468_v9  ;;  %v2109_v12 = vadd.f32 %v4829_v23, %v2108_v10 }
 0x15f   : > { %v2620_v13 = vmax.f32 %v1474_v7, 0.0  ;;  %v2748_v14 = vmax.f32 %v2114_v8, 0.0 }
 0x160   : > { %v2619_v15 = vmax.f32 %v1469_v11, 0.0  ;;  %v2747_v16 = vmax.f32 %v2109_v12, 0.0  ;;  %v3787_v17 = vpop.f32.mrb[34].mxu0  ;;  %v3979_v18 = vpop.f32.mrb[34].mxu1 }
 0x161   : > { %2877 = vst.msk [vmem:[%s4851_s10 + $0x108] sm:$0xff] %vm2843_vm2, %v2620_v13  ;;  %3005 = vst.msk [vmem:[%s4851_s10 + $0x508] sm:$0xff] %vm2843_vm2, %v2748_v14  ;;  %v1484_v19 = vadd.f32 %v3787_v17, %v4829_v23  ;;  %v2124_v20 = vadd.f32 %v3979_v18, %v4829_v23  ;;  %v1478_v21 = vpop.f32.mrb[35].mxu0  ;;  %v2118_v22 = vpop.f32.mrb[35].mxu1 }
 0x162   : > { %2876 = vst.msk [vmem:[%s4851_s10 + $0x100] sm:$0xff] %vm2843_vm2, %v2619_v15  ;;  %3004 = vst.msk [vmem:[%s4851_s10 + $0x500] sm:$0xff] %vm2843_vm2, %v2747_v16  ;;  %v1479_v24 = vadd.f32 %v4829_v23, %v1478_v21  ;;  %v2119_v25 = vadd.f32 %v4829_v23, %v2118_v22 }
 0x163   : > { %v2622_v26 = vmax.f32 %v1484_v19, 0.0  ;;  %v2750_v27 = vmax.f32 %v2124_v20, 0.0 }
 0x164   : > { %v2621_v28 = vmax.f32 %v1479_v24, 0.0  ;;  %v2749_v29 = vmax.f32 %v2119_v25, 0.0  ;;  %v3790_v30 = vpop.f32.mrb[36].mxu0  ;;  %v3982_v31 = vpop.f32.mrb[36].mxu1 }
 0x165   : > { %2879 = vst.msk [vmem:[%s4851_s10 + $0x118] sm:$0xff] %vm2843_vm2, %v2622_v26  ;;  %3007 = vst.msk [vmem:[%s4851_s10 + $0x518] sm:$0xff] %vm2843_vm2, %v2750_v27  ;;  %v1494_v32 = vadd.f32 %v3790_v30, %v4829_v23  ;;  %v2134_v33 = vadd.f32 %v3982_v31, %v4829_v23  ;;  %v1488_v34 = vpop.f32.mrb[37].mxu0  ;;  %v2128_v35 = vpop.f32.mrb[37].mxu1 }
 0x166   : > { %2878 = vst.msk [vmem:[%s4851_s10 + $0x110] sm:$0xff] %vm2843_vm2, %v2621_v28  ;;  %3006 = vst.msk [vmem:[%s4851_s10 + $0x510] sm:$0xff] %vm2843_vm2, %v2749_v29  ;;  %v1489_v36 = vadd.f32 %v4829_v23, %v1488_v34  ;;  %v2129_v37 = vadd.f32 %v4829_v23, %v2128_v35 }
 0x167   : > { %v2624_v38 = vmax.f32 %v1494_v32, 0.0  ;;  %v2752_v39 = vmax.f32 %v2134_v33, 0.0 }
 0x168   : > { %v2623_v40 = vmax.f32 %v1489_v36, 0.0  ;;  %v2751_v41 = vmax.f32 %v2129_v37, 0.0  ;;  %v3793_v42 = vpop.f32.mrb[38].mxu0  ;;  %v3985_v43 = vpop.f32.mrb[38].mxu1 }
 0x169   : > { %2881 = vst.msk [vmem:[%s4851_s10 + $0x128] sm:$0xff] %vm2843_vm2, %v2624_v38  ;;  %3009 = vst.msk [vmem:[%s4851_s10 + $0x528] sm:$0xff] %vm2843_vm2, %v2752_v39  ;;  %v1504_v44 = vadd.f32 %v3793_v42, %v4829_v23  ;;  %v2144_v45 = vadd.f32 %v3985_v43, %v4829_v23  ;;  %v1498_v46 = vpop.f32.mrb[39].mxu0  ;;  %v2138_v47 = vpop.f32.mrb[39].mxu1 }
 0x16a   : > { %2880 = vst.msk [vmem:[%s4851_s10 + $0x120] sm:$0xff] %vm2843_vm2, %v2623_v40  ;;  %3008 = vst.msk [vmem:[%s4851_s10 + $0x520] sm:$0xff] %vm2843_vm2, %v2751_v41  ;;  %v1499_v48 = vadd.f32 %v4829_v23, %v1498_v46  ;;  %v2139_v49 = vadd.f32 %v4829_v23, %v2138_v47 }
 0x16b   : > { %v2626_v50 = vmax.f32 %v1504_v44, 0.0  ;;  %v2754_v51 = vmax.f32 %v2144_v45, 0.0 }
 0x16c   : > { %v2625_v52 = vmax.f32 %v1499_v48, 0.0  ;;  %v2753_v53 = vmax.f32 %v2139_v49, 0.0  ;;  %v3796_v54 = vpop.f32.mrb[40].mxu0  ;;  %v3988_v55 = vpop.f32.mrb[40].mxu1 }
 0x16d   : > { %2883 = vst.msk [vmem:[%s4851_s10 + $0x138] sm:$0xff] %vm2843_vm2, %v2626_v50  ;;  %3011 = vst.msk [vmem:[%s4851_s10 + $0x538] sm:$0xff] %vm2843_vm2, %v2754_v51  ;;  %v1514_v56 = vadd.f32 %v3796_v54, %v4829_v23  ;;  %v2154_v57 = vadd.f32 %v3988_v55, %v4829_v23  ;;  %v1508_v58 = vpop.f32.mrb[41].mxu0  ;;  %v2148_v59 = vpop.f32.mrb[41].mxu1 }
 0x16e   : > { %2882 = vst.msk [vmem:[%s4851_s10 + $0x130] sm:$0xff] %vm2843_vm2, %v2625_v52  ;;  %3010 = vst.msk [vmem:[%s4851_s10 + $0x530] sm:$0xff] %vm2843_vm2, %v2753_v53  ;;  %v1509_v60 = vadd.f32 %v4829_v23, %v1508_v58  ;;  %v2149_v61 = vadd.f32 %v4829_v23, %v2148_v59 }
 0x16f   : > { %v2628_v62 = vmax.f32 %v1514_v56, 0.0  ;;  %v2756_v63 = vmax.f32 %v2154_v57, 0.0 }
 0x170   : > { %v2627_v0 = vmax.f32 %v1509_v60, 0.0  ;;  %v2755_v1 = vmax.f32 %v2149_v61, 0.0  ;;  %v3799_v2 = vpop.f32.mrb[42].mxu0  ;;  %v3991_v3 = vpop.f32.mrb[42].mxu1 }
 0x171   : > { %2885 = vst.msk [vmem:[%s4851_s10 + $0x148] sm:$0xff] %vm2843_vm2, %v2628_v62  ;;  %3013 = vst.msk [vmem:[%s4851_s10 + $0x548] sm:$0xff] %vm2843_vm2, %v2756_v63  ;;  %v1524_v4 = vadd.f32 %v3799_v2, %v4829_v23  ;;  %v2164_v5 = vadd.f32 %v3991_v3, %v4829_v23  ;;  %v1518_v6 = vpop.f32.mrb[43].mxu0  ;;  %v2158_v7 = vpop.f32.mrb[43].mxu1 }
 0x172   : > { %2884 = vst.msk [vmem:[%s4851_s10 + $0x140] sm:$0xff] %vm2843_vm2, %v2627_v0  ;;  %3012 = vst.msk [vmem:[%s4851_s10 + $0x540] sm:$0xff] %vm2843_vm2, %v2755_v1  ;;  %v1519_v8 = vadd.f32 %v4829_v23, %v1518_v6  ;;  %v2159_v9 = vadd.f32 %v4829_v23, %v2158_v7  ;;  %v5239_v6 = vld [vmem:[%s5763_s2] ss:$0 sm:$0xff] }
 0x173   : > { %v2630_v10 = vmax.f32 %v1524_v4, 0.0  ;;  %v2758_v11 = vmax.f32 %v2164_v5, 0.0 }
 0x174   : > { %v2629_v12 = vmax.f32 %v1519_v8, 0.0  ;;  %v2757_v13 = vmax.f32 %v2159_v9, 0.0  ;;  %v3802_v14 = vpop.f32.mrb[44].mxu0  ;;  %v3994_v15 = vpop.f32.mrb[44].mxu1 }
 0x175   : > { %2887 = vst.msk [vmem:[%s4851_s10 + $0x158] sm:$0xff] %vm2843_vm2, %v2630_v10  ;;  %3015 = vst.msk [vmem:[%s4851_s10 + $0x558] sm:$0xff] %vm2843_vm2, %v2758_v11  ;;  %v1534_v16 = vadd.f32 %v3802_v14, %v4829_v23  ;;  %v2174_v17 = vadd.f32 %v3994_v15, %v4829_v23  ;;  %v1528_v18 = vpop.f32.mrb[45].mxu0  ;;  %v2168_v19 = vpop.f32.mrb[45].mxu1 }
 0x176   : > { %2886 = vst.msk [vmem:[%s4851_s10 + $0x150] sm:$0xff] %vm2843_vm2, %v2629_v12  ;;  %3014 = vst.msk [vmem:[%s4851_s10 + $0x550] sm:$0xff] %vm2843_vm2, %v2757_v13  ;;  %v1529_v20 = vadd.f32 %v4829_v23, %v1528_v18  ;;  %v2169_v21 = vadd.f32 %v4829_v23, %v2168_v19 }
 0x177   : > { %v2632_v22 = vmax.f32 %v1534_v16, 0.0  ;;  %v2760_v24 = vmax.f32 %v2174_v17, 0.0 }
 0x178   : > { %v2631_v25 = vmax.f32 %v1529_v20, 0.0  ;;  %v2759_v26 = vmax.f32 %v2169_v21, 0.0  ;;  %v3805_v27 = vpop.f32.mrb[46].mxu0  ;;  %v3997_v28 = vpop.f32.mrb[46].mxu1 }
 0x179   : > { %2889 = vst.msk [vmem:[%s4851_s10 + $0x168] sm:$0xff] %vm2843_vm2, %v2632_v22  ;;  %3017 = vst.msk [vmem:[%s4851_s10 + $0x568] sm:$0xff] %vm2843_vm2, %v2760_v24  ;;  %v1544_v29 = vadd.f32 %v3805_v27, %v4829_v23  ;;  %v2184_v30 = vadd.f32 %v3997_v28, %v4829_v23  ;;  %v1538_v31 = vpop.f32.mrb[47].mxu0  ;;  %v2178_v32 = vpop.f32.mrb[47].mxu1 }
 0x17a   : > { %2888 = vst.msk [vmem:[%s4851_s10 + $0x160] sm:$0xff] %vm2843_vm2, %v2631_v25  ;;  %3016 = vst.msk [vmem:[%s4851_s10 + $0x560] sm:$0xff] %vm2843_vm2, %v2759_v26  ;;  %v1539_v33 = vadd.f32 %v4829_v23, %v1538_v31  ;;  %v2179_v34 = vadd.f32 %v4829_v23, %v2178_v32 }
 0x17b   : > { %v2634_v35 = vmax.f32 %v1544_v29, 0.0  ;;  %v2762_v36 = vmax.f32 %v2184_v30, 0.0 }
 0x17c   : > { %v2633_v37 = vmax.f32 %v1539_v33, 0.0  ;;  %v2761_v38 = vmax.f32 %v2179_v34, 0.0  ;;  %v3808_v39 = vpop.f32.mrb[48].mxu0  ;;  %v4000_v40 = vpop.f32.mrb[48].mxu1 }
 0x17d   : > { %2891 = vst.msk [vmem:[%s4851_s10 + $0x178] sm:$0xff] %vm2843_vm2, %v2634_v35  ;;  %3019 = vst.msk [vmem:[%s4851_s10 + $0x578] sm:$0xff] %vm2843_vm2, %v2762_v36  ;;  %v1554_v41 = vadd.f32 %v3808_v39, %v4829_v23  ;;  %v2194_v42 = vadd.f32 %v4000_v40, %v4829_v23  ;;  %v1548_v43 = vpop.f32.mrb[49].mxu0  ;;  %v2188_v44 = vpop.f32.mrb[49].mxu1 }
 0x17e   : > { %2890 = vst.msk [vmem:[%s4851_s10 + $0x170] sm:$0xff] %vm2843_vm2, %v2633_v37  ;;  %3018 = vst.msk [vmem:[%s4851_s10 + $0x570] sm:$0xff] %vm2843_vm2, %v2761_v38  ;;  %v1549_v45 = vadd.f32 %v4829_v23, %v1548_v43  ;;  %v2189_v46 = vadd.f32 %v4829_v23, %v2188_v44 }
 0x17f   : > { %v2636_v47 = vmax.f32 %v1554_v41, 0.0  ;;  %v2764_v48 = vmax.f32 %v2194_v42, 0.0 }
 0x180   : > { %v2635_v49 = vmax.f32 %v1549_v45, 0.0  ;;  %v2763_v50 = vmax.f32 %v2189_v46, 0.0  ;;  %v3811_v51 = vpop.f32.mrb[50].mxu0  ;;  %v4003_v52 = vpop.f32.mrb[50].mxu1 }
 0x181   : > { %2893 = vst.msk [vmem:[%s4851_s10 + $0x188] sm:$0xff] %vm2843_vm2, %v2636_v47  ;;  %3021 = vst.msk [vmem:[%s4851_s10 + $0x588] sm:$0xff] %vm2843_vm2, %v2764_v48  ;;  %v1564_v53 = vadd.f32 %v3811_v51, %v4829_v23  ;;  %v2204_v54 = vadd.f32 %v4003_v52, %v4829_v23  ;;  %v1558_v55 = vpop.f32.mrb[51].mxu0  ;;  %v2198_v56 = vpop.f32.mrb[51].mxu1 }
 0x182   : > { %2892 = vst.msk [vmem:[%s4851_s10 + $0x180] sm:$0xff] %vm2843_vm2, %v2635_v49  ;;  %3020 = vst.msk [vmem:[%s4851_s10 + $0x580] sm:$0xff] %vm2843_vm2, %v2763_v50  ;;  %v1559_v57 = vadd.f32 %v4829_v23, %v1558_v55  ;;  %v2199_v58 = vadd.f32 %v4829_v23, %v2198_v56 }
 0x183   : > { %v2638_v59 = vmax.f32 %v1564_v53, 0.0  ;;  %v2766_v60 = vmax.f32 %v2204_v54, 0.0 }
 0x184   : > { %v2637_v61 = vmax.f32 %v1559_v57, 0.0  ;;  %v2765_v62 = vmax.f32 %v2199_v58, 0.0  ;;  %v3814_v63 = vpop.f32.mrb[52].mxu0  ;;  %v4006_v0 = vpop.f32.mrb[52].mxu1 }
 0x185   : > { %2895 = vst.msk [vmem:[%s4851_s10 + $0x198] sm:$0xff] %vm2843_vm2, %v2638_v59  ;;  %3023 = vst.msk [vmem:[%s4851_s10 + $0x598] sm:$0xff] %vm2843_vm2, %v2766_v60  ;;  %v1574_v1 = vadd.f32 %v3814_v63, %v4829_v23  ;;  %v2214_v2 = vadd.f32 %v4006_v0, %v4829_v23  ;;  %v1568_v3 = vpop.f32.mrb[53].mxu0  ;;  %v2208_v4 = vpop.f32.mrb[53].mxu1 }
 0x186   : > { %2894 = vst.msk [vmem:[%s4851_s10 + $0x190] sm:$0xff] %vm2843_vm2, %v2637_v61  ;;  %3022 = vst.msk [vmem:[%s4851_s10 + $0x590] sm:$0xff] %vm2843_vm2, %v2765_v62  ;;  %v1569_v5 = vadd.f32 %v4829_v23, %v1568_v3  ;;  %v2209_v7 = vadd.f32 %v5239_v6, %v2208_v4 }
 0x187   : > { %v2640_v8 = vmax.f32 %v1574_v1, 0.0  ;;  %v2768_v9 = vmax.f32 %v2214_v2, 0.0 }
 0x188   : > { %v2639_v10 = vmax.f32 %v1569_v5, 0.0  ;;  %v2767_v11 = vmax.f32 %v2209_v7, 0.0  ;;  %v3817_v12 = vpop.f32.mrb[54].mxu0  ;;  %v4009_v13 = vpop.f32.mrb[54].mxu1 }
 0x189   : > { %2897 = vst.msk [vmem:[%s4851_s10 + $0x1a8] sm:$0xff] %vm2843_vm2, %v2640_v8  ;;  %3025 = vst.msk [vmem:[%s4851_s10 + $0x5a8] sm:$0xff] %vm2843_vm2, %v2768_v9  ;;  %v1584_v23 = vadd.f32 %v5239_v6, %v3817_v12  ;;  %v2224_v14 = vadd.f32 %v5239_v6, %v4009_v13  ;;  %v1578_v15 = vpop.f32.mrb[55].mxu0  ;;  %v2218_v16 = vpop.f32.mrb[55].mxu1 }
 0x18a   : > { %2896 = vst.msk [vmem:[%s4851_s10 + $0x1a0] sm:$0xff] %vm2843_vm2, %v2639_v10  ;;  %3024 = vst.msk [vmem:[%s4851_s10 + $0x5a0] sm:$0xff] %vm2843_vm2, %v2767_v11  ;;  %v1579_v17 = vadd.f32 %v5239_v6, %v1578_v15  ;;  %v2219_v18 = vadd.f32 %v5239_v6, %v2218_v16 }
 0x18b   : > { %v2642_v19 = vmax.f32 %v1584_v23, 0.0  ;;  %v2770_v20 = vmax.f32 %v2224_v14, 0.0 }
 0x18c   : > { %v2641_v21 = vmax.f32 %v1579_v17, 0.0  ;;  %v2769_v22 = vmax.f32 %v2219_v18, 0.0  ;;  %v3820_v24 = vpop.f32.mrb[56].mxu0  ;;  %v4012_v25 = vpop.f32.mrb[56].mxu1 }
 0x18d   : > { %2899 = vst.msk [vmem:[%s4851_s10 + $0x1b8] sm:$0xff] %vm2843_vm2, %v2642_v19  ;;  %3027 = vst.msk [vmem:[%s4851_s10 + $0x5b8] sm:$0xff] %vm2843_vm2, %v2770_v20  ;;  %v1594_v26 = vadd.f32 %v5239_v6, %v3820_v24  ;;  %v2234_v27 = vadd.f32 %v5239_v6, %v4012_v25  ;;  %v1588_v28 = vpop.f32.mrb[57].mxu0  ;;  %v2228_v29 = vpop.f32.mrb[57].mxu1 }
 0x18e   : > { %2898 = vst.msk [vmem:[%s4851_s10 + $0x1b0] sm:$0xff] %vm2843_vm2, %v2641_v21  ;;  %3026 = vst.msk [vmem:[%s4851_s10 + $0x5b0] sm:$0xff] %vm2843_vm2, %v2769_v22  ;;  %v1589_v30 = vadd.f32 %v5239_v6, %v1588_v28  ;;  %v2229_v31 = vadd.f32 %v5239_v6, %v2228_v29 }
 0x18f   : > { %v2644_v32 = vmax.f32 %v1594_v26, 0.0  ;;  %v2772_v33 = vmax.f32 %v2234_v27, 0.0 }
 0x190   : > { %v2643_v34 = vmax.f32 %v1589_v30, 0.0  ;;  %v2771_v35 = vmax.f32 %v2229_v31, 0.0  ;;  %v3823_v36 = vpop.f32.mrb[58].mxu0  ;;  %v4015_v37 = vpop.f32.mrb[58].mxu1 }
 0x191   : > { %2901 = vst.msk [vmem:[%s4851_s10 + $0x1c8] sm:$0xff] %vm2843_vm2, %v2644_v32  ;;  %3029 = vst.msk [vmem:[%s4851_s10 + $0x5c8] sm:$0xff] %vm2843_vm2, %v2772_v33  ;;  %v1604_v38 = vadd.f32 %v5239_v6, %v3823_v36  ;;  %v2244_v39 = vadd.f32 %v5239_v6, %v4015_v37  ;;  %v1598_v40 = vpop.f32.mrb[59].mxu0  ;;  %v2238_v41 = vpop.f32.mrb[59].mxu1 }
 0x192   : > { %2900 = vst.msk [vmem:[%s4851_s10 + $0x1c0] sm:$0xff] %vm2843_vm2, %v2643_v34  ;;  %3028 = vst.msk [vmem:[%s4851_s10 + $0x5c0] sm:$0xff] %vm2843_vm2, %v2771_v35  ;;  %v1599_v42 = vadd.f32 %v5239_v6, %v1598_v40  ;;  %v2239_v43 = vadd.f32 %v5239_v6, %v2238_v41 }
 0x193   : > { %v2646_v44 = vmax.f32 %v1604_v38, 0.0  ;;  %v2774_v45 = vmax.f32 %v2244_v39, 0.0 }
 0x194   : > { %v2645_v46 = vmax.f32 %v1599_v42, 0.0  ;;  %v2773_v47 = vmax.f32 %v2239_v43, 0.0  ;;  %v3826_v48 = vpop.f32.mrb[60].mxu0  ;;  %v4018_v49 = vpop.f32.mrb[60].mxu1 }
 0x195   : > { %2903 = vst.msk [vmem:[%s4851_s10 + $0x1d8] sm:$0xff] %vm2843_vm2, %v2646_v44  ;;  %3031 = vst.msk [vmem:[%s4851_s10 + $0x5d8] sm:$0xff] %vm2843_vm2, %v2774_v45  ;;  %v1614_v50 = vadd.f32 %v5239_v6, %v3826_v48  ;;  %v2254_v51 = vadd.f32 %v5239_v6, %v4018_v49  ;;  %v1608_v52 = vpop.f32.mrb[61].mxu0  ;;  %v2248_v53 = vpop.f32.mrb[61].mxu1 }
 0x196   : > { %2902 = vst.msk [vmem:[%s4851_s10 + $0x1d0] sm:$0xff] %vm2843_vm2, %v2645_v46  ;;  %3030 = vst.msk [vmem:[%s4851_s10 + $0x5d0] sm:$0xff] %vm2843_vm2, %v2773_v47  ;;  %v1609_v54 = vadd.f32 %v5239_v6, %v1608_v52  ;;  %v2249_v55 = vadd.f32 %v5239_v6, %v2248_v53 }
 0x197   : > { %v2648_v56 = vmax.f32 %v1614_v50, 0.0  ;;  %v2776_v57 = vmax.f32 %v2254_v51, 0.0 }
 0x198   : > { %v2647_v58 = vmax.f32 %v1609_v54, 0.0  ;;  %v2775_v59 = vmax.f32 %v2249_v55, 0.0  ;;  %v3829_v60 = vpop.f32.mrb[62].mxu0  ;;  %v4021_v61 = vpop.f32.mrb[62].mxu1 }
 0x199   : > { %2905 = vst.msk [vmem:[%s4851_s10 + $0x1e8] sm:$0xff] %vm2843_vm2, %v2648_v56  ;;  %3033 = vst.msk [vmem:[%s4851_s10 + $0x5e8] sm:$0xff] %vm2843_vm2, %v2776_v57  ;;  %v1624_v62 = vadd.f32 %v5239_v6, %v3829_v60  ;;  %v2264_v63 = vadd.f32 %v5239_v6, %v4021_v61  ;;  %v1618_v0 = vpop.f32.mrb[63].mxu0  ;;  %v2258_v1 = vpop.f32.mrb[63].mxu1 }
 0x19a   : > { %2904 = vst.msk [vmem:[%s4851_s10 + $0x1e0] sm:$0xff] %vm2843_vm2, %v2647_v58  ;;  %3032 = vst.msk [vmem:[%s4851_s10 + $0x5e0] sm:$0xff] %vm2843_vm2, %v2775_v59  ;;  %v1619_v2 = vadd.f32 %v5239_v6, %v1618_v0  ;;  %v2259_v3 = vadd.f32 %v5239_v6, %v2258_v1 }
 0x19b   : > { %v2650_v4 = vmax.f32 %v1624_v62, 0.0  ;;  %v2778_v5 = vmax.f32 %v2264_v63, 0.0 }
 0x19c   : > { %v2649_v7 = vmax.f32 %v1619_v2, 0.0  ;;  %v2777_v8 = vmax.f32 %v2259_v3, 0.0  ;;  %v3832_v9 = vpop.f32.mrb[64].mxu0  ;;  %v4024_v10 = vpop.f32.mrb[64].mxu1 }
 0x19d   : > { %2907 = vst.msk [vmem:[%s4851_s10 + $0x1f8] sm:$0xff] %vm2843_vm2, %v2650_v4  ;;  %3035 = vst.msk [vmem:[%s4851_s10 + $0x5f8] sm:$0xff] %vm2843_vm2, %v2778_v5  ;;  %v1634_v11 = vadd.f32 %v5239_v6, %v3832_v9  ;;  %v2274_v12 = vadd.f32 %v5239_v6, %v4024_v10  ;;  %v1628_v13 = vpop.f32.mrb[65].mxu0  ;;  %v2268_v23 = vpop.f32.mrb[65].mxu1 }
 0x19e   : > { %2906 = vst.msk [vmem:[%s4851_s10 + $0x1f0] sm:$0xff] %vm2843_vm2, %v2649_v7  ;;  %3034 = vst.msk [vmem:[%s4851_s10 + $0x5f0] sm:$0xff] %vm2843_vm2, %v2777_v8  ;;  %v1629_v14 = vadd.f32 %v5239_v6, %v1628_v13  ;;  %v2269_v15 = vadd.f32 %v5239_v6, %v2268_v23 }
 0x19f   : > { %v2652_v16 = vmax.f32 %v1634_v11, 0.0  ;;  %v2780_v17 = vmax.f32 %v2274_v12, 0.0 }
 0x1a0   : > { %v2651_v18 = vmax.f32 %v1629_v14, 0.0  ;;  %v2779_v19 = vmax.f32 %v2269_v15, 0.0  ;;  %v3835_v20 = vpop.f32.mrb[66].mxu0  ;;  %v4027_v21 = vpop.f32.mrb[66].mxu1 }
 0x1a1   : > { %2909 = vst.msk [vmem:[%s4851_s10 + $0x208] sm:$0xff] %vm2843_vm2, %v2652_v16  ;;  %3037 = vst.msk [vmem:[%s4851_s10 + $0x608] sm:$0xff] %vm2843_vm2, %v2780_v17  ;;  %v1644_v22 = vadd.f32 %v5239_v6, %v3835_v20  ;;  %v2284_v24 = vadd.f32 %v5239_v6, %v4027_v21  ;;  %v1638_v25 = vpop.f32.mrb[67].mxu0  ;;  %v2278_v26 = vpop.f32.mrb[67].mxu1 }
 0x1a2   : > { %2908 = vst.msk [vmem:[%s4851_s10 + $0x200] sm:$0xff] %vm2843_vm2, %v2651_v18  ;;  %3036 = vst.msk [vmem:[%s4851_s10 + $0x600] sm:$0xff] %vm2843_vm2, %v2779_v19  ;;  %v1639_v27 = vadd.f32 %v5239_v6, %v1638_v25  ;;  %v2279_v28 = vadd.f32 %v5239_v6, %v2278_v26 }
 0x1a3   : > { %v2654_v29 = vmax.f32 %v1644_v22, 0.0  ;;  %v2782_v30 = vmax.f32 %v2284_v24, 0.0 }
 0x1a4   : > { %v2653_v31 = vmax.f32 %v1639_v27, 0.0  ;;  %v2781_v32 = vmax.f32 %v2279_v28, 0.0  ;;  %v3838_v33 = vpop.f32.mrb[68].mxu0  ;;  %v4030_v34 = vpop.f32.mrb[68].mxu1 }
 0x1a5   : > { %2911 = vst.msk [vmem:[%s4851_s10 + $0x218] sm:$0xff] %vm2843_vm2, %v2654_v29  ;;  %3039 = vst.msk [vmem:[%s4851_s10 + $0x618] sm:$0xff] %vm2843_vm2, %v2782_v30  ;;  %v1654_v35 = vadd.f32 %v5239_v6, %v3838_v33  ;;  %v2294_v36 = vadd.f32 %v5239_v6, %v4030_v34  ;;  %v1648_v37 = vpop.f32.mrb[69].mxu0  ;;  %v2288_v38 = vpop.f32.mrb[69].mxu1 }
 0x1a6   : > { %2910 = vst.msk [vmem:[%s4851_s10 + $0x210] sm:$0xff] %vm2843_vm2, %v2653_v31  ;;  %3038 = vst.msk [vmem:[%s4851_s10 + $0x610] sm:$0xff] %vm2843_vm2, %v2781_v32  ;;  %v1649_v39 = vadd.f32 %v5239_v6, %v1648_v37  ;;  %v2289_v40 = vadd.f32 %v5239_v6, %v2288_v38 }
 0x1a7   : > { %v2656_v41 = vmax.f32 %v1654_v35, 0.0  ;;  %v2784_v42 = vmax.f32 %v2294_v36, 0.0 }
 0x1a8   : > { %v2655_v43 = vmax.f32 %v1649_v39, 0.0  ;;  %v2783_v44 = vmax.f32 %v2289_v40, 0.0  ;;  %v3841_v45 = vpop.f32.mrb[70].mxu0  ;;  %v4033_v46 = vpop.f32.mrb[70].mxu1 }
 0x1a9   : > { %2913 = vst.msk [vmem:[%s4851_s10 + $0x228] sm:$0xff] %vm2843_vm2, %v2656_v41  ;;  %3041 = vst.msk [vmem:[%s4851_s10 + $0x628] sm:$0xff] %vm2843_vm2, %v2784_v42  ;;  %v1664_v47 = vadd.f32 %v5239_v6, %v3841_v45  ;;  %v2304_v48 = vadd.f32 %v5239_v6, %v4033_v46  ;;  %v1658_v49 = vpop.f32.mrb[71].mxu0  ;;  %v2298_v50 = vpop.f32.mrb[71].mxu1 }
 0x1aa   : > { %2912 = vst.msk [vmem:[%s4851_s10 + $0x220] sm:$0xff] %vm2843_vm2, %v2655_v43  ;;  %3040 = vst.msk [vmem:[%s4851_s10 + $0x620] sm:$0xff] %vm2843_vm2, %v2783_v44  ;;  %v1659_v51 = vadd.f32 %v5239_v6, %v1658_v49  ;;  %v2299_v52 = vadd.f32 %v5239_v6, %v2298_v50 }
 0x1ab   : > { %v2658_v53 = vmax.f32 %v1664_v47, 0.0  ;;  %v2786_v54 = vmax.f32 %v2304_v48, 0.0 }
 0x1ac   : > { %v2657_v55 = vmax.f32 %v1659_v51, 0.0  ;;  %v2785_v56 = vmax.f32 %v2299_v52, 0.0  ;;  %v3844_v57 = vpop.f32.mrb[72].mxu0  ;;  %v4036_v58 = vpop.f32.mrb[72].mxu1 }
 0x1ad   : > { %2915 = vst.msk [vmem:[%s4851_s10 + $0x238] sm:$0xff] %vm2843_vm2, %v2658_v53  ;;  %3043 = vst.msk [vmem:[%s4851_s10 + $0x638] sm:$0xff] %vm2843_vm2, %v2786_v54  ;;  %v1674_v59 = vadd.f32 %v5239_v6, %v3844_v57  ;;  %v2314_v60 = vadd.f32 %v5239_v6, %v4036_v58  ;;  %v1668_v61 = vpop.f32.mrb[73].mxu0  ;;  %v2308_v62 = vpop.f32.mrb[73].mxu1 }
 0x1ae   : > { %2914 = vst.msk [vmem:[%s4851_s10 + $0x230] sm:$0xff] %vm2843_vm2, %v2657_v55  ;;  %3042 = vst.msk [vmem:[%s4851_s10 + $0x630] sm:$0xff] %vm2843_vm2, %v2785_v56  ;;  %v1669_v63 = vadd.f32 %v5239_v6, %v1668_v61  ;;  %v2309_v0 = vadd.f32 %v5239_v6, %v2308_v62 }
 0x1af   : > { %v2660_v1 = vmax.f32 %v1674_v59, 0.0  ;;  %v2788_v2 = vmax.f32 %v2314_v60, 0.0 }
 0x1b0   : > { %v2659_v3 = vmax.f32 %v1669_v63, 0.0  ;;  %v2787_v4 = vmax.f32 %v2309_v0, 0.0  ;;  %v3847_v5 = vpop.f32.mrb[74].mxu0  ;;  %v4039_v7 = vpop.f32.mrb[74].mxu1 }
 0x1b1   : > { %2917 = vst.msk [vmem:[%s4851_s10 + $0x248] sm:$0xff] %vm2843_vm2, %v2660_v1  ;;  %3045 = vst.msk [vmem:[%s4851_s10 + $0x648] sm:$0xff] %vm2843_vm2, %v2788_v2  ;;  %v1684_v8 = vadd.f32 %v5239_v6, %v3847_v5  ;;  %v2324_v9 = vadd.f32 %v5239_v6, %v4039_v7  ;;  %v1678_v10 = vpop.f32.mrb[75].mxu0  ;;  %v2318_v11 = vpop.f32.mrb[75].mxu1 }
 0x1b2   : > { %2916 = vst.msk [vmem:[%s4851_s10 + $0x240] sm:$0xff] %vm2843_vm2, %v2659_v3  ;;  %3044 = vst.msk [vmem:[%s4851_s10 + $0x640] sm:$0xff] %vm2843_vm2, %v2787_v4  ;;  %v1679_v12 = vadd.f32 %v5239_v6, %v1678_v10  ;;  %v2319_v13 = vadd.f32 %v5239_v6, %v2318_v11 }
 0x1b3   : > { %v2662_v23 = vmax.f32 %v1684_v8, 0.0  ;;  %v2790_v14 = vmax.f32 %v2324_v9, 0.0 }
 0x1b4   : > { %v2661_v15 = vmax.f32 %v1679_v12, 0.0  ;;  %v2789_v16 = vmax.f32 %v2319_v13, 0.0  ;;  %v3850_v17 = vpop.f32.mrb[76].mxu0  ;;  %v4042_v18 = vpop.f32.mrb[76].mxu1 }
 0x1b5   : > { %2919 = vst.msk [vmem:[%s4851_s10 + $0x258] sm:$0xff] %vm2843_vm2, %v2662_v23  ;;  %3047 = vst.msk [vmem:[%s4851_s10 + $0x658] sm:$0xff] %vm2843_vm2, %v2790_v14  ;;  %v1694_v19 = vadd.f32 %v5239_v6, %v3850_v17  ;;  %v2334_v20 = vadd.f32 %v5239_v6, %v4042_v18  ;;  %v1688_v21 = vpop.f32.mrb[77].mxu0  ;;  %v2328_v22 = vpop.f32.mrb[77].mxu1 }
 0x1b6   : > { %2918 = vst.msk [vmem:[%s4851_s10 + $0x250] sm:$0xff] %vm2843_vm2, %v2661_v15  ;;  %3046 = vst.msk [vmem:[%s4851_s10 + $0x650] sm:$0xff] %vm2843_vm2, %v2789_v16  ;;  %v1689_v24 = vadd.f32 %v5239_v6, %v1688_v21  ;;  %v2329_v25 = vadd.f32 %v5239_v6, %v2328_v22 }
 0x1b7   : > { %v2664_v26 = vmax.f32 %v1694_v19, 0.0  ;;  %v2792_v27 = vmax.f32 %v2334_v20, 0.0 }
 0x1b8   : > { %v2663_v28 = vmax.f32 %v1689_v24, 0.0  ;;  %v2791_v29 = vmax.f32 %v2329_v25, 0.0  ;;  %v3853_v30 = vpop.f32.mrb[78].mxu0  ;;  %v4045_v31 = vpop.f32.mrb[78].mxu1 }
 0x1b9   : > { %2921 = vst.msk [vmem:[%s4851_s10 + $0x268] sm:$0xff] %vm2843_vm2, %v2664_v26  ;;  %3049 = vst.msk [vmem:[%s4851_s10 + $0x668] sm:$0xff] %vm2843_vm2, %v2792_v27  ;;  %v1704_v32 = vadd.f32 %v5239_v6, %v3853_v30  ;;  %v2344_v33 = vadd.f32 %v5239_v6, %v4045_v31  ;;  %v1698_v34 = vpop.f32.mrb[79].mxu0  ;;  %v2338_v35 = vpop.f32.mrb[79].mxu1 }
 0x1ba   : > { %2920 = vst.msk [vmem:[%s4851_s10 + $0x260] sm:$0xff] %vm2843_vm2, %v2663_v28  ;;  %3048 = vst.msk [vmem:[%s4851_s10 + $0x660] sm:$0xff] %vm2843_vm2, %v2791_v29  ;;  %v1699_v36 = vadd.f32 %v5239_v6, %v1698_v34  ;;  %v2339_v37 = vadd.f32 %v5239_v6, %v2338_v35 }
 0x1bb   : > { %v2666_v38 = vmax.f32 %v1704_v32, 0.0  ;;  %v2794_v39 = vmax.f32 %v2344_v33, 0.0 }
 0x1bc   : > { %v2665_v40 = vmax.f32 %v1699_v36, 0.0  ;;  %v2793_v41 = vmax.f32 %v2339_v37, 0.0  ;;  %v3856_v42 = vpop.f32.mrb[80].mxu0  ;;  %v4048_v43 = vpop.f32.mrb[80].mxu1 }
 0x1bd   : > { %2923 = vst.msk [vmem:[%s4851_s10 + $0x278] sm:$0xff] %vm2843_vm2, %v2666_v38  ;;  %3051 = vst.msk [vmem:[%s4851_s10 + $0x678] sm:$0xff] %vm2843_vm2, %v2794_v39  ;;  %v1714_v44 = vadd.f32 %v5239_v6, %v3856_v42  ;;  %v2354_v45 = vadd.f32 %v5239_v6, %v4048_v43  ;;  %v1708_v46 = vpop.f32.mrb[81].mxu0  ;;  %v2348_v47 = vpop.f32.mrb[81].mxu1 }
 0x1be   : > { %2922 = vst.msk [vmem:[%s4851_s10 + $0x270] sm:$0xff] %vm2843_vm2, %v2665_v40  ;;  %3050 = vst.msk [vmem:[%s4851_s10 + $0x670] sm:$0xff] %vm2843_vm2, %v2793_v41  ;;  %v1709_v48 = vadd.f32 %v5239_v6, %v1708_v46  ;;  %v2349_v49 = vadd.f32 %v5239_v6, %v2348_v47 }
 0x1bf   : > { %v2668_v50 = vmax.f32 %v1714_v44, 0.0  ;;  %v2796_v51 = vmax.f32 %v2354_v45, 0.0 }
 0x1c0   : > { %v2667_v52 = vmax.f32 %v1709_v48, 0.0  ;;  %v2795_v53 = vmax.f32 %v2349_v49, 0.0  ;;  %v3859_v54 = vpop.f32.mrb[82].mxu0  ;;  %v4051_v55 = vpop.f32.mrb[82].mxu1 }
 0x1c1   : > { %2925 = vst.msk [vmem:[%s4851_s10 + $0x288] sm:$0xff] %vm2843_vm2, %v2668_v50  ;;  %3053 = vst.msk [vmem:[%s4851_s10 + $0x688] sm:$0xff] %vm2843_vm2, %v2796_v51  ;;  %v1724_v56 = vadd.f32 %v5239_v6, %v3859_v54  ;;  %v2364_v57 = vadd.f32 %v5239_v6, %v4051_v55  ;;  %v1718_v58 = vpop.f32.mrb[83].mxu0  ;;  %v2358_v59 = vpop.f32.mrb[83].mxu1 }
 0x1c2   : > { %2924 = vst.msk [vmem:[%s4851_s10 + $0x280] sm:$0xff] %vm2843_vm2, %v2667_v52  ;;  %3052 = vst.msk [vmem:[%s4851_s10 + $0x680] sm:$0xff] %vm2843_vm2, %v2795_v53  ;;  %v1719_v60 = vadd.f32 %v5239_v6, %v1718_v58  ;;  %v2359_v61 = vadd.f32 %v5239_v6, %v2358_v59 }
 0x1c3   : > { %v2670_v62 = vmax.f32 %v1724_v56, 0.0  ;;  %v2798_v63 = vmax.f32 %v2364_v57, 0.0 }
 0x1c4   : > { %v2669_v0 = vmax.f32 %v1719_v60, 0.0  ;;  %v2797_v1 = vmax.f32 %v2359_v61, 0.0  ;;  %v3862_v2 = vpop.f32.mrb[84].mxu0  ;;  %v4054_v3 = vpop.f32.mrb[84].mxu1 }
 0x1c5   : > { %2927 = vst.msk [vmem:[%s4851_s10 + $0x298] sm:$0xff] %vm2843_vm2, %v2670_v62  ;;  %3055 = vst.msk [vmem:[%s4851_s10 + $0x698] sm:$0xff] %vm2843_vm2, %v2798_v63  ;;  %v1734_v4 = vadd.f32 %v5239_v6, %v3862_v2  ;;  %v2374_v5 = vadd.f32 %v5239_v6, %v4054_v3  ;;  %v1728_v7 = vpop.f32.mrb[85].mxu0  ;;  %v2368_v8 = vpop.f32.mrb[85].mxu1 }
 0x1c6   : > { %2926 = vst.msk [vmem:[%s4851_s10 + $0x290] sm:$0xff] %vm2843_vm2, %v2669_v0  ;;  %3054 = vst.msk [vmem:[%s4851_s10 + $0x690] sm:$0xff] %vm2843_vm2, %v2797_v1  ;;  %v1729_v9 = vadd.f32 %v5239_v6, %v1728_v7  ;;  %v2369_v10 = vadd.f32 %v5239_v6, %v2368_v8 }
 0x1c7   : > { %v2672_v11 = vmax.f32 %v1734_v4, 0.0  ;;  %v2800_v12 = vmax.f32 %v2374_v5, 0.0 }
 0x1c8   : > { %v2671_v13 = vmax.f32 %v1729_v9, 0.0  ;;  %v2799_v23 = vmax.f32 %v2369_v10, 0.0  ;;  %v3865_v14 = vpop.f32.mrb[86].mxu0  ;;  %v4057_v15 = vpop.f32.mrb[86].mxu1 }
 0x1c9   : > { %2929 = vst.msk [vmem:[%s4851_s10 + $0x2a8] sm:$0xff] %vm2843_vm2, %v2672_v11  ;;  %3057 = vst.msk [vmem:[%s4851_s10 + $0x6a8] sm:$0xff] %vm2843_vm2, %v2800_v12  ;;  %v1744_v16 = vadd.f32 %v5239_v6, %v3865_v14  ;;  %v2384_v17 = vadd.f32 %v5239_v6, %v4057_v15  ;;  %v1738_v18 = vpop.f32.mrb[87].mxu0  ;;  %v2378_v19 = vpop.f32.mrb[87].mxu1 }
 0x1ca   : > { %2928 = vst.msk [vmem:[%s4851_s10 + $0x2a0] sm:$0xff] %vm2843_vm2, %v2671_v13  ;;  %3056 = vst.msk [vmem:[%s4851_s10 + $0x6a0] sm:$0xff] %vm2843_vm2, %v2799_v23  ;;  %v1739_v20 = vadd.f32 %v5239_v6, %v1738_v18  ;;  %v2379_v21 = vadd.f32 %v5239_v6, %v2378_v19 }
 0x1cb   : > { %v2674_v22 = vmax.f32 %v1744_v16, 0.0  ;;  %v2802_v24 = vmax.f32 %v2384_v17, 0.0 }
 0x1cc   : > { %v2673_v25 = vmax.f32 %v1739_v20, 0.0  ;;  %v2801_v26 = vmax.f32 %v2379_v21, 0.0  ;;  %v3868_v27 = vpop.f32.mrb[88].mxu0  ;;  %v4060_v28 = vpop.f32.mrb[88].mxu1 }
 0x1cd   : > { %2931 = vst.msk [vmem:[%s4851_s10 + $0x2b8] sm:$0xff] %vm2843_vm2, %v2674_v22  ;;  %3059 = vst.msk [vmem:[%s4851_s10 + $0x6b8] sm:$0xff] %vm2843_vm2, %v2802_v24  ;;  %v1754_v29 = vadd.f32 %v5239_v6, %v3868_v27  ;;  %v2394_v30 = vadd.f32 %v5239_v6, %v4060_v28  ;;  %v1748_v31 = vpop.f32.mrb[89].mxu0  ;;  %v2388_v32 = vpop.f32.mrb[89].mxu1 }
 0x1ce   : > { %2930 = vst.msk [vmem:[%s4851_s10 + $0x2b0] sm:$0xff] %vm2843_vm2, %v2673_v25  ;;  %3058 = vst.msk [vmem:[%s4851_s10 + $0x6b0] sm:$0xff] %vm2843_vm2, %v2801_v26  ;;  %v1749_v33 = vadd.f32 %v5239_v6, %v1748_v31  ;;  %v2389_v34 = vadd.f32 %v5239_v6, %v2388_v32 }
 0x1cf   : > { %v2676_v35 = vmax.f32 %v1754_v29, 0.0  ;;  %v2804_v36 = vmax.f32 %v2394_v30, 0.0 }
 0x1d0   : > { %v2675_v37 = vmax.f32 %v1749_v33, 0.0  ;;  %v2803_v38 = vmax.f32 %v2389_v34, 0.0  ;;  %v3871_v39 = vpop.f32.mrb[90].mxu0  ;;  %v4063_v40 = vpop.f32.mrb[90].mxu1 }
 0x1d1   : > { %2933 = vst.msk [vmem:[%s4851_s10 + $0x2c8] sm:$0xff] %vm2843_vm2, %v2676_v35  ;;  %3061 = vst.msk [vmem:[%s4851_s10 + $0x6c8] sm:$0xff] %vm2843_vm2, %v2804_v36  ;;  %v1764_v41 = vadd.f32 %v5239_v6, %v3871_v39  ;;  %v2404_v42 = vadd.f32 %v5239_v6, %v4063_v40  ;;  %v1758_v43 = vpop.f32.mrb[91].mxu0  ;;  %v2398_v44 = vpop.f32.mrb[91].mxu1 }
 0x1d2   : > { %2932 = vst.msk [vmem:[%s4851_s10 + $0x2c0] sm:$0xff] %vm2843_vm2, %v2675_v37  ;;  %3060 = vst.msk [vmem:[%s4851_s10 + $0x6c0] sm:$0xff] %vm2843_vm2, %v2803_v38  ;;  %v1759_v45 = vadd.f32 %v5239_v6, %v1758_v43  ;;  %v2399_v46 = vadd.f32 %v5239_v6, %v2398_v44 }
 0x1d3   : > { %v2678_v47 = vmax.f32 %v1764_v41, 0.0  ;;  %v2806_v48 = vmax.f32 %v2404_v42, 0.0 }
 0x1d4   : > { %v2677_v49 = vmax.f32 %v1759_v45, 0.0  ;;  %v2805_v50 = vmax.f32 %v2399_v46, 0.0  ;;  %v3874_v51 = vpop.f32.mrb[92].mxu0  ;;  %v4066_v52 = vpop.f32.mrb[92].mxu1 }
 0x1d5   : > { %2935 = vst.msk [vmem:[%s4851_s10 + $0x2d8] sm:$0xff] %vm2843_vm2, %v2678_v47  ;;  %3063 = vst.msk [vmem:[%s4851_s10 + $0x6d8] sm:$0xff] %vm2843_vm2, %v2806_v48  ;;  %v1774_v53 = vadd.f32 %v5239_v6, %v3874_v51  ;;  %v2414_v54 = vadd.f32 %v5239_v6, %v4066_v52  ;;  %v1768_v55 = vpop.f32.mrb[93].mxu0  ;;  %v2408_v56 = vpop.f32.mrb[93].mxu1 }
 0x1d6   : > { %2934 = vst.msk [vmem:[%s4851_s10 + $0x2d0] sm:$0xff] %vm2843_vm2, %v2677_v49  ;;  %3062 = vst.msk [vmem:[%s4851_s10 + $0x6d0] sm:$0xff] %vm2843_vm2, %v2805_v50  ;;  %v1769_v57 = vadd.f32 %v5239_v6, %v1768_v55  ;;  %v2409_v58 = vadd.f32 %v5239_v6, %v2408_v56 }
 0x1d7   : > { %v2680_v59 = vmax.f32 %v1774_v53, 0.0  ;;  %v2808_v60 = vmax.f32 %v2414_v54, 0.0 }
 0x1d8   : > { %v2679_v61 = vmax.f32 %v1769_v57, 0.0  ;;  %v2807_v62 = vmax.f32 %v2409_v58, 0.0  ;;  %v3877_v63 = vpop.f32.mrb[94].mxu0  ;;  %v4069_v0 = vpop.f32.mrb[94].mxu1 }
 0x1d9   : > { %2937 = vst.msk [vmem:[%s4851_s10 + $0x2e8] sm:$0xff] %vm2843_vm2, %v2680_v59  ;;  %3065 = vst.msk [vmem:[%s4851_s10 + $0x6e8] sm:$0xff] %vm2843_vm2, %v2808_v60  ;;  %v1784_v1 = vadd.f32 %v5239_v6, %v3877_v63  ;;  %v2424_v2 = vadd.f32 %v5239_v6, %v4069_v0  ;;  %v1778_v3 = vpop.f32.mrb[95].mxu0  ;;  %v2418_v4 = vpop.f32.mrb[95].mxu1 }
 0x1da   : > { %2936 = vst.msk [vmem:[%s4851_s10 + $0x2e0] sm:$0xff] %vm2843_vm2, %v2679_v61  ;;  %3064 = vst.msk [vmem:[%s4851_s10 + $0x6e0] sm:$0xff] %vm2843_vm2, %v2807_v62  ;;  %v1779_v5 = vadd.f32 %v5239_v6, %v1778_v3  ;;  %v2419_v7 = vadd.f32 %v5239_v6, %v2418_v4 }
 0x1db   : > { %v2682_v8 = vmax.f32 %v1784_v1, 0.0  ;;  %v2810_v9 = vmax.f32 %v2424_v2, 0.0 }
 0x1dc   : > { %v2681_v10 = vmax.f32 %v1779_v5, 0.0  ;;  %v2809_v11 = vmax.f32 %v2419_v7, 0.0  ;;  %v3880_v12 = vpop.f32.mrb[96].mxu0  ;;  %v4072_v13 = vpop.f32.mrb[96].mxu1 }
 0x1dd   : > { %2939 = vst.msk [vmem:[%s4851_s10 + $0x2f8] sm:$0xff] %vm2843_vm2, %v2682_v8  ;;  %3067 = vst.msk [vmem:[%s4851_s10 + $0x6f8] sm:$0xff] %vm2843_vm2, %v2810_v9  ;;  %v1794_v23 = vadd.f32 %v5239_v6, %v3880_v12  ;;  %v2434_v14 = vadd.f32 %v5239_v6, %v4072_v13  ;;  %v1788_v15 = vpop.f32.mrb[97].mxu0  ;;  %v2428_v16 = vpop.f32.mrb[97].mxu1 }
 0x1de   : > { %2938 = vst.msk [vmem:[%s4851_s10 + $0x2f0] sm:$0xff] %vm2843_vm2, %v2681_v10  ;;  %3066 = vst.msk [vmem:[%s4851_s10 + $0x6f0] sm:$0xff] %vm2843_vm2, %v2809_v11  ;;  %v1789_v17 = vadd.f32 %v5239_v6, %v1788_v15  ;;  %v2429_v18 = vadd.f32 %v5239_v6, %v2428_v16 }
 0x1df   : > { %v2684_v19 = vmax.f32 %v1794_v23, 0.0  ;;  %v2812_v20 = vmax.f32 %v2434_v14, 0.0 }
 0x1e0   : > { %v2683_v21 = vmax.f32 %v1789_v17, 0.0  ;;  %v2811_v22 = vmax.f32 %v2429_v18, 0.0  ;;  %v3883_v24 = vpop.f32.mrb[98].mxu0  ;;  %v4075_v25 = vpop.f32.mrb[98].mxu1 }
 0x1e1   : > { %2941 = vst.msk [vmem:[%s4851_s10 + $0x308] sm:$0xff] %vm2843_vm2, %v2684_v19  ;;  %3069 = vst.msk [vmem:[%s4851_s10 + $0x708] sm:$0xff] %vm2843_vm2, %v2812_v20  ;;  %v1804_v26 = vadd.f32 %v5239_v6, %v3883_v24  ;;  %v2444_v27 = vadd.f32 %v5239_v6, %v4075_v25  ;;  %v1798_v28 = vpop.f32.mrb[99].mxu0  ;;  %v2438_v29 = vpop.f32.mrb[99].mxu1 }
 0x1e2   : > { %2940 = vst.msk [vmem:[%s4851_s10 + $0x300] sm:$0xff] %vm2843_vm2, %v2683_v21  ;;  %3068 = vst.msk [vmem:[%s4851_s10 + $0x700] sm:$0xff] %vm2843_vm2, %v2811_v22  ;;  %v1799_v30 = vadd.f32 %v5239_v6, %v1798_v28  ;;  %v2439_v31 = vadd.f32 %v5239_v6, %v2438_v29 }
 0x1e3   : > { %v2686_v32 = vmax.f32 %v1804_v26, 0.0  ;;  %v2814_v33 = vmax.f32 %v2444_v27, 0.0 }
 0x1e4   : > { %v2685_v34 = vmax.f32 %v1799_v30, 0.0  ;;  %v2813_v35 = vmax.f32 %v2439_v31, 0.0  ;;  %v3886_v36 = vpop.f32.mrb[100].mxu0  ;;  %v4078_v37 = vpop.f32.mrb[100].mxu1 }
 0x1e5   : > { %2943 = vst.msk [vmem:[%s4851_s10 + $0x318] sm:$0xff] %vm2843_vm2, %v2686_v32  ;;  %3071 = vst.msk [vmem:[%s4851_s10 + $0x718] sm:$0xff] %vm2843_vm2, %v2814_v33  ;;  %v1814_v38 = vadd.f32 %v5239_v6, %v3886_v36  ;;  %v2454_v39 = vadd.f32 %v5239_v6, %v4078_v37  ;;  %v1808_v40 = vpop.f32.mrb[101].mxu0  ;;  %v2448_v41 = vpop.f32.mrb[101].mxu1 }
 0x1e6   : > { %2942 = vst.msk [vmem:[%s4851_s10 + $0x310] sm:$0xff] %vm2843_vm2, %v2685_v34  ;;  %3070 = vst.msk [vmem:[%s4851_s10 + $0x710] sm:$0xff] %vm2843_vm2, %v2813_v35  ;;  %v1809_v42 = vadd.f32 %v5239_v6, %v1808_v40  ;;  %v2449_v43 = vadd.f32 %v5239_v6, %v2448_v41 }
 0x1e7   : > { %v2688_v44 = vmax.f32 %v1814_v38, 0.0  ;;  %v2816_v45 = vmax.f32 %v2454_v39, 0.0 }
 0x1e8   : > { %v2687_v46 = vmax.f32 %v1809_v42, 0.0  ;;  %v2815_v47 = vmax.f32 %v2449_v43, 0.0  ;;  %v3889_v48 = vpop.f32.mrb[102].mxu0  ;;  %v4081_v49 = vpop.f32.mrb[102].mxu1 }
 0x1e9   : > { %2945 = vst.msk [vmem:[%s4851_s10 + $0x328] sm:$0xff] %vm2843_vm2, %v2688_v44  ;;  %3073 = vst.msk [vmem:[%s4851_s10 + $0x728] sm:$0xff] %vm2843_vm2, %v2816_v45  ;;  %v1824_v50 = vadd.f32 %v5239_v6, %v3889_v48  ;;  %v2464_v51 = vadd.f32 %v5239_v6, %v4081_v49  ;;  %v1818_v52 = vpop.f32.mrb[103].mxu0  ;;  %v2458_v53 = vpop.f32.mrb[103].mxu1 }
 0x1ea   : > { %2944 = vst.msk [vmem:[%s4851_s10 + $0x320] sm:$0xff] %vm2843_vm2, %v2687_v46  ;;  %3072 = vst.msk [vmem:[%s4851_s10 + $0x720] sm:$0xff] %vm2843_vm2, %v2815_v47  ;;  %v1819_v54 = vadd.f32 %v5239_v6, %v1818_v52  ;;  %v2459_v55 = vadd.f32 %v5239_v6, %v2458_v53 }
 0x1eb   : > { %v2690_v56 = vmax.f32 %v1824_v50, 0.0  ;;  %v2818_v57 = vmax.f32 %v2464_v51, 0.0 }
 0x1ec   : > { %v2689_v58 = vmax.f32 %v1819_v54, 0.0  ;;  %v2817_v59 = vmax.f32 %v2459_v55, 0.0  ;;  %v3892_v60 = vpop.f32.mrb[104].mxu0  ;;  %v4084_v61 = vpop.f32.mrb[104].mxu1 }
 0x1ed   : > { %2947 = vst.msk [vmem:[%s4851_s10 + $0x338] sm:$0xff] %vm2843_vm2, %v2690_v56  ;;  %3075 = vst.msk [vmem:[%s4851_s10 + $0x738] sm:$0xff] %vm2843_vm2, %v2818_v57  ;;  %v1834_v62 = vadd.f32 %v5239_v6, %v3892_v60  ;;  %v2474_v63 = vadd.f32 %v5239_v6, %v4084_v61  ;;  %v1828_v0 = vpop.f32.mrb[105].mxu0  ;;  %v2468_v1 = vpop.f32.mrb[105].mxu1 }
 0x1ee   : > { %2946 = vst.msk [vmem:[%s4851_s10 + $0x330] sm:$0xff] %vm2843_vm2, %v2689_v58  ;;  %3074 = vst.msk [vmem:[%s4851_s10 + $0x730] sm:$0xff] %vm2843_vm2, %v2817_v59  ;;  %v1829_v2 = vadd.f32 %v5239_v6, %v1828_v0  ;;  %v2469_v3 = vadd.f32 %v5239_v6, %v2468_v1 }
 0x1ef   : > { %v2692_v4 = vmax.f32 %v1834_v62, 0.0  ;;  %v2820_v5 = vmax.f32 %v2474_v63, 0.0 }
 0x1f0   : > { %v2691_v7 = vmax.f32 %v1829_v2, 0.0  ;;  %v2819_v8 = vmax.f32 %v2469_v3, 0.0  ;;  %v3895_v9 = vpop.f32.mrb[106].mxu0  ;;  %v4087_v10 = vpop.f32.mrb[106].mxu1 }
 0x1f1   : > { %2949 = vst.msk [vmem:[%s4851_s10 + $0x348] sm:$0xff] %vm2843_vm2, %v2692_v4  ;;  %3077 = vst.msk [vmem:[%s4851_s10 + $0x748] sm:$0xff] %vm2843_vm2, %v2820_v5  ;;  %v1844_v11 = vadd.f32 %v5239_v6, %v3895_v9  ;;  %v2484_v12 = vadd.f32 %v5239_v6, %v4087_v10  ;;  %v1838_v13 = vpop.f32.mrb[107].mxu0  ;;  %v2478_v23 = vpop.f32.mrb[107].mxu1 }
 0x1f2   : > { %2948 = vst.msk [vmem:[%s4851_s10 + $0x340] sm:$0xff] %vm2843_vm2, %v2691_v7  ;;  %3076 = vst.msk [vmem:[%s4851_s10 + $0x740] sm:$0xff] %vm2843_vm2, %v2819_v8  ;;  %v1839_v14 = vadd.f32 %v5239_v6, %v1838_v13  ;;  %v2479_v15 = vadd.f32 %v5239_v6, %v2478_v23  ;;  %v5628_v13 = vld [vmem:[%s5763_s2] ss:$0 sm:$0xff] }
 0x1f3   : > { %v2694_v16 = vmax.f32 %v1844_v11, 0.0  ;;  %v2822_v17 = vmax.f32 %v2484_v12, 0.0 }
 0x1f4   : > { %v2693_v18 = vmax.f32 %v1839_v14, 0.0  ;;  %v2821_v19 = vmax.f32 %v2479_v15, 0.0  ;;  %v3898_v20 = vpop.f32.mrb[108].mxu0  ;;  %v4090_v21 = vpop.f32.mrb[108].mxu1 }
 0x1f5   : > { %2951 = vst.msk [vmem:[%s4851_s10 + $0x358] sm:$0xff] %vm2843_vm2, %v2694_v16  ;;  %3079 = vst.msk [vmem:[%s4851_s10 + $0x758] sm:$0xff] %vm2843_vm2, %v2822_v17  ;;  %v1854_v22 = vadd.f32 %v5239_v6, %v3898_v20  ;;  %v2494_v24 = vadd.f32 %v5239_v6, %v4090_v21  ;;  %v1848_v25 = vpop.f32.mrb[109].mxu0  ;;  %v2488_v26 = vpop.f32.mrb[109].mxu1 }
 0x1f6   : > { %2950 = vst.msk [vmem:[%s4851_s10 + $0x350] sm:$0xff] %vm2843_vm2, %v2693_v18  ;;  %3078 = vst.msk [vmem:[%s4851_s10 + $0x750] sm:$0xff] %vm2843_vm2, %v2821_v19  ;;  %v1849_v27 = vadd.f32 %v5239_v6, %v1848_v25  ;;  %v2489_v28 = vadd.f32 %v5239_v6, %v2488_v26 }
 0x1f7   : > { %v2696_v29 = vmax.f32 %v1854_v22, 0.0  ;;  %v2824_v30 = vmax.f32 %v2494_v24, 0.0 }
 0x1f8   : > { %v2695_v31 = vmax.f32 %v1849_v27, 0.0  ;;  %v2823_v32 = vmax.f32 %v2489_v28, 0.0  ;;  %v3901_v33 = vpop.f32.mrb[110].mxu0  ;;  %v4093_v34 = vpop.f32.mrb[110].mxu1 }
 0x1f9   : > { %2953 = vst.msk [vmem:[%s4851_s10 + $0x368] sm:$0xff] %vm2843_vm2, %v2696_v29  ;;  %3081 = vst.msk [vmem:[%s4851_s10 + $0x768] sm:$0xff] %vm2843_vm2, %v2824_v30  ;;  %v1864_v35 = vadd.f32 %v5239_v6, %v3901_v33  ;;  %v2504_v36 = vadd.f32 %v5239_v6, %v4093_v34  ;;  %v1858_v37 = vpop.f32.mrb[111].mxu0  ;;  %v2498_v38 = vpop.f32.mrb[111].mxu1 }
 0x1fa   : > { %2952 = vst.msk [vmem:[%s4851_s10 + $0x360] sm:$0xff] %vm2843_vm2, %v2695_v31  ;;  %3080 = vst.msk [vmem:[%s4851_s10 + $0x760] sm:$0xff] %vm2843_vm2, %v2823_v32  ;;  %v1859_v39 = vadd.f32 %v5239_v6, %v1858_v37  ;;  %v2499_v40 = vadd.f32 %v5239_v6, %v2498_v38 }
 0x1fb   : > { %v2698_v41 = vmax.f32 %v1864_v35, 0.0  ;;  %v2826_v42 = vmax.f32 %v2504_v36, 0.0 }
 0x1fc   : > { %v2697_v43 = vmax.f32 %v1859_v39, 0.0  ;;  %v2825_v44 = vmax.f32 %v2499_v40, 0.0  ;;  %v3904_v45 = vpop.f32.mrb[112].mxu0  ;;  %v4096_v46 = vpop.f32.mrb[112].mxu1 }
 0x1fd   : > { %2955 = vst.msk [vmem:[%s4851_s10 + $0x378] sm:$0xff] %vm2843_vm2, %v2698_v41  ;;  %3083 = vst.msk [vmem:[%s4851_s10 + $0x778] sm:$0xff] %vm2843_vm2, %v2826_v42  ;;  %v1874_v47 = vadd.f32 %v5239_v6, %v3904_v45  ;;  %v2514_v48 = vadd.f32 %v5239_v6, %v4096_v46  ;;  %v1868_v49 = vpop.f32.mrb[113].mxu0  ;;  %v2508_v50 = vpop.f32.mrb[113].mxu1 }
 0x1fe   : > { %2954 = vst.msk [vmem:[%s4851_s10 + $0x370] sm:$0xff] %vm2843_vm2, %v2697_v43  ;;  %3082 = vst.msk [vmem:[%s4851_s10 + $0x770] sm:$0xff] %vm2843_vm2, %v2825_v44  ;;  %v1869_v51 = vadd.f32 %v5239_v6, %v1868_v49  ;;  %v2509_v52 = vadd.f32 %v5239_v6, %v2508_v50 }
 0x1ff   : > { %v2700_v53 = vmax.f32 %v1874_v47, 0.0  ;;  %v2828_v54 = vmax.f32 %v2514_v48, 0.0 }
 0x200   : > { %v2699_v55 = vmax.f32 %v1869_v51, 0.0  ;;  %v2827_v56 = vmax.f32 %v2509_v52, 0.0  ;;  %v3907_v57 = vpop.f32.mrb[114].mxu0  ;;  %v4099_v58 = vpop.f32.mrb[114].mxu1 }
 0x201   : > { %2957 = vst.msk [vmem:[%s4851_s10 + $0x388] sm:$0xff] %vm2843_vm2, %v2700_v53  ;;  %3085 = vst.msk [vmem:[%s4851_s10 + $0x788] sm:$0xff] %vm2843_vm2, %v2828_v54  ;;  %v1884_v59 = vadd.f32 %v5239_v6, %v3907_v57  ;;  %v2524_v60 = vadd.f32 %v5239_v6, %v4099_v58  ;;  %v1878_v61 = vpop.f32.mrb[115].mxu0  ;;  %v2518_v62 = vpop.f32.mrb[115].mxu1 }
 0x202   : > { %2956 = vst.msk [vmem:[%s4851_s10 + $0x380] sm:$0xff] %vm2843_vm2, %v2699_v55  ;;  %3084 = vst.msk [vmem:[%s4851_s10 + $0x780] sm:$0xff] %vm2843_vm2, %v2827_v56  ;;  %v1879_v63 = vadd.f32 %v5239_v6, %v1878_v61  ;;  %v2519_v0 = vadd.f32 %v5239_v6, %v2518_v62 }
 0x203   : > { %v2702_v1 = vmax.f32 %v1884_v59, 0.0  ;;  %v2830_v2 = vmax.f32 %v2524_v60, 0.0 }
 0x204   : > { %v2701_v3 = vmax.f32 %v1879_v63, 0.0  ;;  %v2829_v4 = vmax.f32 %v2519_v0, 0.0  ;;  %v3910_v5 = vpop.f32.mrb[116].mxu0  ;;  %v4102_v7 = vpop.f32.mrb[116].mxu1 }
 0x205   : > { %2959 = vst.msk [vmem:[%s4851_s10 + $0x398] sm:$0xff] %vm2843_vm2, %v2702_v1  ;;  %3087 = vst.msk [vmem:[%s4851_s10 + $0x798] sm:$0xff] %vm2843_vm2, %v2830_v2  ;;  %v1894_v8 = vadd.f32 %v5239_v6, %v3910_v5  ;;  %v2534_v9 = vadd.f32 %v5239_v6, %v4102_v7  ;;  %v1888_v10 = vpop.f32.mrb[117].mxu0  ;;  %v2528_v11 = vpop.f32.mrb[117].mxu1 }
 0x206   : > { %2958 = vst.msk [vmem:[%s4851_s10 + $0x390] sm:$0xff] %vm2843_vm2, %v2701_v3  ;;  %3086 = vst.msk [vmem:[%s4851_s10 + $0x790] sm:$0xff] %vm2843_vm2, %v2829_v4  ;;  %v1889_v12 = vadd.f32 %v5239_v6, %v1888_v10  ;;  %v2529_v23 = vadd.f32 %v5628_v13, %v2528_v11 }
 0x207   : > { %v2704_v14 = vmax.f32 %v1894_v8, 0.0  ;;  %v2832_v15 = vmax.f32 %v2534_v9, 0.0 }
 0x208   : > { %v2703_v16 = vmax.f32 %v1889_v12, 0.0  ;;  %v2831_v17 = vmax.f32 %v2529_v23, 0.0  ;;  %v3913_v18 = vpop.f32.mrb[118].mxu0  ;;  %v4105_v19 = vpop.f32.mrb[118].mxu1 }
 0x209   : > { %2961 = vst.msk [vmem:[%s4851_s10 + $0x3a8] sm:$0xff] %vm2843_vm2, %v2704_v14  ;;  %3089 = vst.msk [vmem:[%s4851_s10 + $0x7a8] sm:$0xff] %vm2843_vm2, %v2832_v15  ;;  %v1904_v6 = vadd.f32 %v5628_v13, %v3913_v18  ;;  %v2544_v20 = vadd.f32 %v5628_v13, %v4105_v19  ;;  %v1898_v21 = vpop.f32.mrb[119].mxu0  ;;  %v2538_v22 = vpop.f32.mrb[119].mxu1 }
 0x20a   : > { %2960 = vst.msk [vmem:[%s4851_s10 + $0x3a0] sm:$0xff] %vm2843_vm2, %v2703_v16  ;;  %3088 = vst.msk [vmem:[%s4851_s10 + $0x7a0] sm:$0xff] %vm2843_vm2, %v2831_v17  ;;  %v1899_v24 = vadd.f32 %v5628_v13, %v1898_v21  ;;  %v2539_v25 = vadd.f32 %v5628_v13, %v2538_v22 }
 0x20b   : > { %v2706_v26 = vmax.f32 %v1904_v6, 0.0  ;;  %v2834_v27 = vmax.f32 %v2544_v20, 0.0 }
 0x20c   : > { %v2705_v28 = vmax.f32 %v1899_v24, 0.0  ;;  %v2833_v29 = vmax.f32 %v2539_v25, 0.0  ;;  %v3916_v30 = vpop.f32.mrb[120].mxu0  ;;  %v4108_v31 = vpop.f32.mrb[120].mxu1 }
 0x20d   : > { %2963 = vst.msk [vmem:[%s4851_s10 + $0x3b8] sm:$0xff] %vm2843_vm2, %v2706_v26  ;;  %3091 = vst.msk [vmem:[%s4851_s10 + $0x7b8] sm:$0xff] %vm2843_vm2, %v2834_v27  ;;  %v1914_v32 = vadd.f32 %v5628_v13, %v3916_v30  ;;  %v2554_v33 = vadd.f32 %v5628_v13, %v4108_v31  ;;  %v1908_v34 = vpop.f32.mrb[121].mxu0  ;;  %v2548_v35 = vpop.f32.mrb[121].mxu1 }
 0x20e   : > { %2962 = vst.msk [vmem:[%s4851_s10 + $0x3b0] sm:$0xff] %vm2843_vm2, %v2705_v28  ;;  %3090 = vst.msk [vmem:[%s4851_s10 + $0x7b0] sm:$0xff] %vm2843_vm2, %v2833_v29  ;;  %v1909_v36 = vadd.f32 %v5628_v13, %v1908_v34  ;;  %v2549_v37 = vadd.f32 %v5628_v13, %v2548_v35 }
 0x20f   : > { %v2708_v38 = vmax.f32 %v1914_v32, 0.0  ;;  %v2836_v39 = vmax.f32 %v2554_v33, 0.0 }
 0x210   : > { %v2707_v40 = vmax.f32 %v1909_v36, 0.0  ;;  %v2835_v41 = vmax.f32 %v2549_v37, 0.0  ;;  %v3919_v42 = vpop.f32.mrb[122].mxu0  ;;  %v4111_v43 = vpop.f32.mrb[122].mxu1 }
 0x211   : > { %2965 = vst.msk [vmem:[%s4851_s10 + $0x3c8] sm:$0xff] %vm2843_vm2, %v2708_v38  ;;  %3093 = vst.msk [vmem:[%s4851_s10 + $0x7c8] sm:$0xff] %vm2843_vm2, %v2836_v39  ;;  %v1924_v44 = vadd.f32 %v5628_v13, %v3919_v42  ;;  %v2564_v45 = vadd.f32 %v5628_v13, %v4111_v43  ;;  %v1918_v46 = vpop.f32.mrb[123].mxu0  ;;  %v2558_v47 = vpop.f32.mrb[123].mxu1 }
 0x212   : > { %2964 = vst.msk [vmem:[%s4851_s10 + $0x3c0] sm:$0xff] %vm2843_vm2, %v2707_v40  ;;  %3092 = vst.msk [vmem:[%s4851_s10 + $0x7c0] sm:$0xff] %vm2843_vm2, %v2835_v41  ;;  %v1919_v48 = vadd.f32 %v5628_v13, %v1918_v46  ;;  %v2559_v49 = vadd.f32 %v5628_v13, %v2558_v47 }
 0x213   : > { %v2710_v50 = vmax.f32 %v1924_v44, 0.0  ;;  %v2838_v51 = vmax.f32 %v2564_v45, 0.0 }
 0x214   : > { %v2709_v52 = vmax.f32 %v1919_v48, 0.0  ;;  %v2837_v53 = vmax.f32 %v2559_v49, 0.0  ;;  %v3922_v54 = vpop.f32.mrb[124].mxu0  ;;  %v4114_v55 = vpop.f32.mrb[124].mxu1 }
 0x215   : > { %2967 = vst.msk [vmem:[%s4851_s10 + $0x3d8] sm:$0xff] %vm2843_vm2, %v2710_v50  ;;  %3095 = vst.msk [vmem:[%s4851_s10 + $0x7d8] sm:$0xff] %vm2843_vm2, %v2838_v51  ;;  %v1934_v56 = vadd.f32 %v5628_v13, %v3922_v54  ;;  %v2574_v57 = vadd.f32 %v5628_v13, %v4114_v55  ;;  %v1928_v58 = vpop.f32.mrb[125].mxu0  ;;  %v2568_v59 = vpop.f32.mrb[125].mxu1 }
 0x216   : > { %2966 = vst.msk [vmem:[%s4851_s10 + $0x3d0] sm:$0xff] %vm2843_vm2, %v2709_v52  ;;  %3094 = vst.msk [vmem:[%s4851_s10 + $0x7d0] sm:$0xff] %vm2843_vm2, %v2837_v53  ;;  %v1929_v60 = vadd.f32 %v5628_v13, %v1928_v58  ;;  %v2569_v61 = vadd.f32 %v5628_v13, %v2568_v59 }
 0x217   : > { %v2712_v62 = vmax.f32 %v1934_v56, 0.0  ;;  %v2840_v63 = vmax.f32 %v2574_v57, 0.0 }
 0x218   : > { %v2711_v0 = vmax.f32 %v1929_v60, 0.0  ;;  %v2839_v1 = vmax.f32 %v2569_v61, 0.0  ;;  %v3925_v2 = vpop.f32.mrb[126].mxu0  ;;  %v4117_v3 = vpop.f32.mrb[126].mxu1  ;;  %3107 = sbr.rel (!%p4331_p9) target bundleno = 571 (0x23b), region = 40 }
 0x219   : > { %2969 = vst.msk [vmem:[%s4851_s10 + $0x3e8] sm:$0xff] %vm2843_vm2, %v2712_v62  ;;  %3097 = vst.msk [vmem:[%s4851_s10 + $0x7e8] sm:$0xff] %vm2843_vm2, %v2840_v63  ;;  %v1944_v4 = vadd.f32 %v5628_v13, %v3925_v2  ;;  %v2584_v5 = vadd.f32 %v5628_v13, %v4117_v3  ;;  %v1938_v7 = vpop.f32.mrb[127].mxu0  ;;  %v2578_v8 = vpop.f32.mrb[127].mxu1 }
 0x21a   : > { %2968 = vst.msk [vmem:[%s4851_s10 + $0x3e0] sm:$0xff] %vm2843_vm2, %v2711_v0  ;;  %3096 = vst.msk [vmem:[%s4851_s10 + $0x7e0] sm:$0xff] %vm2843_vm2, %v2839_v1  ;;  %v1939_v9 = vadd.f32 %v5628_v13, %v1938_v7  ;;  %v2579_v10 = vadd.f32 %v5628_v13, %v2578_v8 }
 0x21b   : > { %v2714_v11 = vmax.f32 %v1944_v4, 0.0  ;;  %v2842_v12 = vmax.f32 %v2584_v5, 0.0 }
 0x21c   : > { %v2713_v23 = vmax.f32 %v1939_v9, 0.0  ;;  %v2841_v14 = vmax.f32 %v2579_v10, 0.0 }
 0x21d   : > { %2971 = vst.msk [vmem:[%s4851_s10 + $0x3f8] sm:$0xff] %vm2843_vm2, %v2714_v11  ;;  %3099 = vst.msk [vmem:[%s4851_s10 + $0x7f8] sm:$0xff] %vm2843_vm2, %v2842_v12 }
 0x21e   : > { %2970 = vst.msk [vmem:[%s4851_s10 + $0x3f0] sm:$0xff] %vm2843_vm2, %v2713_v23  ;;  %3098 = vst.msk [vmem:[%s4851_s10 + $0x7f0] sm:$0xff] %vm2843_vm2, %v2841_v14 }
 0x21f   : > { %s5776_s5 = smov (!%p3110_p6, %s3109_s5), 256 }
 0x220   : > { %s5703_s6 = sshll.u32 %s5776_s5, 7 }
 0x221   : > { %s3114_s7 = ssub.s32 32768, %s5703_s6 }
 0x222   : > { %3115 = vsyncadd %s3101_s28, %s3114_s7  ;;  %p3467_p10 = scmp.ne.s32.totalorder %s5703_s6, 0  ;;  %s3474_s23 = sshll.u32 %s4308_s16, 15 }
 0x223   : > { %s5713_s19 = scalar_lea.hbm %s5764_s3, %s3474_s23  ;;  %s3120_s29 = sshll.u32 %s4851_s10, 4  ;;  %s5716_s29 = int_to_ptr.vmem [resolvable:$true] %s3120_s29 }
 0x224   : > { %s4193_s4 = scalar_lea.vmem %s5716_s29, %s5703_s6  ;;  %s4264_s22 = smov [#allocation5]  }
 0x225   : > { %p4194_p9 = scmp.ne.s32.totalorder %s5716_s29, %s4193_s4  ;;  %s4197_s9 = sshll.u32 %s4264_s22, 4  ;;  %s4198_s9 = int_to_ptr.vmem [resolvable:$false] %s4197_s9 }
 0x226   : > { %s4199_s16 = scalar_lea.vmem %s4198_s9, 65536  ;;  %p4200_p12 = scmp.lt.s32.totalorder %s5716_s29, %s4198_s9 }
 0x227   : > { %p4195_p13 = pnand %p4194_p9, %p3467_p10  ;;  %p4201_p0 = scmp.lt.s32.totalorder %s4199_s16, %s4193_s4 }
 0x229   : > { %p4196_p11 = pneg %p4195_p13  ;;  %p4202_p1 = por %p4201_p0, %p4200_p12 }
 0x22b   : > { %p4203_p3 = pnand %p4202_p1, %p4196_p11 }
 0x22d   : > { %4206 = shalt.err (!%p4203_p3)
}
 0x22e   : > { %s4207_s10 = scalar_lea.hbm %s5713_s19, %s5703_s6  ;;  %s4211_s26 = scalar_lea.hbm %s5764_s3, 1440000 }
 0x22f   : > { %p4208_p4 = scmp.ne.s32.totalorder %s5713_s19, %s4207_s10  ;;  %p4212_p7 = scmp.lt.u32.totalorder %s5713_s19, %s5764_s3 }
 0x230   : > { %p4213_p8 = scmp.lt.u32.totalorder %s4211_s26, %s4207_s10  ;;  %p4215_p9 = scmp.lt.u32.totalorder %s4207_s10, %s5713_s19 }
 0x231   : > { %p4209_p5 = pnand %p4208_p4, %p3467_p10 }
 0x232   : > { %p4214_p6 = por %p4213_p8, %p4212_p7 }
 0x233   : > { %p4210_p2 = pneg %p4209_p5 }
 0x234   : > { %p4216_p13 = por %p4215_p9, %p4214_p6 }
 0x236   : > { %p4217_p11 = pnand %p4216_p13, %p4210_p2 }
 0x238   : > { %4220 = shalt.err (!%p4217_p11)
}
 0x239   : > { %s4265_s5 = smov 128   ;;  %s4266_s7 = smov 8  }
 0x23a   : > { %3126 = dma.vmem_to_hbm [thread:$0]  (%p3467_p10), %s5716_s29, %s5703_s6, %s5713_s19, %s3101_s28, %s4265_s5, %s4265_s5, %s4266_s7  }
 0x23b PF: > { %p4126_p12 = scmp.ge.s32.totalorder %s4259_s15, 2  ;;  %s3135_s23 = sand.u32 1, %s4247_s12  }
 0x23c   : > { %p5768_p0 = scmp.ne.s32.totalorder %s5767_s24, 0  ;;  %s3136_s11 = scalar_lea.sflag [#allocation4], %s3135_s23 }
 0x23e   : > { %p4123_p1 = pnand %p4126_p12, %p5768_p0 }
 0x240   : > { %4242 = dma.done.wait (!%p4123_p1), %s3136_s11, 32768  }
 0x241   : > { %4244 = vsyncadd (!%p4123_p1), %s3136_s11, 4294934528  ;;  %p16_p3 = scmp.ge.s32.totalorder %s4312_s18, 46   ;;  %s5769_s12 = smov %s4251_s13 }
 0x242   : > { %s5770_s13 = smov %s4255_s14  ;;  %s5771_s14 = smov %s4324_s21 }
 0x243   : > { %s5772_s15 = smov %s4312_s18  ;;  %18 = sbr.rel (!%p16_p3) target bundleno = 5 (0x5), region = 77 }
 0x24a   :  { %3141 = vsyncpa [#allocation3], 1 }
 0x24b   :  { %3143 = vsyncpa [#allocation3 + $0x1], 1 }
 0x24c   :  { %3144 = vsyncpa [#allocation4], 1 }
 0x24d   :  { %3146 = vsyncpa [#allocation4 + $0x1], 1 }

</bundles_post_ra>
